<compile_context>
chip_gen: v7x
topology: tpu7x:2x2x1
jax: 0.10.0
libtpu: 0.0.40
codegen_flags: <defaults>
</compile_context>

<pallas_src>
import functools

import jax
import jax.numpy as jnp
from jax.experimental import pallas as pl
from jax.experimental.pallas import tpu as pltpu

# Safe on v5e/v6e (128 MiB physical) and v7x (64 MiB physical).
VMEM_LIMIT_BYTES = 64 * 1024 * 1024


def _cparams(semantics):
    return pltpu.CompilerParams(dimension_semantics=semantics,
                                vmem_limit_bytes=VMEM_LIMIT_BYTES)


def _pick_time_tile(T, B, target_rows=512):
    """Largest divisor tt of T with tt*B <= target_rows rows per projection tile."""
    best = 1
    for tt in range(1, T + 1):
        if T % tt == 0 and tt * B <= target_rows:
            best = tt
    return best


# ----------------------------------------------------------------------------
# Pallas kernels
# ----------------------------------------------------------------------------
def input_proj_kernel(*refs, n_in, hidden):
    """Time-parallel input projection for one bi-LSTM layer (one time tile / step).

    Inputs (all 2D, rows = tile_timesteps * B):
      xf_0..xf_{n-1}  : forward-time views of the layer input(s), bf16
      xr_0..xr_{n-1}  : time-REVERSED views of the same input(s), bf16
      wf_i / wr_i     : (I_i, 4H) bf16 weights, gate order (i,f,o,g)
      bf / br         : (1, 4H) f32 biases (b_ih + b_hh), gate order (i,f,o,g)
    Output:
      o_ref           : (rows, 8H) bf16, interleaved [i_f,i_r,f_f,f_r,o_f,o_r,g_f,g_r],
                        with reverse-gate columns already time-reversed so the
                        recurrence only ever reads gx[s].
    """
    H = hidden
    xf = refs[:n_in]
    xr = refs[n_in:2 * n_in]
    wf = refs[2 * n_in:3 * n_in]
    wr = refs[3 * n_in:4 * n_in]
    bf_ref = refs[4 * n_in]
    br_ref = refs[4 * n_in + 1]
    o_ref = refs[4 * n_in + 2]

    def proj(x_refs, w_refs, b_ref):
        acc = None
        for x_ref, w_ref in zip(x_refs, w_refs):
            p = jnp.dot(x_ref[...].astype(w_ref.dtype), w_ref[...],
                        preferred_element_type=jnp.float32)
            acc = p if acc is None else acc + p
        return acc + b_ref[...]                          # (rows, 4H) f32

    g_f = proj(xf, wf, bf_ref)     # forward-direction gates from x[t]
    g_r = proj(xr, wr, br_ref)     # reverse-direction gates from x[T-1-t]

    # Interleave gate blocks into the recurrence layout (static sliced stores;
    # off the serial path, once per tile).
    for k in range(4):
        o_ref[:, (2 * k) * H:(2 * k + 1) * H] = g_f[:, k * H:(k + 1) * H].astype(o_ref.dtype)
        o_ref[:, (2 * k + 1) * H:(2 * k + 2) * H] = g_r[:, k * H:(k + 1) * H].astype(o_ref.dtype)


def bilstm_kernel(*refs, seq_len, hidden, with_head, unroll):
    """Fused bidirectional LSTM recurrence for one layer (one batch tile / step).

    gx layout per row: [i_f,i_r,f_f,f_r,o_f,o_r,g_f,g_r]; reverse-gate columns are
    already time-reversed, so step s reads only gx[s].  The carry h = [h_f | h_r]
    (B, 2H) f32 drives a single (B,2H) x (2H,8H) recurrent matmul per step against
    a block-diagonally packed W_hh.

    Layer-0 variant writes 4 lane-dense outputs per step:
      a[t]   = h_fwd(t)            b[t] = h_rev(t)
      c[t]   = h_fwd(T-1-t)        d[t] = h_rev(T-1-t)     (pre-reversed copies,
    so layer-1's projection consumes them with plain forward index maps).
    Head variant folds the Linear layer into the last step (logits only).
    """
    if with_head:
        gx_ref, whh_ref, lw_ref, lb_ref, logits_ref = refs
    else:
        gx_ref, whh_ref, a_ref, b_ref, c_ref, d_ref = refs

    T, H = seq_len, hidden
    B = gx_ref.shape[1]
    whh = whh_ref[...]                                   # (2H, 8H) bf16, resident

    def step(s, carry):
        h, c = carry                                     # (B, 2H) f32 each
        rs = T - 1 - s
        gates = (gx_ref[s].astype(jnp.float32) +
                 jnp.dot(h.astype(whh.dtype), whh,
                         preferred_element_type=jnp.float32))        # (B, 8H) f32
        sig = jax.nn.sigmoid(gates[:, :6 * H])           # [i_f,i_r,f_f,f_r,o_f,o_r]
        g = jnp.tanh(gates[:, 6 * H:])                   # [g_f,g_r]
        i_g = sig[:, :2 * H]
        f_g = sig[:, 2 * H:4 * H]
        o_g = sig[:, 4 * H:6 * H]
        c_new = f_g * c + i_g * g
        h_new = o_g * jnp.tanh(c_new)                    # (B, 2H) = [h_f | h_r]
        if not with_head:
            hf = h_new[:, :H].astype(a_ref.dtype)
            hr = h_new[:, H:].astype(a_ref.dtype)
            a_ref[s] = hf                                # h_fwd in natural time order
            c_ref[rs] = hf                               # h_fwd time-reversed
            b_ref[rs] = hr                               # h_rev in natural time order
            d_ref[s] = hr                                # h_rev time-reversed
        return h_new, c_new

    init = (jnp.zeros((B, 2 * H), jnp.float32),
            jnp.zeros((B, 2 * H), jnp.float32))
    h_fin, _ = jax.lax.fori_loop(0, T, step, init, unroll=unroll)

    if with_head:
        logits_ref[...] = (jnp.dot(h_fin.astype(lw_ref.dtype), lw_ref[...],
                                   preferred_element_type=jnp.float32)
                           + lb_ref[...])


# ----------------------------------------------------------------------------
# pallas_call wrappers
# ----------------------------------------------------------------------------
def run_input_proj(x_fwd, x_rev, wf, wr, b_f, b_r, T, B):
    """x_* : lists of (T*B, I_i) bf16; returns gx (T*B, 8H) bf16 (interleaved)."""
    n_in = len(x_fwd)
    H = b_f.shape[-1] // 4
    G = 8 * H
    N = T * B
    tt = _pick_time_tile(T, B)
    rows = tt * B
    nt = T // tt

    kernel = functools.partial(input_proj_kernel, n_in=n_in, hidden=H)
    x_specs = [pl.BlockSpec((rows, x.shape[1]), lambda t: (t, 0))
               for x in list(x_fwd) + list(x_rev)]
    w_specs = [pl.BlockSpec(tuple(w.shape), lambda t: (0, 0))
               for w in list(wf) + list(wr)]
    b_specs = [pl.BlockSpec((1, 4 * H), lambda t: (0, 0))] * 2

    return pl.pallas_call(
        kernel,
        out_shape=jax.ShapeDtypeStruct((N, G), jnp.bfloat16),
        grid_spec=pltpu.PrefetchScalarGridSpec(
            num_scalar_prefetch=0,
            grid=(nt,),
            in_specs=x_specs + w_specs + b_specs,
            out_specs=pl.BlockSpec((rows, G), lambda t: (t, 0))),
        compiler_params=_cparams(("parallel",)),
    )(*x_fwd, *x_rev, *wf, *wr, b_f, b_r)


def run_bilstm_layer(gx, whh):
    """gx: (T, B, 8H) bf16 -> 4 outputs (T, B, H) bf16: h_fwd, h_rev and their
    time-reversed copies (so the next layer's projection needs no flip/concat)."""
    T, B, G = gx.shape
    H = G // 8
    nb = 2 if (B % 16 == 0) else 1        # v7x: 2 TC-parallel batch tiles
    Bt = B // nb
    # TODO(synk): for production T*B*H, stream gx / outputs from HBM
    # (memory_space=pl.ANY + make_async_copy double-buffering) instead of keeping
    # them VMEM-resident — required on v7x's 64 MiB VMEM.
    kernel = functools.partial(bilstm_kernel, seq_len=T, hidden=H,
                               with_head=False, unroll=min(T, 8))
    out_sd = jax.ShapeDtypeStruct((T, B, H), jnp.bfloat16)
    out_spec = pl.BlockSpec((T, Bt, H), lambda b: (0, b, 0))
    return pl.pallas_call(
        kernel,
        out_shape=(out_sd, out_sd, out_sd, out_sd),
        grid_spec=pltpu.PrefetchScalarGridSpec(
            num_scalar_prefetch=0,
            grid=(nb,),
            in_specs=[pl.BlockSpec((T, Bt, G), lambda b: (0, b, 0)),
                      pl.BlockSpec((2 * H, G), lambda b: (0, 0))],
            out_specs=(out_spec, out_spec, out_spec, out_spec)),
        compiler_params=_cparams(("parallel",)),
    )(gx, whh)


def run_bilstm_head(gx, whh, lin_w, lin_b):
    """Last layer: recurrence + folded Linear head. Only logits (B, O) leave VMEM."""
    T, B, G = gx.shape
    H = G // 8
    O = lin_w.shape[1]
    nb = 2 if (B % 16 == 0) else 1
    Bt = B // nb
    kernel = functools.partial(bilstm_kernel, seq_len=T, hidden=H,
                               with_head=True, unroll=min(T, 8))
    return pl.pallas_call(
        kernel,
        out_shape=jax.ShapeDtypeStruct((B, O), jnp.float32),
        grid_spec=pltpu.PrefetchScalarGridSpec(
            num_scalar_prefetch=0,
            grid=(nb,),
            in_specs=[pl.BlockSpec((T, Bt, G), lambda b: (0, b, 0)),
                      pl.BlockSpec((2 * H, G), lambda b: (0, 0)),
                      pl.BlockSpec((2 * H, O), lambda b: (0, 0)),
                      pl.BlockSpec((1, O), lambda b: (0, 0))],
            out_specs=pl.BlockSpec((Bt, O), lambda b: (b, 0))),
        compiler_params=_cparams(("parallel",)),
    )(gx, whh, lin_w, lin_b)


# ----------------------------------------------------------------------------
# Weight repacking (PyTorch layout -> fused kernel layout), done once.
# ----------------------------------------------------------------------------
_GATE_PERM = (0, 1, 3, 2)   # PyTorch (i,f,g,o) -> kernel (i,f,o,g)


def _reorder_gates(a, H):
    """Reorder the trailing 4H axis from (i,f,g,o) to (i,f,o,g)."""
    return jnp.concatenate([a[..., p * H:(p + 1) * H] for p in _GATE_PERM], axis=-1)


def _blockdiag_hh(u_f, u_r, H):
    """(H,4H)+(H,4H) (gate order i,f,o,g) -> (2H,8H): rows 0:H drive forward gate
    columns (even H-blocks), rows H:2H drive reverse gate columns (odd H-blocks)."""
    z = jnp.zeros((H, H), u_f.dtype)
    top, bot = [], []
    for k in range(4):
        top += [u_f[:, k * H:(k + 1) * H], z]
        bot += [z, u_r[:, k * H:(k + 1) * H]]
    return jnp.concatenate([jnp.concatenate(top, axis=1),
                            jnp.concatenate(bot, axis=1)], axis=0)


def prepare_params(params):
    """Pack raw (PyTorch-layout) params into the fused-kernel layout (weights bf16)."""
    H = params["lstm"][(0, 0)][1].shape[0]
    prep = {"embed": params["embed"].astype(jnp.bfloat16), "layers": []}
    for layer in range(2):
        w_f, u_f, b_f = params["lstm"][(layer, 0)]
        w_r, u_r, b_r = params["lstm"][(layer, 1)]
        wf = _reorder_gates(w_f, H).astype(jnp.bfloat16)         # (I, 4H)
        wr = _reorder_gates(w_r, H).astype(jnp.bfloat16)
        bf = _reorder_gates(b_f, H).reshape(1, 4 * H)            # f32
        br = _reorder_gates(b_r, H).reshape(1, 4 * H)
        whh = _blockdiag_hh(_reorder_gates(u_f, H),
                            _reorder_gates(u_r, H), H).astype(jnp.bfloat16)
        if layer == 0:
            wf_list, wr_list = [wf], [wr]
        else:
            # Layer-1 input is [h_fwd | h_rev]; split the 2H input rows so the
            # projection kernel can consume the two per-direction outputs directly.
            wf_list, wr_list = [wf[:H], wf[H:]], [wr[:H], wr[H:]]
        prep["layers"].append({"wf": wf_list, "wr": wr_list, "bf": bf, "br": br,
                               "whh": whh})
    # Module: hidden = cat([hidden[-1], hidden[-2]]) = [rev | fwd]; kernel carry is
    # [fwd | rev], so permute the Linear weight rows accordingly.
    w_t = params["lin_w_t"]                                      # (2H, O)
    prep["lin_w"] = jnp.concatenate([w_t[H:], w_t[:H]], axis=0).astype(jnp.bfloat16)
    prep["lin_b"] = params["lin_b"].reshape(1, -1)
    return prep


# ----------------------------------------------------------------------------
# Full forward pass (matches RNNModel.forward, eval mode)
# ----------------------------------------------------------------------------
def rnn_forward(text, prep):
    T, B = text.shape
    H = prep["layers"][0]["whh"].shape[0] // 2

    # Pad batch to sublane / MXU-row granularity (multiple of 8); padded rows are
    # independent and sliced off at the end.
    Bp = max(8, ((B + 7) // 8) * 8)
    if Bp != B:
        text = jnp.pad(text, ((0, 0), (0, Bp - B)))

    # Embedding lookup (gather) stays in XLA glue; table stored in bf16.
    # TODO(synk): scalar-prefetch gather kernel for the embedding if it ever matters.
    emb = prep["embed"]
    x_f = jnp.take(emb, text, axis=0)                            # (T, Bp, E) bf16
    x_r = jnp.take(emb, text[::-1], axis=0)                      # time-reversed view
    E = x_f.shape[-1]
    # dropout -> identity (eval mode)

    # ---- layer 0 ----
    L0 = prep["layers"][0]
    gx0 = run_input_proj([x_f.reshape(T * Bp, E)], [x_r.reshape(T * Bp, E)],
                         L0["wf"], L0["wr"], L0["bf"], L0["br"], T, Bp)
    gx0 = gx0.reshape(T, Bp, 8 * H)
    a, b, c, d = run_bilstm_layer(gx0, L0["whh"])                # each (T, Bp, H) bf16

    # ---- layer 1 (+ folded Linear head) ----
    L1 = prep["layers"][1]
    gx1 = run_input_proj([a.reshape(T * Bp, H), b.reshape(T * Bp, H)],
                         [c.reshape(T * Bp, H), d.reshape(T * Bp, H)],
                         L1["wf"], L1["wr"], L1["bf"], L1["br"], T, Bp)
    gx1 = gx1.reshape(T, Bp, 8 * H)
    logits = run_bilstm_head(gx1, L1["whh"], prep["lin_w"], prep["lin_b"])

    # dropout -> identity.
    # TODO(synk): PyTorch's .squeeze() drops the batch dim when B == 1; here the
    # output keeps shape (B, O).
    return logits[:B]


# ----------------------------------------------------------------------------
# Pure-JAX f32 reference (lax.scan), PyTorch semantics
# ----------------------------------------------------------------------------
def _lstm_dir_ref(x, w_ih_t, w_hh_t, b, reverse):
    T, B, _ = x.shape
    H = w_hh_t.shape[0]
    xs = x[::-1] if reverse else x

    def step(carry, xt):
        h, c = carry
        g = xt @ w_ih_t + h @ w_hh_t + b
        i, f, gg, o = jnp.split(g, 4, axis=-1)
        i, f, o = jax.nn.sigmoid(i), jax.nn.sigmoid(f), jax.nn.sigmoid(o)
        gg = jnp.tanh(gg)
        c = f * c + i * gg
        h = o * jnp.tanh(c)
        return (h, c), h

    (hN, _), hs = jax.lax.scan(step, (jnp.zeros((B, H)), jnp.zeros((B, H))), xs)
    if reverse:
        hs = hs[::-1]
    return hs, hN


def rnn_forward_ref(text, params):
    x = jnp.take(params["embed"], text, axis=0)
    for layer in range(2):
        wf, uf, bf = params["lstm"][(layer, 0)]
        wr, ur, br = params["lstm"][(layer, 1)]
        out_f, h_f = _lstm_dir_ref(x, wf, uf, bf, False)
        out_r, h_r = _lstm_dir_ref(x, wr, ur, br, True)
        x = jnp.concatenate([out_f, out_r], axis=-1)
    hidden = jnp.concatenate([h_r, h_f], axis=1)   # cat([hidden[-1], hidden[-2]])
    return hidden @ params["lin_w_t"] + params["lin_b"]


# ----------------------------------------------------------------------------
# Deterministic parameter init (shapes match the nn.Module __init__)
# ----------------------------------------------------------------------------
def init_params(vocab_size, embedding_size, hidden_size, output_size, seed=42):
    key = jax.random.PRNGKey(seed)
    keys = iter(jax.random.split(key, 64))
    H = hidden_size
    bound = 1.0 / float(H) ** 0.5

    def unif(shape, b):
        return jax.random.uniform(next(keys), shape, jnp.float32, -b, b)

    params = {"embed": jax.random.normal(next(keys), (vocab_size, embedding_size),
                                         jnp.float32)}
    lstm = {}
    for layer in range(2):
        in_sz = embedding_size if layer == 0 else 2 * H
        for direction in range(2):
            w_ih_t = unif((in_sz, 4 * H), bound)   # transposed weight_ih_l{l}[_reverse]
            w_hh_t = unif((H, 4 * H), bound)       # transposed weight_hh_l{l}[_reverse]
            b = unif((4 * H,), bound) + unif((4 * H,), bound)  # bias_ih + bias_hh
            lstm[(layer, direction)] = (w_ih_t, w_hh_t, b)
    params["lstm"] = lstm

    lin_bound = 1.0 / float(2 * H) ** 0.5
    params["lin_w_t"] = unif((2 * H, output_size), lin_bound)   # transposed Linear weight
    params["lin_b"] = unif((output_size,), lin_bound)
    return params


# ----------------------------------------------------------------------------
if __name__ == "__main__":
    VOCAB, EMB, HID, OUT = 50, 32, 32, 8
    SEQ, BATCH = 8, 2

    params = init_params(VOCAB, EMB, HID, OUT)
    prep = prepare_params(params)
    text = jax.random.randint(jax.random.PRNGKey(0), (SEQ, BATCH), 0, VOCAB,
                              dtype=jnp.int32)

    out = jax.jit(rnn_forward)(text, prep)
    out = jax.block_until_ready(out)
    assert out.shape == (BATCH, OUT)

    ref = rnn_forward_ref(text, params)
    # Kernels use bf16 MXU operands and bf16 intermediate activations (f32
    # accumulation / gate math / carries); compare against the full-f32 reference
    # with a bf16-appropriate tolerance.
    assert jnp.allclose(out, ref, atol=5e-2, rtol=5e-2), (out, ref)

    print("KERNEL_OK")
</pallas_src>

<mosaic_0001>
module attributes {stable_mosaic.version = 11 : i64} {
  func.func @input_proj_kernel(%arg0: i32, %arg1: memref<64x32xbf16, #tpu.memory_space<vmem>>, %arg2: memref<64x32xbf16, #tpu.memory_space<vmem>>, %arg3: memref<32x128xbf16, #tpu.memory_space<vmem>>, %arg4: memref<32x128xbf16, #tpu.memory_space<vmem>>, %arg5: memref<1x128xf32, #tpu.memory_space<vmem>>, %arg6: memref<1x128xf32, #tpu.memory_space<vmem>>, %arg7: memref<64x256xbf16, #tpu.memory_space<vmem>>) attributes {dimension_semantics = [#tpu.dimension_semantics<parallel>], iteration_bounds = array<i64: 1>, scalar_prefetch = 0 : i64, scratch_operands = 0 : i64, tpu.core_type = #tpu.core_type<tc>, window_params = [{transform_indices = @transform_0, window_bounds = array<i64: 64, 32>}, {transform_indices = @transform_1, window_bounds = array<i64: 64, 32>}, {pipeline_mode = #tpu.pipeline_mode<synchronous>, transform_indices = @transform_2, window_bounds = array<i64: 32, 128>}, {pipeline_mode = #tpu.pipeline_mode<synchronous>, transform_indices = @transform_3, window_bounds = array<i64: 32, 128>}, {pipeline_mode = #tpu.pipeline_mode<synchronous>, transform_indices = @transform_4, window_bounds = array<i64: 1, 128>}, {pipeline_mode = #tpu.pipeline_mode<synchronous>, transform_indices = @transform_5, window_bounds = array<i64: 1, 128>}, {transform_indices = @transform_6, window_bounds = array<i64: 64, 256>}]} {
    %c0 = arith.constant 0 : index
    %c0_0 = arith.constant 0 : index
    %0 = vector.load %arg1[%c0, %c0_0] : memref<64x32xbf16, #tpu.memory_space<vmem>>, vector<64x32xbf16>
    %c0_1 = arith.constant 0 : index
    %c0_2 = arith.constant 0 : index
    %1 = vector.load %arg3[%c0_1, %c0_2] : memref<32x128xbf16, #tpu.memory_space<vmem>>, vector<32x128xbf16>
    %cst = arith.constant dense<0.000000e+00> : vector<64x128xf32>
    %2 = tpu.matmul %0, %1, %cst {dimension_numbers = #tpu.dot_dimension_numbers<[1], [0], [0], [1], [0, 0, 1, 1], [], []>} : vector<64x32xbf16>, vector<32x128xbf16>, vector<64x128xf32> -> vector<64x128xf32>
    %c0_3 = arith.constant 0 : index
    %c0_4 = arith.constant 0 : index
    %3 = vector.load %arg5[%c0_3, %c0_4] : memref<1x128xf32, #tpu.memory_space<vmem>>, vector<1x128xf32>
    %4 = vector.broadcast %3 : vector<1x128xf32> to vector<64x128xf32>
    %5 = arith.addf %2, %4 : vector<64x128xf32>
    %c0_5 = arith.constant 0 : index
    %c0_6 = arith.constant 0 : index
    %6 = vector.load %arg2[%c0_5, %c0_6] : memref<64x32xbf16, #tpu.memory_space<vmem>>, vector<64x32xbf16>
    %c0_7 = arith.constant 0 : index
    %c0_8 = arith.constant 0 : index
    %7 = vector.load %arg4[%c0_7, %c0_8] : memref<32x128xbf16, #tpu.memory_space<vmem>>, vector<32x128xbf16>
    %cst_9 = arith.constant dense<0.000000e+00> : vector<64x128xf32>
    %8 = tpu.matmul %6, %7, %cst_9 {dimension_numbers = #tpu.dot_dimension_numbers<[1], [0], [0], [1], [0, 0, 1, 1], [], []>} : vector<64x32xbf16>, vector<32x128xbf16>, vector<64x128xf32> -> vector<64x128xf32>
    %c0_10 = arith.constant 0 : index
    %c0_11 = arith.constant 0 : index
    %9 = vector.load %arg6[%c0_10, %c0_11] : memref<1x128xf32, #tpu.memory_space<vmem>>, vector<1x128xf32>
    %10 = vector.broadcast %9 : vector<1x128xf32> to vector<64x128xf32>
    %11 = arith.addf %8, %10 : vector<64x128xf32>
    %12 = vector.extract_strided_slice %5 {offsets = [0, 0], sizes = [64, 32], strides = [1, 1]} : vector<64x128xf32> to vector<64x32xf32>
    %13 = arith.truncf %12 : vector<64x32xf32> to vector<64x32xbf16>
    %c0_12 = arith.constant 0 : index
    %c0_13 = arith.constant 0 : index
    %14 = vector.load %arg7[%c0_12, %c0_13] : memref<64x256xbf16, #tpu.memory_space<vmem>>, vector<64x32xbf16>
    tpu.vector_store %arg7[%c0_12, %c0_13], %13 {strides = array<i32>} : memref<64x256xbf16, #tpu.memory_space<vmem>>, vector<64x32xbf16>,
    %15 = vector.extract_strided_slice %11 {offsets = [0, 0], sizes = [64, 32], strides = [1, 1]} : vector<64x128xf32> to vector<64x32xf32>
    %16 = arith.truncf %15 : vector<64x32xf32> to vector<64x32xbf16>
    %c0_14 = arith.constant 0 : index
    %c32 = arith.constant 32 : index
    %17 = vector.load %arg7[%c0_14, %c32] : memref<64x256xbf16, #tpu.memory_space<vmem>>, vector<64x32xbf16>
    tpu.vector_store %arg7[%c0_14, %c32], %16 {strides = array<i32>} : memref<64x256xbf16, #tpu.memory_space<vmem>>, vector<64x32xbf16>,
    %18 = vector.extract_strided_slice %5 {offsets = [0, 32], sizes = [64, 32], strides = [1, 1]} : vector<64x128xf32> to vector<64x32xf32>
    %19 = arith.truncf %18 : vector<64x32xf32> to vector<64x32xbf16>
    %c0_15 = arith.constant 0 : index
    %c64 = arith.constant 64 : index
    %20 = vector.load %arg7[%c0_15, %c64] : memref<64x256xbf16, #tpu.memory_space<vmem>>, vector<64x32xbf16>
    tpu.vector_store %arg7[%c0_15, %c64], %19 {strides = array<i32>} : memref<64x256xbf16, #tpu.memory_space<vmem>>, vector<64x32xbf16>,
    %21 = vector.extract_strided_slice %11 {offsets = [0, 32], sizes = [64, 32], strides = [1, 1]} : vector<64x128xf32> to vector<64x32xf32>
    %22 = arith.truncf %21 : vector<64x32xf32> to vector<64x32xbf16>
    %c0_16 = arith.constant 0 : index
    %c96 = arith.constant 96 : index
    %23 = vector.load %arg7[%c0_16, %c96] : memref<64x256xbf16, #tpu.memory_space<vmem>>, vector<64x32xbf16>
    tpu.vector_store %arg7[%c0_16, %c96], %22 {strides = array<i32>} : memref<64x256xbf16, #tpu.memory_space<vmem>>, vector<64x32xbf16>,
    %24 = vector.extract_strided_slice %5 {offsets = [0, 64], sizes = [64, 32], strides = [1, 1]} : vector<64x128xf32> to vector<64x32xf32>
    %25 = arith.truncf %24 : vector<64x32xf32> to vector<64x32xbf16>
    %c0_17 = arith.constant 0 : index
    %c128 = arith.constant 128 : index
    %26 = vector.load %arg7[%c0_17, %c128] : memref<64x256xbf16, #tpu.memory_space<vmem>>, vector<64x32xbf16>
    tpu.vector_store %arg7[%c0_17, %c128], %25 {strides = array<i32>} : memref<64x256xbf16, #tpu.memory_space<vmem>>, vector<64x32xbf16>,
    %27 = vector.extract_strided_slice %11 {offsets = [0, 64], sizes = [64, 32], strides = [1, 1]} : vector<64x128xf32> to vector<64x32xf32>
    %28 = arith.truncf %27 : vector<64x32xf32> to vector<64x32xbf16>
    %c0_18 = arith.constant 0 : index
    %c160 = arith.constant 160 : index
    %29 = vector.load %arg7[%c0_18, %c160] : memref<64x256xbf16, #tpu.memory_space<vmem>>, vector<64x32xbf16>
    tpu.vector_store %arg7[%c0_18, %c160], %28 {strides = array<i32>} : memref<64x256xbf16, #tpu.memory_space<vmem>>, vector<64x32xbf16>,
    %30 = vector.extract_strided_slice %5 {offsets = [0, 96], sizes = [64, 32], strides = [1, 1]} : vector<64x128xf32> to vector<64x32xf32>
    %31 = arith.truncf %30 : vector<64x32xf32> to vector<64x32xbf16>
    %c0_19 = arith.constant 0 : index
    %c192 = arith.constant 192 : index
    %32 = vector.load %arg7[%c0_19, %c192] : memref<64x256xbf16, #tpu.memory_space<vmem>>, vector<64x32xbf16>
    tpu.vector_store %arg7[%c0_19, %c192], %31 {strides = array<i32>} : memref<64x256xbf16, #tpu.memory_space<vmem>>, vector<64x32xbf16>,
    %33 = vector.extract_strided_slice %11 {offsets = [0, 96], sizes = [64, 32], strides = [1, 1]} : vector<64x128xf32> to vector<64x32xf32>
    %34 = arith.truncf %33 : vector<64x32xf32> to vector<64x32xbf16>
    %c0_20 = arith.constant 0 : index
    %c224 = arith.constant 224 : index
    %35 = vector.load %arg7[%c0_20, %c224] : memref<64x256xbf16, #tpu.memory_space<vmem>>, vector<64x32xbf16>
    tpu.vector_store %arg7[%c0_20, %c224], %34 {strides = array<i32>} : memref<64x256xbf16, #tpu.memory_space<vmem>>, vector<64x32xbf16>,
    return
  }
  func.func @transform_0(%arg0: i32) -> (i32, i32) {
    %c0_i32 = arith.constant 0 : i32
    %c0_i32_0 = arith.constant 0 : i32
    return %arg0, %c0_i32 : i32, i32
  }
  func.func @transform_1(%arg0: i32) -> (i32, i32) {
    %c0_i32 = arith.constant 0 : i32
    %c0_i32_0 = arith.constant 0 : i32
    return %arg0, %c0_i32 : i32, i32
  }
  func.func @transform_2(%arg0: i32) -> (i32, i32) {
    %c0_i32 = arith.constant 0 : i32
    %c0_i32_0 = arith.constant 0 : i32
    %c0_i32_1 = arith.constant 0 : i32
    return %c0_i32, %c0_i32_0 : i32, i32
  }
  func.func @transform_3(%arg0: i32) -> (i32, i32) {
    %c0_i32 = arith.constant 0 : i32
    %c0_i32_0 = arith.constant 0 : i32
    %c0_i32_1 = arith.constant 0 : i32
    return %c0_i32, %c0_i32_0 : i32, i32
  }
  func.func @transform_4(%arg0: i32) -> (i32, i32) {
    %c0_i32 = arith.constant 0 : i32
    %c0_i32_0 = arith.constant 0 : i32
    %c0_i32_1 = arith.constant 0 : i32
    return %c0_i32, %c0_i32_0 : i32, i32
  }
  func.func @transform_5(%arg0: i32) -> (i32, i32) {
    %c0_i32 = arith.constant 0 : i32
    %c0_i32_0 = arith.constant 0 : i32
    %c0_i32_1 = arith.constant 0 : i32
    return %c0_i32, %c0_i32_0 : i32, i32
  }
  func.func @transform_6(%arg0: i32) -> (i32, i32) {
    %c0_i32 = arith.constant 0 : i32
    %c0_i32_0 = arith.constant 0 : i32
    return %arg0, %c0_i32 : i32, i32
  }
}

module attributes {stable_mosaic.version = 11 : i64} {
  func.func @bilstm_kernel(%arg0: i32, %arg1: memref<8x8x256xbf16, #tpu.memory_space<vmem>>, %arg2: memref<64x256xbf16, #tpu.memory_space<vmem>>, %arg3: memref<8x8x32xbf16, #tpu.memory_space<vmem>>, %arg4: memref<8x8x32xbf16, #tpu.memory_space<vmem>>, %arg5: memref<8x8x32xbf16, #tpu.memory_space<vmem>>, %arg6: memref<8x8x32xbf16, #tpu.memory_space<vmem>>) attributes {dimension_semantics = [#tpu.dimension_semantics<parallel>], iteration_bounds = array<i64: 1>, scalar_prefetch = 0 : i64, scratch_operands = 0 : i64, tpu.core_type = #tpu.core_type<tc>, window_params = [{transform_indices = @transform_0, window_bounds = array<i64: 8, 8, 256>}, {pipeline_mode = #tpu.pipeline_mode<synchronous>, transform_indices = @transform_1, window_bounds = array<i64: 64, 256>}, {transform_indices = @transform_2, window_bounds = array<i64: 8, 8, 32>}, {transform_indices = @transform_3, window_bounds = array<i64: 8, 8, 32>}, {transform_indices = @transform_4, window_bounds = array<i64: 8, 8, 32>}, {transform_indices = @transform_5, window_bounds = array<i64: 8, 8, 32>}]} {
    %c0 = arith.constant 0 : index
    %c0_0 = arith.constant 0 : index
    %0 = vector.load %arg2[%c0, %c0_0] : memref<64x256xbf16, #tpu.memory_space<vmem>>, vector<64x256xbf16>
    %cst = arith.constant 0.000000e+00 : f32
    %1 = vector.broadcast %cst : f32 to vector<8x64xf32>
    %cst_1 = arith.constant 0.000000e+00 : f32
    %2 = vector.broadcast %cst_1 : f32 to vector<8x64xf32>
    %c0_i32 = arith.constant 0 : i32
    %c7_i32 = arith.constant 7 : i32
    %3 = arith.subi %c7_i32, %c0_i32 : i32
    %4 = arith.index_cast %c0_i32 : i32 to index
    %c0_2 = arith.constant 0 : index
    %c0_3 = arith.constant 0 : index
    %5 = vector.load %arg1[%4, %c0_2, %c0_3] : memref<8x8x256xbf16, #tpu.memory_space<vmem>>, vector<1x8x256xbf16>
    %6 = vector.shape_cast %5 : vector<1x8x256xbf16> to vector<8x256xbf16>
    %7 = arith.extf %6 : vector<8x256xbf16> to vector<8x256xf32>
    %8 = arith.truncf %1 : vector<8x64xf32> to vector<8x64xbf16>
    %cst_4 = arith.constant dense<0.000000e+00> : vector<8x256xf32>
    %9 = tpu.matmul %8, %0, %cst_4 {dimension_numbers = #tpu.dot_dimension_numbers<[1], [0], [0], [1], [0, 0, 1, 1], [], []>} : vector<8x64xbf16>, vector<64x256xbf16>, vector<8x256xf32> -> vector<8x256xf32>
    %10 = arith.addf %7, %9 : vector<8x256xf32>
    %11 = vector.extract_strided_slice %10 {offsets = [0, 0], sizes = [8, 192], strides = [1, 1]} : vector<8x256xf32> to vector<8x192xf32>
    %12 = arith.negf %11 : vector<8x192xf32>
    %13 = math.exp %12 : vector<8x192xf32>
    %cst_5 = arith.constant 1.000000e+00 : f32
    %14 = vector.broadcast %cst_5 : f32 to vector<8x192xf32>
    %15 = arith.addf %14, %13 : vector<8x192xf32>
    %16 = arith.divf %14, %15 : vector<8x192xf32>
    %17 = vector.extract_strided_slice %10 {offsets = [0, 192], sizes = [8, 64], strides = [1, 1]} : vector<8x256xf32> to vector<8x64xf32>
    %18 = math.tanh %17 : vector<8x64xf32>
    %19 = vector.extract_strided_slice %16 {offsets = [0, 0], sizes = [8, 64], strides = [1, 1]} : vector<8x192xf32> to vector<8x64xf32>
    %20 = vector.extract_strided_slice %16 {offsets = [0, 64], sizes = [8, 64], strides = [1, 1]} : vector<8x192xf32> to vector<8x64xf32>
    %21 = vector.extract_strided_slice %16 {offsets = [0, 128], sizes = [8, 64], strides = [1, 1]} : vector<8x192xf32> to vector<8x64xf32>
    %22 = arith.mulf %20, %2 : vector<8x64xf32>
    %23 = arith.mulf %19, %18 : vector<8x64xf32>
    %24 = arith.addf %22, %23 : vector<8x64xf32>
    %25 = math.tanh %24 : vector<8x64xf32>
    %26 = arith.mulf %21, %25 : vector<8x64xf32>
    %27 = vector.extract_strided_slice %26 {offsets = [0, 0], sizes = [8, 32], strides = [1, 1]} : vector<8x64xf32> to vector<8x32xf32>
    %28 = arith.truncf %27 : vector<8x32xf32> to vector<8x32xbf16>
    %29 = vector.extract_strided_slice %26 {offsets = [0, 32], sizes = [8, 32], strides = [1, 1]} : vector<8x64xf32> to vector<8x32xf32>
    %30 = arith.truncf %29 : vector<8x32xf32> to vector<8x32xbf16>
    %31 = arith.index_cast %c0_i32 : i32 to index
    %c0_6 = arith.constant 0 : index
    %c0_7 = arith.constant 0 : index
    %32 = vector.load %arg3[%31, %c0_6, %c0_7] : memref<8x8x32xbf16, #tpu.memory_space<vmem>>, vector<1x8x32xbf16>
    %33 = vector.shape_cast %32 : vector<1x8x32xbf16> to vector<8x32xbf16>
    %34 = vector.shape_cast %28 : vector<8x32xbf16> to vector<1x8x32xbf16>
    tpu.vector_store %arg3[%31, %c0_6, %c0_7], %34 {strides = array<i32>} : memref<8x8x32xbf16, #tpu.memory_space<vmem>>, vector<1x8x32xbf16>,
    %35 = arith.index_cast %3 : i32 to index
    %c0_8 = arith.constant 0 : index
    %c0_9 = arith.constant 0 : index
    %36 = vector.load %arg5[%35, %c0_8, %c0_9] : memref<8x8x32xbf16, #tpu.memory_space<vmem>>, vector<1x8x32xbf16>
    %37 = vector.shape_cast %36 : vector<1x8x32xbf16> to vector<8x32xbf16>
    %38 = vector.shape_cast %28 : vector<8x32xbf16> to vector<1x8x32xbf16>
    tpu.vector_store %arg5[%35, %c0_8, %c0_9], %38 {strides = array<i32>} : memref<8x8x32xbf16, #tpu.memory_space<vmem>>, vector<1x8x32xbf16>,
    %39 = arith.index_cast %3 : i32 to index
    %c0_10 = arith.constant 0 : index
    %c0_11 = arith.constant 0 : index
    %40 = vector.load %arg4[%39, %c0_10, %c0_11] : memref<8x8x32xbf16, #tpu.memory_space<vmem>>, vector<1x8x32xbf16>
    %41 = vector.shape_cast %40 : vector<1x8x32xbf16> to vector<8x32xbf16>
    %42 = vector.shape_cast %30 : vector<8x32xbf16> to vector<1x8x32xbf16>
    tpu.vector_store %arg4[%39, %c0_10, %c0_11], %42 {strides = array<i32>} : memref<8x8x32xbf16, #tpu.memory_space<vmem>>, vector<1x8x32xbf16>,
    %43 = arith.index_cast %c0_i32 : i32 to index
    %c0_12 = arith.constant 0 : index
    %c0_13 = arith.constant 0 : index
    %44 = vector.load %arg6[%43, %c0_12, %c0_13] : memref<8x8x32xbf16, #tpu.memory_space<vmem>>, vector<1x8x32xbf16>
    %45 = vector.shape_cast %44 : vector<1x8x32xbf16> to vector<8x32xbf16>
    %46 = vector.shape_cast %30 : vector<8x32xbf16> to vector<1x8x32xbf16>
    tpu.vector_store %arg6[%43, %c0_12, %c0_13], %46 {strides = array<i32>} : memref<8x8x32xbf16, #tpu.memory_space<vmem>>, vector<1x8x32xbf16>,
    %c1_i32 = arith.constant 1 : i32
    %c7_i32_14 = arith.constant 7 : i32
    %47 = arith.subi %c7_i32_14, %c1_i32 : i32
    %48 = arith.index_cast %c1_i32 : i32 to index
    %c0_15 = arith.constant 0 : index
    %c0_16 = arith.constant 0 : index
    %49 = vector.load %arg1[%48, %c0_15, %c0_16] : memref<8x8x256xbf16, #tpu.memory_space<vmem>>, vector<1x8x256xbf16>
    %50 = vector.shape_cast %49 : vector<1x8x256xbf16> to vector<8x256xbf16>
    %51 = arith.extf %50 : vector<8x256xbf16> to vector<8x256xf32>
    %52 = arith.truncf %26 : vector<8x64xf32> to vector<8x64xbf16>
    %cst_17 = arith.constant dense<0.000000e+00> : vector<8x256xf32>
    %53 = tpu.matmul %52, %0, %cst_17 {dimension_numbers = #tpu.dot_dimension_numbers<[1], [0], [0], [1], [0, 0, 1, 1], [], []>} : vector<8x64xbf16>, vector<64x256xbf16>, vector<8x256xf32> -> vector<8x256xf32>
    %54 = arith.addf %51, %53 : vector<8x256xf32>
    %55 = vector.extract_strided_slice %54 {offsets = [0, 0], sizes = [8, 192], strides = [1, 1]} : vector<8x256xf32> to vector<8x192xf32>
    %56 = arith.negf %55 : vector<8x192xf32>
    %57 = math.exp %56 : vector<8x192xf32>
    %cst_18 = arith.constant 1.000000e+00 : f32
    %58 = vector.broadcast %cst_18 : f32 to vector<8x192xf32>
    %59 = arith.addf %58, %57 : vector<8x192xf32>
    %60 = arith.divf %58, %59 : vector<8x192xf32>
    %61 = vector.extract_strided_slice %54 {offsets = [0, 192], sizes = [8, 64], strides = [1, 1]} : vector<8x256xf32> to vector<8x64xf32>
    %62 = math.tanh %61 : vector<8x64xf32>
    %63 = vector.extract_strided_slice %60 {offsets = [0, 0], sizes = [8, 64], strides = [1, 1]} : vector<8x192xf32> to vector<8x64xf32>
    %64 = vector.extract_strided_slice %60 {offsets = [0, 64], sizes = [8, 64], strides = [1, 1]} : vector<8x192xf32> to vector<8x64xf32>
    %65 = vector.extract_strided_slice %60 {offsets = [0, 128], sizes = [8, 64], strides = [1, 1]} : vector<8x192xf32> to vector<8x64xf32>
    %66 = arith.mulf %64, %24 : vector<8x64xf32>
    %67 = arith.mulf %63, %62 : vector<8x64xf32>
    %68 = arith.addf %66, %67 : vector<8x64xf32>
    %69 = math.tanh %68 : vector<8x64xf32>
    %70 = arith.mulf %65, %69 : vector<8x64xf32>
    %71 = vector.extract_strided_slice %70 {offsets = [0, 0], sizes = [8, 32], strides = [1, 1]} : vector<8x64xf32> to vector<8x32xf32>
    %72 = arith.truncf %71 : vector<8x32xf32> to vector<8x32xbf16>
    %73 = vector.extract_strided_slice %70 {offsets = [0, 32], sizes = [8, 32], strides = [1, 1]} : vector<8x64xf32> to vector<8x32xf32>
    %74 = arith.truncf %73 : vector<8x32xf32> to vector<8x32xbf16>
    %75 = arith.index_cast %c1_i32 : i32 to index
    %c0_19 = arith.constant 0 : index
    %c0_20 = arith.constant 0 : index
    %76 = vector.load %arg3[%75, %c0_19, %c0_20] : memref<8x8x32xbf16, #tpu.memory_space<vmem>>, vector<1x8x32xbf16>
    %77 = vector.shape_cast %76 : vector<1x8x32xbf16> to vector<8x32xbf16>
    %78 = vector.shape_cast %72 : vector<8x32xbf16> to vector<1x8x32xbf16>
    tpu.vector_store %arg3[%75, %c0_19, %c0_20], %78 {strides = array<i32>} : memref<8x8x32xbf16, #tpu.memory_space<vmem>>, vector<1x8x32xbf16>,
    %79 = arith.index_cast %47 : i32 to index
    %c0_21 = arith.constant 0 : index
    %c0_22 = arith.constant 0 : index
    %80 = vector.load %arg5[%79, %c0_21, %c0_22] : memref<8x8x32xbf16, #tpu.memory_space<vmem>>, vector<1x8x32xbf16>
    %81 = vector.shape_cast %80 : vector<1x8x32xbf16> to vector<8x32xbf16>
    %82 = vector.shape_cast %72 : vector<8x32xbf16> to vector<1x8x32xbf16>
    tpu.vector_store %arg5[%79, %c0_21, %c0_22], %82 {strides = array<i32>} : memref<8x8x32xbf16, #tpu.memory_space<vmem>>, vector<1x8x32xbf16>,
    %83 = arith.index_cast %47 : i32 to index
    %c0_23 = arith.constant 0 : index
    %c0_24 = arith.constant 0 : index
    %84 = vector.load %arg4[%83, %c0_23, %c0_24] : memref<8x8x32xbf16, #tpu.memory_space<vmem>>, vector<1x8x32xbf16>
    %85 = vector.shape_cast %84 : vector<1x8x32xbf16> to vector<8x32xbf16>
    %86 = vector.shape_cast %74 : vector<8x32xbf16> to vector<1x8x32xbf16>
    tpu.vector_store %arg4[%83, %c0_23, %c0_24], %86 {strides = array<i32>} : memref<8x8x32xbf16, #tpu.memory_space<vmem>>, vector<1x8x32xbf16>,
    %87 = arith.index_cast %c1_i32 : i32 to index
    %c0_25 = arith.constant 0 : index
    %c0_26 = arith.constant 0 : index
    %88 = vector.load %arg6[%87, %c0_25, %c0_26] : memref<8x8x32xbf16, #tpu.memory_space<vmem>>, vector<1x8x32xbf16>
    %89 = vector.shape_cast %88 : vector<1x8x32xbf16> to vector<8x32xbf16>
    %90 = vector.shape_cast %74 : vector<8x32xbf16> to vector<1x8x32xbf16>
    tpu.vector_store %arg6[%87, %c0_25, %c0_26], %90 {strides = array<i32>} : memref<8x8x32xbf16, #tpu.memory_space<vmem>>, vector<1x8x32xbf16>,
    %c2_i32 = arith.constant 2 : i32
    %c7_i32_27 = arith.constant 7 : i32
    %91 = arith.subi %c7_i32_27, %c2_i32 : i32
    %92 = arith.index_cast %c2_i32 : i32 to index
    %c0_28 = arith.constant 0 : index
    %c0_29 = arith.constant 0 : index
    %93 = vector.load %arg1[%92, %c0_28, %c0_29] : memref<8x8x256xbf16, #tpu.memory_space<vmem>>, vector<1x8x256xbf16>
    %94 = vector.shape_cast %93 : vector<1x8x256xbf16> to vector<8x256xbf16>
    %95 = arith.extf %94 : vector<8x256xbf16> to vector<8x256xf32>
    %96 = arith.truncf %70 : vector<8x64xf32> to vector<8x64xbf16>
    %cst_30 = arith.constant dense<0.000000e+00> : vector<8x256xf32>
    %97 = tpu.matmul %96, %0, %cst_30 {dimension_numbers = #tpu.dot_dimension_numbers<[1], [0], [0], [1], [0, 0, 1, 1], [], []>} : vector<8x64xbf16>, vector<64x256xbf16>, vector<8x256xf32> -> vector<8x256xf32>
    %98 = arith.addf %95, %97 : vector<8x256xf32>
    %99 = vector.extract_strided_slice %98 {offsets = [0, 0], sizes = [8, 192], strides = [1, 1]} : vector<8x256xf32> to vector<8x192xf32>
    %100 = arith.negf %99 : vector<8x192xf32>
    %101 = math.exp %100 : vector<8x192xf32>
    %cst_31 = arith.constant 1.000000e+00 : f32
    %102 = vector.broadcast %cst_31 : f32 to vector<8x192xf32>
    %103 = arith.addf %102, %101 : vector<8x192xf32>
    %104 = arith.divf %102, %103 : vector<8x192xf32>
    %105 = vector.extract_strided_slice %98 {offsets = [0, 192], sizes = [8, 64], strides = [1, 1]} : vector<8x256xf32> to vector<8x64xf32>
    %106 = math.tanh %105 : vector<8x64xf32>
    %107 = vector.extract_strided_slice %104 {offsets = [0, 0], sizes = [8, 64], strides = [1, 1]} : vector<8x192xf32> to vector<8x64xf32>
    %108 = vector.extract_strided_slice %104 {offsets = [0, 64], sizes = [8, 64], strides = [1, 1]} : vector<8x192xf32> to vector<8x64xf32>
    %109 = vector.extract_strided_slice %104 {offsets = [0, 128], sizes = [8, 64], strides = [1, 1]} : vector<8x192xf32> to vector<8x64xf32>
    %110 = arith.mulf %108, %68 : vector<8x64xf32>
    %111 = arith.mulf %107, %106 : vector<8x64xf32>
    %112 = arith.addf %110, %111 : vector<8x64xf32>
    %113 = math.tanh %112 : vector<8x64xf32>
    %114 = arith.mulf %109, %113 : vector<8x64xf32>
    %115 = vector.extract_strided_slice %114 {offsets = [0, 0], sizes = [8, 32], strides = [1, 1]} : vector<8x64xf32> to vector<8x32xf32>
    %116 = arith.truncf %115 : vector<8x32xf32> to vector<8x32xbf16>
    %117 = vector.extract_strided_slice %114 {offsets = [0, 32], sizes = [8, 32], strides = [1, 1]} : vector<8x64xf32> to vector<8x32xf32>
    %118 = arith.truncf %117 : vector<8x32xf32> to vector<8x32xbf16>
    %119 = arith.index_cast %c2_i32 : i32 to index
    %c0_32 = arith.constant 0 : index
    %c0_33 = arith.constant 0 : index
    %120 = vector.load %arg3[%119, %c0_32, %c0_33] : memref<8x8x32xbf16, #tpu.memory_space<vmem>>, vector<1x8x32xbf16>
    %121 = vector.shape_cast %120 : vector<1x8x32xbf16> to vector<8x32xbf16>
    %122 = vector.shape_cast %116 : vector<8x32xbf16> to vector<1x8x32xbf16>
    tpu.vector_store %arg3[%119, %c0_32, %c0_33], %122 {strides = array<i32>} : memref<8x8x32xbf16, #tpu.memory_space<vmem>>, vector<1x8x32xbf16>,
    %123 = arith.index_cast %91 : i32 to index
    %c0_34 = arith.constant 0 : index
    %c0_35 = arith.constant 0 : index
    %124 = vector.load %arg5[%123, %c0_34, %c0_35] : memref<8x8x32xbf16, #tpu.memory_space<vmem>>, vector<1x8x32xbf16>
    %125 = vector.shape_cast %124 : vector<1x8x32xbf16> to vector<8x32xbf16>
    %126 = vector.shape_cast %116 : vector<8x32xbf16> to vector<1x8x32xbf16>
    tpu.vector_store %arg5[%123, %c0_34, %c0_35], %126 {strides = array<i32>} : memref<8x8x32xbf16, #tpu.memory_space<vmem>>, vector<1x8x32xbf16>,
    %127 = arith.index_cast %91 : i32 to index
    %c0_36 = arith.constant 0 : index
    %c0_37 = arith.constant 0 : index
    %128 = vector.load %arg4[%127, %c0_36, %c0_37] : memref<8x8x32xbf16, #tpu.memory_space<vmem>>, vector<1x8x32xbf16>
    %129 = vector.shape_cast %128 : vector<1x8x32xbf16> to vector<8x32xbf16>
    %130 = vector.shape_cast %118 : vector<8x32xbf16> to vector<1x8x32xbf16>
    tpu.vector_store %arg4[%127, %c0_36, %c0_37], %130 {strides = array<i32>} : memref<8x8x32xbf16, #tpu.memory_space<vmem>>, vector<1x8x32xbf16>,
    %131 = arith.index_cast %c2_i32 : i32 to index
    %c0_38 = arith.constant 0 : index
    %c0_39 = arith.constant 0 : index
    %132 = vector.load %arg6[%131, %c0_38, %c0_39] : memref<8x8x32xbf16, #tpu.memory_space<vmem>>, vector<1x8x32xbf16>
    %133 = vector.shape_cast %132 : vector<1x8x32xbf16> to vector<8x32xbf16>
    %134 = vector.shape_cast %118 : vector<8x32xbf16> to vector<1x8x32xbf16>
    tpu.vector_store %arg6[%131, %c0_38, %c0_39], %134 {strides = array<i32>} : memref<8x8x32xbf16, #tpu.memory_space<vmem>>, vector<1x8x32xbf16>,
    %c3_i32 = arith.constant 3 : i32
    %c7_i32_40 = arith.constant 7 : i32
    %135 = arith.subi %c7_i32_40, %c3_i32 : i32
    %136 = arith.index_cast %c3_i32 : i32 to index
    %c0_41 = arith.constant 0 : index
    %c0_42 = arith.constant 0 : index
    %137 = vector.load %arg1[%136, %c0_41, %c0_42] : memref<8x8x256xbf16, #tpu.memory_space<vmem>>, vector<1x8x256xbf16>
    %138 = vector.shape_cast %137 : vector<1x8x256xbf16> to vector<8x256xbf16>
    %139 = arith.extf %138 : vector<8x256xbf16> to vector<8x256xf32>
    %140 = arith.truncf %114 : vector<8x64xf32> to vector<8x64xbf16>
    %cst_43 = arith.constant dense<0.000000e+00> : vector<8x256xf32>
    %141 = tpu.matmul %140, %0, %cst_43 {dimension_numbers = #tpu.dot_dimension_numbers<[1], [0], [0], [1], [0, 0, 1, 1], [], []>} : vector<8x64xbf16>, vector<64x256xbf16>, vector<8x256xf32> -> vector<8x256xf32>
    %142 = arith.addf %139, %141 : vector<8x256xf32>
    %143 = vector.extract_strided_slice %142 {offsets = [0, 0], sizes = [8, 192], strides = [1, 1]} : vector<8x256xf32> to vector<8x192xf32>
    %144 = arith.negf %143 : vector<8x192xf32>
    %145 = math.exp %144 : vector<8x192xf32>
    %cst_44 = arith.constant 1.000000e+00 : f32
    %146 = vector.broadcast %cst_44 : f32 to vector<8x192xf32>
    %147 = arith.addf %146, %145 : vector<8x192xf32>
    %148 = arith.divf %146, %147 : vector<8x192xf32>
    %149 = vector.extract_strided_slice %142 {offsets = [0, 192], sizes = [8, 64], strides = [1, 1]} : vector<8x256xf32> to vector<8x64xf32>
    %150 = math.tanh %149 : vector<8x64xf32>
    %151 = vector.extract_strided_slice %148 {offsets = [0, 0], sizes = [8, 64], strides = [1, 1]} : vector<8x192xf32> to vector<8x64xf32>
    %152 = vector.extract_strided_slice %148 {offsets = [0, 64], sizes = [8, 64], strides = [1, 1]} : vector<8x192xf32> to vector<8x64xf32>
    %153 = vector.extract_strided_slice %148 {offsets = [0, 128], sizes = [8, 64], strides = [1, 1]} : vector<8x192xf32> to vector<8x64xf32>
    %154 = arith.mulf %152, %112 : vector<8x64xf32>
    %155 = arith.mulf %151, %150 : vector<8x64xf32>
    %156 = arith.addf %154, %155 : vector<8x64xf32>
    %157 = math.tanh %156 : vector<8x64xf32>
    %158 = arith.mulf %153, %157 : vector<8x64xf32>
    %159 = vector.extract_strided_slice %158 {offsets = [0, 0], sizes = [8, 32], strides = [1, 1]} : vector<8x64xf32> to vector<8x32xf32>
    %160 = arith.truncf %159 : vector<8x32xf32> to vector<8x32xbf16>
    %161 = vector.extract_strided_slice %158 {offsets = [0, 32], sizes = [8, 32], strides = [1, 1]} : vector<8x64xf32> to vector<8x32xf32>
    %162 = arith.truncf %161 : vector<8x32xf32> to vector<8x32xbf16>
    %163 = arith.index_cast %c3_i32 : i32 to index
    %c0_45 = arith.constant 0 : index
    %c0_46 = arith.constant 0 : index
    %164 = vector.load %arg3[%163, %c0_45, %c0_46] : memref<8x8x32xbf16, #tpu.memory_space<vmem>>, vector<1x8x32xbf16>
    %165 = vector.shape_cast %164 : vector<1x8x32xbf16> to vector<8x32xbf16>
    %166 = vector.shape_cast %160 : vector<8x32xbf16> to vector<1x8x32xbf16>
    tpu.vector_store %arg3[%163, %c0_45, %c0_46], %166 {strides = array<i32>} : memref<8x8x32xbf16, #tpu.memory_space<vmem>>, vector<1x8x32xbf16>,
    %167 = arith.index_cast %135 : i32 to index
    %c0_47 = arith.constant 0 : index
    %c0_48 = arith.constant 0 : index
    %168 = vector.load %arg5[%167, %c0_47, %c0_48] : memref<8x8x32xbf16, #tpu.memory_space<vmem>>, vector<1x8x32xbf16>
    %169 = vector.shape_cast %168 : vector<1x8x32xbf16> to vector<8x32xbf16>
    %170 = vector.shape_cast %160 : vector<8x32xbf16> to vector<1x8x32xbf16>
    tpu.vector_store %arg5[%167, %c0_47, %c0_48], %170 {strides = array<i32>} : memref<8x8x32xbf16, #tpu.memory_space<vmem>>, vector<1x8x32xbf16>,
    %171 = arith.index_cast %135 : i32 to index
    %c0_49 = arith.constant 0 : index
    %c0_50 = arith.constant 0 : index
    %172 = vector.load %arg4[%171, %c0_49, %c0_50] : memref<8x8x32xbf16, #tpu.memory_space<vmem>>, vector<1x8x32xbf16>
    %173 = vector.shape_cast %172 : vector<1x8x32xbf16> to vector<8x32xbf16>
    %174 = vector.shape_cast %162 : vector<8x32xbf16> to vector<1x8x32xbf16>
    tpu.vector_store %arg4[%171, %c0_49, %c0_50], %174 {strides = array<i32>} : memref<8x8x32xbf16, #tpu.memory_space<vmem>>, vector<1x8x32xbf16>,
    %175 = arith.index_cast %c3_i32 : i32 to index
    %c0_51 = arith.constant 0 : index
    %c0_52 = arith.constant 0 : index
    %176 = vector.load %arg6[%175, %c0_51, %c0_52] : memref<8x8x32xbf16, #tpu.memory_space<vmem>>, vector<1x8x32xbf16>
    %177 = vector.shape_cast %176 : vector<1x8x32xbf16> to vector<8x32xbf16>
    %178 = vector.shape_cast %162 : vector<8x32xbf16> to vector<1x8x32xbf16>
    tpu.vector_store %arg6[%175, %c0_51, %c0_52], %178 {strides = array<i32>} : memref<8x8x32xbf16, #tpu.memory_space<vmem>>, vector<1x8x32xbf16>,
    %c4_i32 = arith.constant 4 : i32
    %c7_i32_53 = arith.constant 7 : i32
    %179 = arith.subi %c7_i32_53, %c4_i32 : i32
    %180 = arith.index_cast %c4_i32 : i32 to index
    %c0_54 = arith.constant 0 : index
    %c0_55 = arith.constant 0 : index
    %181 = vector.load %arg1[%180, %c0_54, %c0_55] : memref<8x8x256xbf16, #tpu.memory_space<vmem>>, vector<1x8x256xbf16>
    %182 = vector.shape_cast %181 : vector<1x8x256xbf16> to vector<8x256xbf16>
    %183 = arith.extf %182 : vector<8x256xbf16> to vector<8x256xf32>
    %184 = arith.truncf %158 : vector<8x64xf32> to vector<8x64xbf16>
    %cst_56 = arith.constant dense<0.000000e+00> : vector<8x256xf32>
    %185 = tpu.matmul %184, %0, %cst_56 {dimension_numbers = #tpu.dot_dimension_numbers<[1], [0], [0], [1], [0, 0, 1, 1], [], []>} : vector<8x64xbf16>, vector<64x256xbf16>, vector<8x256xf32> -> vector<8x256xf32>
    %186 = arith.addf %183, %185 : vector<8x256xf32>
    %187 = vector.extract_strided_slice %186 {offsets = [0, 0], sizes = [8, 192], strides = [1, 1]} : vector<8x256xf32> to vector<8x192xf32>
    %188 = arith.negf %187 : vector<8x192xf32>
    %189 = math.exp %188 : vector<8x192xf32>
    %cst_57 = arith.constant 1.000000e+00 : f32
    %190 = vector.broadcast %cst_57 : f32 to vector<8x192xf32>
    %191 = arith.addf %190, %189 : vector<8x192xf32>
    %192 = arith.divf %190, %191 : vector<8x192xf32>
    %193 = vector.extract_strided_slice %186 {offsets = [0, 192], sizes = [8, 64], strides = [1, 1]} : vector<8x256xf32> to vector<8x64xf32>
    %194 = math.tanh %193 : vector<8x64xf32>
    %195 = vector.extract_strided_slice %192 {offsets = [0, 0], sizes = [8, 64], strides = [1, 1]} : vector<8x192xf32> to vector<8x64xf32>
    %196 = vector.extract_strided_slice %192 {offsets = [0, 64], sizes = [8, 64], strides = [1, 1]} : vector<8x192xf32> to vector<8x64xf32>
    %197 = vector.extract_strided_slice %192 {offsets = [0, 128], sizes = [8, 64], strides = [1, 1]} : vector<8x192xf32> to vector<8x64xf32>
    %198 = arith.mulf %196, %156 : vector<8x64xf32>
    %199 = arith.mulf %195, %194 : vector<8x64xf32>
    %200 = arith.addf %198, %199 : vector<8x64xf32>
    %201 = math.tanh %200 : vector<8x64xf32>
    %202 = arith.mulf %197, %201 : vector<8x64xf32>
    %203 = vector.extract_strided_slice %202 {offsets = [0, 0], sizes = [8, 32], strides = [1, 1]} : vector<8x64xf32> to vector<8x32xf32>
    %204 = arith.truncf %203 : vector<8x32xf32> to vector<8x32xbf16>
    %205 = vector.extract_strided_slice %202 {offsets = [0, 32], sizes = [8, 32], strides = [1, 1]} : vector<8x64xf32> to vector<8x32xf32>
    %206 = arith.truncf %205 : vector<8x32xf32> to vector<8x32xbf16>
    %207 = arith.index_cast %c4_i32 : i32 to index
    %c0_58 = arith.constant 0 : index
    %c0_59 = arith.constant 0 : index
    %208 = vector.load %arg3[%207, %c0_58, %c0_59] : memref<8x8x32xbf16, #tpu.memory_space<vmem>>, vector<1x8x32xbf16>
    %209 = vector.shape_cast %208 : vector<1x8x32xbf16> to vector<8x32xbf16>
    %210 = vector.shape_cast %204 : vector<8x32xbf16> to vector<1x8x32xbf16>
    tpu.vector_store %arg3[%207, %c0_58, %c0_59], %210 {strides = array<i32>} : memref<8x8x32xbf16, #tpu.memory_space<vmem>>, vector<1x8x32xbf16>,
    %211 = arith.index_cast %179 : i32 to index
    %c0_60 = arith.constant 0 : index
    %c0_61 = arith.constant 0 : index
    %212 = vector.load %arg5[%211, %c0_60, %c0_61] : memref<8x8x32xbf16, #tpu.memory_space<vmem>>, vector<1x8x32xbf16>
    %213 = vector.shape_cast %212 : vector<1x8x32xbf16> to vector<8x32xbf16>
    %214 = vector.shape_cast %204 : vector<8x32xbf16> to vector<1x8x32xbf16>
    tpu.vector_store %arg5[%211, %c0_60, %c0_61], %214 {strides = array<i32>} : memref<8x8x32xbf16, #tpu.memory_space<vmem>>, vector<1x8x32xbf16>,
    %215 = arith.index_cast %179 : i32 to index
    %c0_62 = arith.constant 0 : index
    %c0_63 = arith.constant 0 : index
    %216 = vector.load %arg4[%215, %c0_62, %c0_63] : memref<8x8x32xbf16, #tpu.memory_space<vmem>>, vector<1x8x32xbf16>
    %217 = vector.shape_cast %216 : vector<1x8x32xbf16> to vector<8x32xbf16>
    %218 = vector.shape_cast %206 : vector<8x32xbf16> to vector<1x8x32xbf16>
    tpu.vector_store %arg4[%215, %c0_62, %c0_63], %218 {strides = array<i32>} : memref<8x8x32xbf16, #tpu.memory_space<vmem>>, vector<1x8x32xbf16>,
    %219 = arith.index_cast %c4_i32 : i32 to index
    %c0_64 = arith.constant 0 : index
    %c0_65 = arith.constant 0 : index
    %220 = vector.load %arg6[%219, %c0_64, %c0_65] : memref<8x8x32xbf16, #tpu.memory_space<vmem>>, vector<1x8x32xbf16>
    %221 = vector.shape_cast %220 : vector<1x8x32xbf16> to vector<8x32xbf16>
    %222 = vector.shape_cast %206 : vector<8x32xbf16> to vector<1x8x32xbf16>
    tpu.vector_store %arg6[%219, %c0_64, %c0_65], %222 {strides = array<i32>} : memref<8x8x32xbf16, #tpu.memory_space<vmem>>, vector<1x8x32xbf16>,
    %c5_i32 = arith.constant 5 : i32
    %c7_i32_66 = arith.constant 7 : i32
    %223 = arith.subi %c7_i32_66, %c5_i32 : i32
    %224 = arith.index_cast %c5_i32 : i32 to index
    %c0_67 = arith.constant 0 : index
    %c0_68 = arith.constant 0 : index
    %225 = vector.load %arg1[%224, %c0_67, %c0_68] : memref<8x8x256xbf16, #tpu.memory_space<vmem>>, vector<1x8x256xbf16>
    %226 = vector.shape_cast %225 : vector<1x8x256xbf16> to vector<8x256xbf16>
    %227 = arith.extf %226 : vector<8x256xbf16> to vector<8x256xf32>
    %228 = arith.truncf %202 : vector<8x64xf32> to vector<8x64xbf16>
    %cst_69 = arith.constant dense<0.000000e+00> : vector<8x256xf32>
    %229 = tpu.matmul %228, %0, %cst_69 {dimension_numbers = #tpu.dot_dimension_numbers<[1], [0], [0], [1], [0, 0, 1, 1], [], []>} : vector<8x64xbf16>, vector<64x256xbf16>, vector<8x256xf32> -> vector<8x256xf32>
    %230 = arith.addf %227, %229 : vector<8x256xf32>
    %231 = vector.extract_strided_slice %230 {offsets = [0, 0], sizes = [8, 192], strides = [1, 1]} : vector<8x256xf32> to vector<8x192xf32>
    %232 = arith.negf %231 : vector<8x192xf32>
    %233 = math.exp %232 : vector<8x192xf32>
    %cst_70 = arith.constant 1.000000e+00 : f32
    %234 = vector.broadcast %cst_70 : f32 to vector<8x192xf32>
    %235 = arith.addf %234, %233 : vector<8x192xf32>
    %236 = arith.divf %234, %235 : vector<8x192xf32>
    %237 = vector.extract_strided_slice %230 {offsets = [0, 192], sizes = [8, 64], strides = [1, 1]} : vector<8x256xf32> to vector<8x64xf32>
    %238 = math.tanh %237 : vector<8x64xf32>
    %239 = vector.extract_strided_slice %236 {offsets = [0, 0], sizes = [8, 64], strides = [1, 1]} : vector<8x192xf32> to vector<8x64xf32>
    %240 = vector.extract_strided_slice %236 {offsets = [0, 64], sizes = [8, 64], strides = [1, 1]} : vector<8x192xf32> to vector<8x64xf32>
    %241 = vector.extract_strided_slice %236 {offsets = [0, 128], sizes = [8, 64], strides = [1, 1]} : vector<8x192xf32> to vector<8x64xf32>
    %242 = arith.mulf %240, %200 : vector<8x64xf32>
    %243 = arith.mulf %239, %238 : vector<8x64xf32>
    %244 = arith.addf %242, %243 : vector<8x64xf32>
    %245 = math.tanh %244 : vector<8x64xf32>
    %246 = arith.mulf %241, %245 : vector<8x64xf32>
    %247 = vector.extract_strided_slice %246 {offsets = [0, 0], sizes = [8, 32], strides = [1, 1]} : vector<8x64xf32> to vector<8x32xf32>
    %248 = arith.truncf %247 : vector<8x32xf32> to vector<8x32xbf16>
    %249 = vector.extract_strided_slice %246 {offsets = [0, 32], sizes = [8, 32], strides = [1, 1]} : vector<8x64xf32> to vector<8x32xf32>
    %250 = arith.truncf %249 : vector<8x32xf32> to vector<8x32xbf16>
    %251 = arith.index_cast %c5_i32 : i32 to index
    %c0_71 = arith.constant 0 : index
    %c0_72 = arith.constant 0 : index
    %252 = vector.load %arg3[%251, %c0_71, %c0_72] : memref<8x8x32xbf16, #tpu.memory_space<vmem>>, vector<1x8x32xbf16>
    %253 = vector.shape_cast %252 : vector<1x8x32xbf16> to vector<8x32xbf16>
    %254 = vector.shape_cast %248 : vector<8x32xbf16> to vector<1x8x32xbf16>
    tpu.vector_store %arg3[%251, %c0_71, %c0_72], %254 {strides = array<i32>} : memref<8x8x32xbf16, #tpu.memory_space<vmem>>, vector<1x8x32xbf16>,
    %255 = arith.index_cast %223 : i32 to index
    %c0_73 = arith.constant 0 : index
    %c0_74 = arith.constant 0 : index
    %256 = vector.load %arg5[%255, %c0_73, %c0_74] : memref<8x8x32xbf16, #tpu.memory_space<vmem>>, vector<1x8x32xbf16>
    %257 = vector.shape_cast %256 : vector<1x8x32xbf16> to vector<8x32xbf16>
    %258 = vector.shape_cast %248 : vector<8x32xbf16> to vector<1x8x32xbf16>
    tpu.vector_store %arg5[%255, %c0_73, %c0_74], %258 {strides = array<i32>} : memref<8x8x32xbf16, #tpu.memory_space<vmem>>, vector<1x8x32xbf16>,
    %259 = arith.index_cast %223 : i32 to index
    %c0_75 = arith.constant 0 : index
    %c0_76 = arith.constant 0 : index
    %260 = vector.load %arg4[%259, %c0_75, %c0_76] : memref<8x8x32xbf16, #tpu.memory_space<vmem>>, vector<1x8x32xbf16>
    %261 = vector.shape_cast %260 : vector<1x8x32xbf16> to vector<8x32xbf16>
    %262 = vector.shape_cast %250 : vector<8x32xbf16> to vector<1x8x32xbf16>
    tpu.vector_store %arg4[%259, %c0_75, %c0_76], %262 {strides = array<i32>} : memref<8x8x32xbf16, #tpu.memory_space<vmem>>, vector<1x8x32xbf16>,
    %263 = arith.index_cast %c5_i32 : i32 to index
    %c0_77 = arith.constant 0 : index
    %c0_78 = arith.constant 0 : index
    %264 = vector.load %arg6[%263, %c0_77, %c0_78] : memref<8x8x32xbf16, #tpu.memory_space<vmem>>, vector<1x8x32xbf16>
    %265 = vector.shape_cast %264 : vector<1x8x32xbf16> to vector<8x32xbf16>
    %266 = vector.shape_cast %250 : vector<8x32xbf16> to vector<1x8x32xbf16>
    tpu.vector_store %arg6[%263, %c0_77, %c0_78], %266 {strides = array<i32>} : memref<8x8x32xbf16, #tpu.memory_space<vmem>>, vector<1x8x32xbf16>,
    %c6_i32 = arith.constant 6 : i32
    %c7_i32_79 = arith.constant 7 : i32
    %267 = arith.subi %c7_i32_79, %c6_i32 : i32
    %268 = arith.index_cast %c6_i32 : i32 to index
    %c0_80 = arith.constant 0 : index
    %c0_81 = arith.constant 0 : index
    %269 = vector.load %arg1[%268, %c0_80, %c0_81] : memref<8x8x256xbf16, #tpu.memory_space<vmem>>, vector<1x8x256xbf16>
    %270 = vector.shape_cast %269 : vector<1x8x256xbf16> to vector<8x256xbf16>
    %271 = arith.extf %270 : vector<8x256xbf16> to vector<8x256xf32>
    %272 = arith.truncf %246 : vector<8x64xf32> to vector<8x64xbf16>
    %cst_82 = arith.constant dense<0.000000e+00> : vector<8x256xf32>
    %273 = tpu.matmul %272, %0, %cst_82 {dimension_numbers = #tpu.dot_dimension_numbers<[1], [0], [0], [1], [0, 0, 1, 1], [], []>} : vector<8x64xbf16>, vector<64x256xbf16>, vector<8x256xf32> -> vector<8x256xf32>
    %274 = arith.addf %271, %273 : vector<8x256xf32>
    %275 = vector.extract_strided_slice %274 {offsets = [0, 0], sizes = [8, 192], strides = [1, 1]} : vector<8x256xf32> to vector<8x192xf32>
    %276 = arith.negf %275 : vector<8x192xf32>
    %277 = math.exp %276 : vector<8x192xf32>
    %cst_83 = arith.constant 1.000000e+00 : f32
    %278 = vector.broadcast %cst_83 : f32 to vector<8x192xf32>
    %279 = arith.addf %278, %277 : vector<8x192xf32>
    %280 = arith.divf %278, %279 : vector<8x192xf32>
    %281 = vector.extract_strided_slice %274 {offsets = [0, 192], sizes = [8, 64], strides = [1, 1]} : vector<8x256xf32> to vector<8x64xf32>
    %282 = math.tanh %281 : vector<8x64xf32>
    %283 = vector.extract_strided_slice %280 {offsets = [0, 0], sizes = [8, 64], strides = [1, 1]} : vector<8x192xf32> to vector<8x64xf32>
    %284 = vector.extract_strided_slice %280 {offsets = [0, 64], sizes = [8, 64], strides = [1, 1]} : vector<8x192xf32> to vector<8x64xf32>
    %285 = vector.extract_strided_slice %280 {offsets = [0, 128], sizes = [8, 64], strides = [1, 1]} : vector<8x192xf32> to vector<8x64xf32>
    %286 = arith.mulf %284, %244 : vector<8x64xf32>
    %287 = arith.mulf %283, %282 : vector<8x64xf32>
    %288 = arith.addf %286, %287 : vector<8x64xf32>
    %289 = math.tanh %288 : vector<8x64xf32>
    %290 = arith.mulf %285, %289 : vector<8x64xf32>
    %291 = vector.extract_strided_slice %290 {offsets = [0, 0], sizes = [8, 32], strides = [1, 1]} : vector<8x64xf32> to vector<8x32xf32>
    %292 = arith.truncf %291 : vector<8x32xf32> to vector<8x32xbf16>
    %293 = vector.extract_strided_slice %290 {offsets = [0, 32], sizes = [8, 32], strides = [1, 1]} : vector<8x64xf32> to vector<8x32xf32>
    %294 = arith.truncf %293 : vector<8x32xf32> to vector<8x32xbf16>
    %295 = arith.index_cast %c6_i32 : i32 to index
    %c0_84 = arith.constant 0 : index
    %c0_85 = arith.constant 0 : index
    %296 = vector.load %arg3[%295, %c0_84, %c0_85] : memref<8x8x32xbf16, #tpu.memory_space<vmem>>, vector<1x8x32xbf16>
    %297 = vector.shape_cast %296 : vector<1x8x32xbf16> to vector<8x32xbf16>
    %298 = vector.shape_cast %292 : vector<8x32xbf16> to vector<1x8x32xbf16>
    tpu.vector_store %arg3[%295, %c0_84, %c0_85], %298 {strides = array<i32>} : memref<8x8x32xbf16, #tpu.memory_space<vmem>>, vector<1x8x32xbf16>,
    %299 = arith.index_cast %267 : i32 to index
    %c0_86 = arith.constant 0 : index
    %c0_87 = arith.constant 0 : index
    %300 = vector.load %arg5[%299, %c0_86, %c0_87] : memref<8x8x32xbf16, #tpu.memory_space<vmem>>, vector<1x8x32xbf16>
    %301 = vector.shape_cast %300 : vector<1x8x32xbf16> to vector<8x32xbf16>
    %302 = vector.shape_cast %292 : vector<8x32xbf16> to vector<1x8x32xbf16>
    tpu.vector_store %arg5[%299, %c0_86, %c0_87], %302 {strides = array<i32>} : memref<8x8x32xbf16, #tpu.memory_space<vmem>>, vector<1x8x32xbf16>,
    %303 = arith.index_cast %267 : i32 to index
    %c0_88 = arith.constant 0 : index
    %c0_89 = arith.constant 0 : index
    %304 = vector.load %arg4[%303, %c0_88, %c0_89] : memref<8x8x32xbf16, #tpu.memory_space<vmem>>, vector<1x8x32xbf16>
    %305 = vector.shape_cast %304 : vector<1x8x32xbf16> to vector<8x32xbf16>
    %306 = vector.shape_cast %294 : vector<8x32xbf16> to vector<1x8x32xbf16>
    tpu.vector_store %arg4[%303, %c0_88, %c0_89], %306 {strides = array<i32>} : memref<8x8x32xbf16, #tpu.memory_space<vmem>>, vector<1x8x32xbf16>,
    %307 = arith.index_cast %c6_i32 : i32 to index
    %c0_90 = arith.constant 0 : index
    %c0_91 = arith.constant 0 : index
    %308 = vector.load %arg6[%307, %c0_90, %c0_91] : memref<8x8x32xbf16, #tpu.memory_space<vmem>>, vector<1x8x32xbf16>
    %309 = vector.shape_cast %308 : vector<1x8x32xbf16> to vector<8x32xbf16>
    %310 = vector.shape_cast %294 : vector<8x32xbf16> to vector<1x8x32xbf16>
    tpu.vector_store %arg6[%307, %c0_90, %c0_91], %310 {strides = array<i32>} : memref<8x8x32xbf16, #tpu.memory_space<vmem>>, vector<1x8x32xbf16>,
    %c7_i32_92 = arith.constant 7 : i32
    %c7_i32_93 = arith.constant 7 : i32
    %311 = arith.subi %c7_i32_93, %c7_i32_92 : i32
    %312 = arith.index_cast %c7_i32_92 : i32 to index
    %c0_94 = arith.constant 0 : index
    %c0_95 = arith.constant 0 : index
    %313 = vector.load %arg1[%312, %c0_94, %c0_95] : memref<8x8x256xbf16, #tpu.memory_space<vmem>>, vector<1x8x256xbf16>
    %314 = vector.shape_cast %313 : vector<1x8x256xbf16> to vector<8x256xbf16>
    %315 = arith.extf %314 : vector<8x256xbf16> to vector<8x256xf32>
    %316 = arith.truncf %290 : vector<8x64xf32> to vector<8x64xbf16>
    %cst_96 = arith.constant dense<0.000000e+00> : vector<8x256xf32>
    %317 = tpu.matmul %316, %0, %cst_96 {dimension_numbers = #tpu.dot_dimension_numbers<[1], [0], [0], [1], [0, 0, 1, 1], [], []>} : vector<8x64xbf16>, vector<64x256xbf16>, vector<8x256xf32> -> vector<8x256xf32>
    %318 = arith.addf %315, %317 : vector<8x256xf32>
    %319 = vector.extract_strided_slice %318 {offsets = [0, 0], sizes = [8, 192], strides = [1, 1]} : vector<8x256xf32> to vector<8x192xf32>
    %320 = arith.negf %319 : vector<8x192xf32>
    %321 = math.exp %320 : vector<8x192xf32>
    %cst_97 = arith.constant 1.000000e+00 : f32
    %322 = vector.broadcast %cst_97 : f32 to vector<8x192xf32>
    %323 = arith.addf %322, %321 : vector<8x192xf32>
    %324 = arith.divf %322, %323 : vector<8x192xf32>
    %325 = vector.extract_strided_slice %318 {offsets = [0, 192], sizes = [8, 64], strides = [1, 1]} : vector<8x256xf32> to vector<8x64xf32>
    %326 = math.tanh %325 : vector<8x64xf32>
    %327 = vector.extract_strided_slice %324 {offsets = [0, 0], sizes = [8, 64], strides = [1, 1]} : vector<8x192xf32> to vector<8x64xf32>
    %328 = vector.extract_strided_slice %324 {offsets = [0, 64], sizes = [8, 64], strides = [1, 1]} : vector<8x192xf32> to vector<8x64xf32>
    %329 = vector.extract_strided_slice %324 {offsets = [0, 128], sizes = [8, 64], strides = [1, 1]} : vector<8x192xf32> to vector<8x64xf32>
    %330 = arith.mulf %328, %288 : vector<8x64xf32>
    %331 = arith.mulf %327, %326 : vector<8x64xf32>
    %332 = arith.addf %330, %331 : vector<8x64xf32>
    %333 = math.tanh %332 : vector<8x64xf32>
    %334 = arith.mulf %329, %333 : vector<8x64xf32>
    %335 = vector.extract_strided_slice %334 {offsets = [0, 0], sizes = [8, 32], strides = [1, 1]} : vector<8x64xf32> to vector<8x32xf32>
    %336 = arith.truncf %335 : vector<8x32xf32> to vector<8x32xbf16>
    %337 = vector.extract_strided_slice %334 {offsets = [0, 32], sizes = [8, 32], strides = [1, 1]} : vector<8x64xf32> to vector<8x32xf32>
    %338 = arith.truncf %337 : vector<8x32xf32> to vector<8x32xbf16>
    %339 = arith.index_cast %c7_i32_92 : i32 to index
    %c0_98 = arith.constant 0 : index
    %c0_99 = arith.constant 0 : index
    %340 = vector.load %arg3[%339, %c0_98, %c0_99] : memref<8x8x32xbf16, #tpu.memory_space<vmem>>, vector<1x8x32xbf16>
    %341 = vector.shape_cast %340 : vector<1x8x32xbf16> to vector<8x32xbf16>
    %342 = vector.shape_cast %336 : vector<8x32xbf16> to vector<1x8x32xbf16>
    tpu.vector_store %arg3[%339, %c0_98, %c0_99], %342 {strides = array<i32>} : memref<8x8x32xbf16, #tpu.memory_space<vmem>>, vector<1x8x32xbf16>,
    %343 = arith.index_cast %311 : i32 to index
    %c0_100 = arith.constant 0 : index
    %c0_101 = arith.constant 0 : index
    %344 = vector.load %arg5[%343, %c0_100, %c0_101] : memref<8x8x32xbf16, #tpu.memory_space<vmem>>, vector<1x8x32xbf16>
    %345 = vector.shape_cast %344 : vector<1x8x32xbf16> to vector<8x32xbf16>
    %346 = vector.shape_cast %336 : vector<8x32xbf16> to vector<1x8x32xbf16>
    tpu.vector_store %arg5[%343, %c0_100, %c0_101], %346 {strides = array<i32>} : memref<8x8x32xbf16, #tpu.memory_space<vmem>>, vector<1x8x32xbf16>,
    %347 = arith.index_cast %311 : i32 to index
    %c0_102 = arith.constant 0 : index
    %c0_103 = arith.constant 0 : index
    %348 = vector.load %arg4[%347, %c0_102, %c0_103] : memref<8x8x32xbf16, #tpu.memory_space<vmem>>, vector<1x8x32xbf16>
    %349 = vector.shape_cast %348 : vector<1x8x32xbf16> to vector<8x32xbf16>
    %350 = vector.shape_cast %338 : vector<8x32xbf16> to vector<1x8x32xbf16>
    tpu.vector_store %arg4[%347, %c0_102, %c0_103], %350 {strides = array<i32>} : memref<8x8x32xbf16, #tpu.memory_space<vmem>>, vector<1x8x32xbf16>,
    %351 = arith.index_cast %c7_i32_92 : i32 to index
    %c0_104 = arith.constant 0 : index
    %c0_105 = arith.constant 0 : index
    %352 = vector.load %arg6[%351, %c0_104, %c0_105] : memref<8x8x32xbf16, #tpu.memory_space<vmem>>, vector<1x8x32xbf16>
    %353 = vector.shape_cast %352 : vector<1x8x32xbf16> to vector<8x32xbf16>
    %354 = vector.shape_cast %338 : vector<8x32xbf16> to vector<1x8x32xbf16>
    tpu.vector_store %arg6[%351, %c0_104, %c0_105], %354 {strides = array<i32>} : memref<8x8x32xbf16, #tpu.memory_space<vmem>>, vector<1x8x32xbf16>,
    %c8_i32 = arith.constant 8 : i32
    return
  }
  func.func @transform_0(%arg0: i32) -> (i32, i32, i32) {
    %c0_i32 = arith.constant 0 : i32
    %c0_i32_0 = arith.constant 0 : i32
    %c0_i32_1 = arith.constant 0 : i32
    return %c0_i32, %arg0, %c0_i32_0 : i32, i32, i32
  }
  func.func @transform_1(%arg0: i32) -> (i32, i32) {
    %c0_i32 = arith.constant 0 : i32
    %c0_i32_0 = arith.constant 0 : i32
    %c0_i32_1 = arith.constant 0 : i32
    return %c0_i32, %c0_i32_0 : i32, i32
  }
  func.func @transform_2(%arg0: i32) -> (i32, i32, i32) {
    %c0_i32 = arith.constant 0 : i32
    %c0_i32_0 = arith.constant 0 : i32
    %c0_i32_1 = arith.constant 0 : i32
    return %c0_i32, %arg0, %c0_i32_0 : i32, i32, i32
  }
  func.func @transform_3(%arg0: i32) -> (i32, i32, i32) {
    %c0_i32 = arith.constant 0 : i32
    %c0_i32_0 = arith.constant 0 : i32
    %c0_i32_1 = arith.constant 0 : i32
    return %c0_i32, %arg0, %c0_i32_0 : i32, i32, i32
  }
  func.func @transform_4(%arg0: i32) -> (i32, i32, i32) {
    %c0_i32 = arith.constant 0 : i32
    %c0_i32_0 = arith.constant 0 : i32
    %c0_i32_1 = arith.constant 0 : i32
    return %c0_i32, %arg0, %c0_i32_0 : i32, i32, i32
  }
  func.func @transform_5(%arg0: i32) -> (i32, i32, i32) {
    %c0_i32 = arith.constant 0 : i32
    %c0_i32_0 = arith.constant 0 : i32
    %c0_i32_1 = arith.constant 0 : i32
    return %c0_i32, %arg0, %c0_i32_0 : i32, i32, i32
  }
}

module attributes {stable_mosaic.version = 11 : i64} {
  func.func @input_proj_kernel(%arg0: i32, %arg1: memref<64x32xbf16, #tpu.memory_space<vmem>>, %arg2: memref<64x32xbf16, #tpu.memory_space<vmem>>, %arg3: memref<64x32xbf16, #tpu.memory_space<vmem>>, %arg4: memref<64x32xbf16, #tpu.memory_space<vmem>>, %arg5: memref<32x128xbf16, #tpu.memory_space<vmem>>, %arg6: memref<32x128xbf16, #tpu.memory_space<vmem>>, %arg7: memref<32x128xbf16, #tpu.memory_space<vmem>>, %arg8: memref<32x128xbf16, #tpu.memory_space<vmem>>, %arg9: memref<1x128xf32, #tpu.memory_space<vmem>>, %arg10: memref<1x128xf32, #tpu.memory_space<vmem>>, %arg11: memref<64x256xbf16, #tpu.memory_space<vmem>>) attributes {dimension_semantics = [#tpu.dimension_semantics<parallel>], iteration_bounds = array<i64: 1>, scalar_prefetch = 0 : i64, scratch_operands = 0 : i64, tpu.core_type = #tpu.core_type<tc>, window_params = [{transform_indices = @transform_0, window_bounds = array<i64: 64, 32>}, {transform_indices = @transform_1, window_bounds = array<i64: 64, 32>}, {transform_indices = @transform_2, window_bounds = array<i64: 64, 32>}, {transform_indices = @transform_3, window_bounds = array<i64: 64, 32>}, {pipeline_mode = #tpu.pipeline_mode<synchronous>, transform_indices = @transform_4, window_bounds = array<i64: 32, 128>}, {pipeline_mode = #tpu.pipeline_mode<synchronous>, transform_indices = @transform_5, window_bounds = array<i64: 32, 128>}, {pipeline_mode = #tpu.pipeline_mode<synchronous>, transform_indices = @transform_6, window_bounds = array<i64: 32, 128>}, {pipeline_mode = #tpu.pipeline_mode<synchronous>, transform_indices = @transform_7, window_bounds = array<i64: 32, 128>}, {pipeline_mode = #tpu.pipeline_mode<synchronous>, transform_indices = @transform_8, window_bounds = array<i64: 1, 128>}, {pipeline_mode = #tpu.pipeline_mode<synchronous>, transform_indices = @transform_9, window_bounds = array<i64: 1, 128>}, {transform_indices = @transform_10, window_bounds = array<i64: 64, 256>}]} {
    %c0 = arith.constant 0 : index
    %c0_0 = arith.constant 0 : index
    %0 = vector.load %arg1[%c0, %c0_0] : memref<64x32xbf16, #tpu.memory_space<vmem>>, vector<64x32xbf16>
    %c0_1 = arith.constant 0 : index
    %c0_2 = arith.constant 0 : index
    %1 = vector.load %arg5[%c0_1, %c0_2] : memref<32x128xbf16, #tpu.memory_space<vmem>>, vector<32x128xbf16>
    %cst = arith.constant dense<0.000000e+00> : vector<64x128xf32>
    %2 = tpu.matmul %0, %1, %cst {dimension_numbers = #tpu.dot_dimension_numbers<[1], [0], [0], [1], [0, 0, 1, 1], [], []>} : vector<64x32xbf16>, vector<32x128xbf16>, vector<64x128xf32> -> vector<64x128xf32>
    %c0_3 = arith.constant 0 : index
    %c0_4 = arith.constant 0 : index
    %3 = vector.load %arg2[%c0_3, %c0_4] : memref<64x32xbf16, #tpu.memory_space<vmem>>, vector<64x32xbf16>
    %c0_5 = arith.constant 0 : index
    %c0_6 = arith.constant 0 : index
    %4 = vector.load %arg6[%c0_5, %c0_6] : memref<32x128xbf16, #tpu.memory_space<vmem>>, vector<32x128xbf16>
    %cst_7 = arith.constant dense<0.000000e+00> : vector<64x128xf32>
    %5 = tpu.matmul %3, %4, %cst_7 {dimension_numbers = #tpu.dot_dimension_numbers<[1], [0], [0], [1], [0, 0, 1, 1], [], []>} : vector<64x32xbf16>, vector<32x128xbf16>, vector<64x128xf32> -> vector<64x128xf32>
    %6 = arith.addf %2, %5 : vector<64x128xf32>
    %c0_8 = arith.constant 0 : index
    %c0_9 = arith.constant 0 : index
    %7 = vector.load %arg9[%c0_8, %c0_9] : memref<1x128xf32, #tpu.memory_space<vmem>>, vector<1x128xf32>
    %8 = vector.broadcast %7 : vector<1x128xf32> to vector<64x128xf32>
    %9 = arith.addf %6, %8 : vector<64x128xf32>
    %c0_10 = arith.constant 0 : index
    %c0_11 = arith.constant 0 : index
    %10 = vector.load %arg3[%c0_10, %c0_11] : memref<64x32xbf16, #tpu.memory_space<vmem>>, vector<64x32xbf16>
    %c0_12 = arith.constant 0 : index
    %c0_13 = arith.constant 0 : index
    %11 = vector.load %arg7[%c0_12, %c0_13] : memref<32x128xbf16, #tpu.memory_space<vmem>>, vector<32x128xbf16>
    %cst_14 = arith.constant dense<0.000000e+00> : vector<64x128xf32>
    %12 = tpu.matmul %10, %11, %cst_14 {dimension_numbers = #tpu.dot_dimension_numbers<[1], [0], [0], [1], [0, 0, 1, 1], [], []>} : vector<64x32xbf16>, vector<32x128xbf16>, vector<64x128xf32> -> vector<64x128xf32>
    %c0_15 = arith.constant 0 : index
    %c0_16 = arith.constant 0 : index
    %13 = vector.load %arg4[%c0_15, %c0_16] : memref<64x32xbf16, #tpu.memory_space<vmem>>, vector<64x32xbf16>
    %c0_17 = arith.constant 0 : index
    %c0_18 = arith.constant 0 : index
    %14 = vector.load %arg8[%c0_17, %c0_18] : memref<32x128xbf16, #tpu.memory_space<vmem>>, vector<32x128xbf16>
    %cst_19 = arith.constant dense<0.000000e+00> : vector<64x128xf32>
    %15 = tpu.matmul %13, %14, %cst_19 {dimension_numbers = #tpu.dot_dimension_numbers<[1], [0], [0], [1], [0, 0, 1, 1], [], []>} : vector<64x32xbf16>, vector<32x128xbf16>, vector<64x128xf32> -> vector<64x128xf32>
    %16 = arith.addf %12, %15 : vector<64x128xf32>
    %c0_20 = arith.constant 0 : index
    %c0_21 = arith.constant 0 : index
    %17 = vector.load %arg10[%c0_20, %c0_21] : memref<1x128xf32, #tpu.memory_space<vmem>>, vector<1x128xf32>
    %18 = vector.broadcast %17 : vector<1x128xf32> to vector<64x128xf32>
    %19 = arith.addf %16, %18 : vector<64x128xf32>
    %20 = vector.extract_strided_slice %9 {offsets = [0, 0], sizes = [64, 32], strides = [1, 1]} : vector<64x128xf32> to vector<64x32xf32>
    %21 = arith.truncf %20 : vector<64x32xf32> to vector<64x32xbf16>
    %c0_22 = arith.constant 0 : index
    %c0_23 = arith.constant 0 : index
    %22 = vector.load %arg11[%c0_22, %c0_23] : memref<64x256xbf16, #tpu.memory_space<vmem>>, vector<64x32xbf16>
    tpu.vector_store %arg11[%c0_22, %c0_23], %21 {strides = array<i32>} : memref<64x256xbf16, #tpu.memory_space<vmem>>, vector<64x32xbf16>,
    %23 = vector.extract_strided_slice %19 {offsets = [0, 0], sizes = [64, 32], strides = [1, 1]} : vector<64x128xf32> to vector<64x32xf32>
    %24 = arith.truncf %23 : vector<64x32xf32> to vector<64x32xbf16>
    %c0_24 = arith.constant 0 : index
    %c32 = arith.constant 32 : index
    %25 = vector.load %arg11[%c0_24, %c32] : memref<64x256xbf16, #tpu.memory_space<vmem>>, vector<64x32xbf16>
    tpu.vector_store %arg11[%c0_24, %c32], %24 {strides = array<i32>} : memref<64x256xbf16, #tpu.memory_space<vmem>>, vector<64x32xbf16>,
    %26 = vector.extract_strided_slice %9 {offsets = [0, 32], sizes = [64, 32], strides = [1, 1]} : vector<64x128xf32> to vector<64x32xf32>
    %27 = arith.truncf %26 : vector<64x32xf32> to vector<64x32xbf16>
    %c0_25 = arith.constant 0 : index
    %c64 = arith.constant 64 : index
    %28 = vector.load %arg11[%c0_25, %c64] : memref<64x256xbf16, #tpu.memory_space<vmem>>, vector<64x32xbf16>
    tpu.vector_store %arg11[%c0_25, %c64], %27 {strides = array<i32>} : memref<64x256xbf16, #tpu.memory_space<vmem>>, vector<64x32xbf16>,
    %29 = vector.extract_strided_slice %19 {offsets = [0, 32], sizes = [64, 32], strides = [1, 1]} : vector<64x128xf32> to vector<64x32xf32>
    %30 = arith.truncf %29 : vector<64x32xf32> to vector<64x32xbf16>
    %c0_26 = arith.constant 0 : index
    %c96 = arith.constant 96 : index
    %31 = vector.load %arg11[%c0_26, %c96] : memref<64x256xbf16, #tpu.memory_space<vmem>>, vector<64x32xbf16>
    tpu.vector_store %arg11[%c0_26, %c96], %30 {strides = array<i32>} : memref<64x256xbf16, #tpu.memory_space<vmem>>, vector<64x32xbf16>,
    %32 = vector.extract_strided_slice %9 {offsets = [0, 64], sizes = [64, 32], strides = [1, 1]} : vector<64x128xf32> to vector<64x32xf32>
    %33 = arith.truncf %32 : vector<64x32xf32> to vector<64x32xbf16>
    %c0_27 = arith.constant 0 : index
    %c128 = arith.constant 128 : index
    %34 = vector.load %arg11[%c0_27, %c128] : memref<64x256xbf16, #tpu.memory_space<vmem>>, vector<64x32xbf16>
    tpu.vector_store %arg11[%c0_27, %c128], %33 {strides = array<i32>} : memref<64x256xbf16, #tpu.memory_space<vmem>>, vector<64x32xbf16>,
    %35 = vector.extract_strided_slice %19 {offsets = [0, 64], sizes = [64, 32], strides = [1, 1]} : vector<64x128xf32> to vector<64x32xf32>
    %36 = arith.truncf %35 : vector<64x32xf32> to vector<64x32xbf16>
    %c0_28 = arith.constant 0 : index
    %c160 = arith.constant 160 : index
    %37 = vector.load %arg11[%c0_28, %c160] : memref<64x256xbf16, #tpu.memory_space<vmem>>, vector<64x32xbf16>
    tpu.vector_store %arg11[%c0_28, %c160], %36 {strides = array<i32>} : memref<64x256xbf16, #tpu.memory_space<vmem>>, vector<64x32xbf16>,
    %38 = vector.extract_strided_slice %9 {offsets = [0, 96], sizes = [64, 32], strides = [1, 1]} : vector<64x128xf32> to vector<64x32xf32>
    %39 = arith.truncf %38 : vector<64x32xf32> to vector<64x32xbf16>
    %c0_29 = arith.constant 0 : index
    %c192 = arith.constant 192 : index
    %40 = vector.load %arg11[%c0_29, %c192] : memref<64x256xbf16, #tpu.memory_space<vmem>>, vector<64x32xbf16>
    tpu.vector_store %arg11[%c0_29, %c192], %39 {strides = array<i32>} : memref<64x256xbf16, #tpu.memory_space<vmem>>, vector<64x32xbf16>,
    %41 = vector.extract_strided_slice %19 {offsets = [0, 96], sizes = [64, 32], strides = [1, 1]} : vector<64x128xf32> to vector<64x32xf32>
    %42 = arith.truncf %41 : vector<64x32xf32> to vector<64x32xbf16>
    %c0_30 = arith.constant 0 : index
    %c224 = arith.constant 224 : index
    %43 = vector.load %arg11[%c0_30, %c224] : memref<64x256xbf16, #tpu.memory_space<vmem>>, vector<64x32xbf16>
    tpu.vector_store %arg11[%c0_30, %c224], %42 {strides = array<i32>} : memref<64x256xbf16, #tpu.memory_space<vmem>>, vector<64x32xbf16>,
    return
  }
  func.func @transform_0(%arg0: i32) -> (i32, i32) {
    %c0_i32 = arith.constant 0 : i32
    %c0_i32_0 = arith.constant 0 : i32
    return %arg0, %c0_i32 : i32, i32
  }
  func.func @transform_1(%arg0: i32) -> (i32, i32) {
    %c0_i32 = arith.constant 0 : i32
    %c0_i32_0 = arith.constant 0 : i32
    return %arg0, %c0_i32 : i32, i32
  }
  func.func @transform_2(%arg0: i32) -> (i32, i32) {
    %c0_i32 = arith.constant 0 : i32
    %c0_i32_0 = arith.constant 0 : i32
    return %arg0, %c0_i32 : i32, i32
  }
  func.func @transform_3(%arg0: i32) -> (i32, i32) {
    %c0_i32 = arith.constant 0 : i32
    %c0_i32_0 = arith.constant 0 : i32
    return %arg0, %c0_i32 : i32, i32
  }
  func.func @transform_4(%arg0: i32) -> (i32, i32) {
    %c0_i32 = arith.constant 0 : i32
    %c0_i32_0 = arith.constant 0 : i32
    %c0_i32_1 = arith.constant 0 : i32
    return %c0_i32, %c0_i32_0 : i32, i32
  }
  func.func @transform_5(%arg0: i32) -> (i32, i32) {
    %c0_i32 = arith.constant 0 : i32
    %c0_i32_0 = arith.constant 0 : i32
    %c0_i32_1 = arith.constant 0 : i32
    return %c0_i32, %c0_i32_0 : i32, i32
  }
  func.func @transform_6(%arg0: i32) -> (i32, i32) {
    %c0_i32 = arith.constant 0 : i32
    %c0_i32_0 = arith.constant 0 : i32
    %c0_i32_1 = arith.constant 0 : i32
    return %c0_i32, %c0_i32_0 : i32, i32
  }
  func.func @transform_7(%arg0: i32) -> (i32, i32) {
    %c0_i32 = arith.constant 0 : i32
    %c0_i32_0 = arith.constant 0 : i32
    %c0_i32_1 = arith.constant 0 : i32
    return %c0_i32, %c0_i32_0 : i32, i32
  }
  func.func @transform_8(%arg0: i32) -> (i32, i32) {
    %c0_i32 = arith.constant 0 : i32
    %c0_i32_0 = arith.constant 0 : i32
    %c0_i32_1 = arith.constant 0 : i32
    return %c0_i32, %c0_i32_0 : i32, i32
  }
  func.func @transform_9(%arg0: i32) -> (i32, i32) {
    %c0_i32 = arith.constant 0 : i32
    %c0_i32_0 = arith.constant 0 : i32
    %c0_i32_1 = arith.constant 0 : i32
    return %c0_i32, %c0_i32_0 : i32, i32
  }
  func.func @transform_10(%arg0: i32) -> (i32, i32) {
    %c0_i32 = arith.constant 0 : i32
    %c0_i32_0 = arith.constant 0 : i32
    return %arg0, %c0_i32 : i32, i32
  }
}

module attributes {stable_mosaic.version = 11 : i64} {
  func.func @bilstm_kernel(%arg0: i32, %arg1: memref<8x8x256xbf16, #tpu.memory_space<vmem>>, %arg2: memref<64x256xbf16, #tpu.memory_space<vmem>>, %arg3: memref<64x8xbf16, #tpu.memory_space<vmem>>, %arg4: memref<1x8xf32, #tpu.memory_space<vmem>>, %arg5: memref<8x8xf32, #tpu.memory_space<vmem>>) attributes {dimension_semantics = [#tpu.dimension_semantics<parallel>], iteration_bounds = array<i64: 1>, scalar_prefetch = 0 : i64, scratch_operands = 0 : i64, tpu.core_type = #tpu.core_type<tc>, window_params = [{transform_indices = @transform_0, window_bounds = array<i64: 8, 8, 256>}, {pipeline_mode = #tpu.pipeline_mode<synchronous>, transform_indices = @transform_1, window_bounds = array<i64: 64, 256>}, {pipeline_mode = #tpu.pipeline_mode<synchronous>, transform_indices = @transform_2, window_bounds = array<i64: 64, 8>}, {pipeline_mode = #tpu.pipeline_mode<synchronous>, transform_indices = @transform_3, window_bounds = array<i64: 1, 8>}, {transform_indices = @transform_4, window_bounds = array<i64: 8, 8>}]} {
    %c0 = arith.constant 0 : index
    %c0_0 = arith.constant 0 : index
    %0 = vector.load %arg2[%c0, %c0_0] : memref<64x256xbf16, #tpu.memory_space<vmem>>, vector<64x256xbf16>
    %cst = arith.constant 0.000000e+00 : f32
    %1 = vector.broadcast %cst : f32 to vector<8x64xf32>
    %cst_1 = arith.constant 0.000000e+00 : f32
    %2 = vector.broadcast %cst_1 : f32 to vector<8x64xf32>
    %c0_i32 = arith.constant 0 : i32
    %3 = arith.index_cast %c0_i32 : i32 to index
    %c0_2 = arith.constant 0 : index
    %c0_3 = arith.constant 0 : index
    %4 = vector.load %arg1[%3, %c0_2, %c0_3] : memref<8x8x256xbf16, #tpu.memory_space<vmem>>, vector<1x8x256xbf16>
    %5 = vector.shape_cast %4 : vector<1x8x256xbf16> to vector<8x256xbf16>
    %6 = arith.extf %5 : vector<8x256xbf16> to vector<8x256xf32>
    %7 = arith.truncf %1 : vector<8x64xf32> to vector<8x64xbf16>
    %cst_4 = arith.constant dense<0.000000e+00> : vector<8x256xf32>
    %8 = tpu.matmul %7, %0, %cst_4 {dimension_numbers = #tpu.dot_dimension_numbers<[1], [0], [0], [1], [0, 0, 1, 1], [], []>} : vector<8x64xbf16>, vector<64x256xbf16>, vector<8x256xf32> -> vector<8x256xf32>
    %9 = arith.addf %6, %8 : vector<8x256xf32>
    %10 = vector.extract_strided_slice %9 {offsets = [0, 0], sizes = [8, 192], strides = [1, 1]} : vector<8x256xf32> to vector<8x192xf32>
    %11 = arith.negf %10 : vector<8x192xf32>
    %12 = math.exp %11 : vector<8x192xf32>
    %cst_5 = arith.constant 1.000000e+00 : f32
    %13 = vector.broadcast %cst_5 : f32 to vector<8x192xf32>
    %14 = arith.addf %13, %12 : vector<8x192xf32>
    %15 = arith.divf %13, %14 : vector<8x192xf32>
    %16 = vector.extract_strided_slice %9 {offsets = [0, 192], sizes = [8, 64], strides = [1, 1]} : vector<8x256xf32> to vector<8x64xf32>
    %17 = math.tanh %16 : vector<8x64xf32>
    %18 = vector.extract_strided_slice %15 {offsets = [0, 0], sizes = [8, 64], strides = [1, 1]} : vector<8x192xf32> to vector<8x64xf32>
    %19 = vector.extract_strided_slice %15 {offsets = [0, 64], sizes = [8, 64], strides = [1, 1]} : vector<8x192xf32> to vector<8x64xf32>
    %20 = vector.extract_strided_slice %15 {offsets = [0, 128], sizes = [8, 64], strides = [1, 1]} : vector<8x192xf32> to vector<8x64xf32>
    %21 = arith.mulf %19, %2 : vector<8x64xf32>
    %22 = arith.mulf %18, %17 : vector<8x64xf32>
    %23 = arith.addf %21, %22 : vector<8x64xf32>
    %24 = math.tanh %23 : vector<8x64xf32>
    %25 = arith.mulf %20, %24 : vector<8x64xf32>
    %c1_i32 = arith.constant 1 : i32
    %26 = arith.index_cast %c1_i32 : i32 to index
    %c0_6 = arith.constant 0 : index
    %c0_7 = arith.constant 0 : index
    %27 = vector.load %arg1[%26, %c0_6, %c0_7] : memref<8x8x256xbf16, #tpu.memory_space<vmem>>, vector<1x8x256xbf16>
    %28 = vector.shape_cast %27 : vector<1x8x256xbf16> to vector<8x256xbf16>
    %29 = arith.extf %28 : vector<8x256xbf16> to vector<8x256xf32>
    %30 = arith.truncf %25 : vector<8x64xf32> to vector<8x64xbf16>
    %cst_8 = arith.constant dense<0.000000e+00> : vector<8x256xf32>
    %31 = tpu.matmul %30, %0, %cst_8 {dimension_numbers = #tpu.dot_dimension_numbers<[1], [0], [0], [1], [0, 0, 1, 1], [], []>} : vector<8x64xbf16>, vector<64x256xbf16>, vector<8x256xf32> -> vector<8x256xf32>
    %32 = arith.addf %29, %31 : vector<8x256xf32>
    %33 = vector.extract_strided_slice %32 {offsets = [0, 0], sizes = [8, 192], strides = [1, 1]} : vector<8x256xf32> to vector<8x192xf32>
    %34 = arith.negf %33 : vector<8x192xf32>
    %35 = math.exp %34 : vector<8x192xf32>
    %cst_9 = arith.constant 1.000000e+00 : f32
    %36 = vector.broadcast %cst_9 : f32 to vector<8x192xf32>
    %37 = arith.addf %36, %35 : vector<8x192xf32>
    %38 = arith.divf %36, %37 : vector<8x192xf32>
    %39 = vector.extract_strided_slice %32 {offsets = [0, 192], sizes = [8, 64], strides = [1, 1]} : vector<8x256xf32> to vector<8x64xf32>
    %40 = math.tanh %39 : vector<8x64xf32>
    %41 = vector.extract_strided_slice %38 {offsets = [0, 0], sizes = [8, 64], strides = [1, 1]} : vector<8x192xf32> to vector<8x64xf32>
    %42 = vector.extract_strided_slice %38 {offsets = [0, 64], sizes = [8, 64], strides = [1, 1]} : vector<8x192xf32> to vector<8x64xf32>
    %43 = vector.extract_strided_slice %38 {offsets = [0, 128], sizes = [8, 64], strides = [1, 1]} : vector<8x192xf32> to vector<8x64xf32>
    %44 = arith.mulf %42, %23 : vector<8x64xf32>
    %45 = arith.mulf %41, %40 : vector<8x64xf32>
    %46 = arith.addf %44, %45 : vector<8x64xf32>
    %47 = math.tanh %46 : vector<8x64xf32>
    %48 = arith.mulf %43, %47 : vector<8x64xf32>
    %c2_i32 = arith.constant 2 : i32
    %49 = arith.index_cast %c2_i32 : i32 to index
    %c0_10 = arith.constant 0 : index
    %c0_11 = arith.constant 0 : index
    %50 = vector.load %arg1[%49, %c0_10, %c0_11] : memref<8x8x256xbf16, #tpu.memory_space<vmem>>, vector<1x8x256xbf16>
    %51 = vector.shape_cast %50 : vector<1x8x256xbf16> to vector<8x256xbf16>
    %52 = arith.extf %51 : vector<8x256xbf16> to vector<8x256xf32>
    %53 = arith.truncf %48 : vector<8x64xf32> to vector<8x64xbf16>
    %cst_12 = arith.constant dense<0.000000e+00> : vector<8x256xf32>
    %54 = tpu.matmul %53, %0, %cst_12 {dimension_numbers = #tpu.dot_dimension_numbers<[1], [0], [0], [1], [0, 0, 1, 1], [], []>} : vector<8x64xbf16>, vector<64x256xbf16>, vector<8x256xf32> -> vector<8x256xf32>
    %55 = arith.addf %52, %54 : vector<8x256xf32>
    %56 = vector.extract_strided_slice %55 {offsets = [0, 0], sizes = [8, 192], strides = [1, 1]} : vector<8x256xf32> to vector<8x192xf32>
    %57 = arith.negf %56 : vector<8x192xf32>
    %58 = math.exp %57 : vector<8x192xf32>
    %cst_13 = arith.constant 1.000000e+00 : f32
    %59 = vector.broadcast %cst_13 : f32 to vector<8x192xf32>
    %60 = arith.addf %59, %58 : vector<8x192xf32>
    %61 = arith.divf %59, %60 : vector<8x192xf32>
    %62 = vector.extract_strided_slice %55 {offsets = [0, 192], sizes = [8, 64], strides = [1, 1]} : vector<8x256xf32> to vector<8x64xf32>
    %63 = math.tanh %62 : vector<8x64xf32>
    %64 = vector.extract_strided_slice %61 {offsets = [0, 0], sizes = [8, 64], strides = [1, 1]} : vector<8x192xf32> to vector<8x64xf32>
    %65 = vector.extract_strided_slice %61 {offsets = [0, 64], sizes = [8, 64], strides = [1, 1]} : vector<8x192xf32> to vector<8x64xf32>
    %66 = vector.extract_strided_slice %61 {offsets = [0, 128], sizes = [8, 64], strides = [1, 1]} : vector<8x192xf32> to vector<8x64xf32>
    %67 = arith.mulf %65, %46 : vector<8x64xf32>
    %68 = arith.mulf %64, %63 : vector<8x64xf32>
    %69 = arith.addf %67, %68 : vector<8x64xf32>
    %70 = math.tanh %69 : vector<8x64xf32>
    %71 = arith.mulf %66, %70 : vector<8x64xf32>
    %c3_i32 = arith.constant 3 : i32
    %72 = arith.index_cast %c3_i32 : i32 to index
    %c0_14 = arith.constant 0 : index
    %c0_15 = arith.constant 0 : index
    %73 = vector.load %arg1[%72, %c0_14, %c0_15] : memref<8x8x256xbf16, #tpu.memory_space<vmem>>, vector<1x8x256xbf16>
    %74 = vector.shape_cast %73 : vector<1x8x256xbf16> to vector<8x256xbf16>
    %75 = arith.extf %74 : vector<8x256xbf16> to vector<8x256xf32>
    %76 = arith.truncf %71 : vector<8x64xf32> to vector<8x64xbf16>
    %cst_16 = arith.constant dense<0.000000e+00> : vector<8x256xf32>
    %77 = tpu.matmul %76, %0, %cst_16 {dimension_numbers = #tpu.dot_dimension_numbers<[1], [0], [0], [1], [0, 0, 1, 1], [], []>} : vector<8x64xbf16>, vector<64x256xbf16>, vector<8x256xf32> -> vector<8x256xf32>
    %78 = arith.addf %75, %77 : vector<8x256xf32>
    %79 = vector.extract_strided_slice %78 {offsets = [0, 0], sizes = [8, 192], strides = [1, 1]} : vector<8x256xf32> to vector<8x192xf32>
    %80 = arith.negf %79 : vector<8x192xf32>
    %81 = math.exp %80 : vector<8x192xf32>
    %cst_17 = arith.constant 1.000000e+00 : f32
    %82 = vector.broadcast %cst_17 : f32 to vector<8x192xf32>
    %83 = arith.addf %82, %81 : vector<8x192xf32>
    %84 = arith.divf %82, %83 : vector<8x192xf32>
    %85 = vector.extract_strided_slice %78 {offsets = [0, 192], sizes = [8, 64], strides = [1, 1]} : vector<8x256xf32> to vector<8x64xf32>
    %86 = math.tanh %85 : vector<8x64xf32>
    %87 = vector.extract_strided_slice %84 {offsets = [0, 0], sizes = [8, 64], strides = [1, 1]} : vector<8x192xf32> to vector<8x64xf32>
    %88 = vector.extract_strided_slice %84 {offsets = [0, 64], sizes = [8, 64], strides = [1, 1]} : vector<8x192xf32> to vector<8x64xf32>
    %89 = vector.extract_strided_slice %84 {offsets = [0, 128], sizes = [8, 64], strides = [1, 1]} : vector<8x192xf32> to vector<8x64xf32>
    %90 = arith.mulf %88, %69 : vector<8x64xf32>
    %91 = arith.mulf %87, %86 : vector<8x64xf32>
    %92 = arith.addf %90, %91 : vector<8x64xf32>
    %93 = math.tanh %92 : vector<8x64xf32>
    %94 = arith.mulf %89, %93 : vector<8x64xf32>
    %c4_i32 = arith.constant 4 : i32
    %95 = arith.index_cast %c4_i32 : i32 to index
    %c0_18 = arith.constant 0 : index
    %c0_19 = arith.constant 0 : index
    %96 = vector.load %arg1[%95, %c0_18, %c0_19] : memref<8x8x256xbf16, #tpu.memory_space<vmem>>, vector<1x8x256xbf16>
    %97 = vector.shape_cast %96 : vector<1x8x256xbf16> to vector<8x256xbf16>
    %98 = arith.extf %97 : vector<8x256xbf16> to vector<8x256xf32>
    %99 = arith.truncf %94 : vector<8x64xf32> to vector<8x64xbf16>
    %cst_20 = arith.constant dense<0.000000e+00> : vector<8x256xf32>
    %100 = tpu.matmul %99, %0, %cst_20 {dimension_numbers = #tpu.dot_dimension_numbers<[1], [0], [0], [1], [0, 0, 1, 1], [], []>} : vector<8x64xbf16>, vector<64x256xbf16>, vector<8x256xf32> -> vector<8x256xf32>
    %101 = arith.addf %98, %100 : vector<8x256xf32>
    %102 = vector.extract_strided_slice %101 {offsets = [0, 0], sizes = [8, 192], strides = [1, 1]} : vector<8x256xf32> to vector<8x192xf32>
    %103 = arith.negf %102 : vector<8x192xf32>
    %104 = math.exp %103 : vector<8x192xf32>
    %cst_21 = arith.constant 1.000000e+00 : f32
    %105 = vector.broadcast %cst_21 : f32 to vector<8x192xf32>
    %106 = arith.addf %105, %104 : vector<8x192xf32>
    %107 = arith.divf %105, %106 : vector<8x192xf32>
    %108 = vector.extract_strided_slice %101 {offsets = [0, 192], sizes = [8, 64], strides = [1, 1]} : vector<8x256xf32> to vector<8x64xf32>
    %109 = math.tanh %108 : vector<8x64xf32>
    %110 = vector.extract_strided_slice %107 {offsets = [0, 0], sizes = [8, 64], strides = [1, 1]} : vector<8x192xf32> to vector<8x64xf32>
    %111 = vector.extract_strided_slice %107 {offsets = [0, 64], sizes = [8, 64], strides = [1, 1]} : vector<8x192xf32> to vector<8x64xf32>
    %112 = vector.extract_strided_slice %107 {offsets = [0, 128], sizes = [8, 64], strides = [1, 1]} : vector<8x192xf32> to vector<8x64xf32>
    %113 = arith.mulf %111, %92 : vector<8x64xf32>
    %114 = arith.mulf %110, %109 : vector<8x64xf32>
    %115 = arith.addf %113, %114 : vector<8x64xf32>
    %116 = math.tanh %115 : vector<8x64xf32>
    %117 = arith.mulf %112, %116 : vector<8x64xf32>
    %c5_i32 = arith.constant 5 : i32
    %118 = arith.index_cast %c5_i32 : i32 to index
    %c0_22 = arith.constant 0 : index
    %c0_23 = arith.constant 0 : index
    %119 = vector.load %arg1[%118, %c0_22, %c0_23] : memref<8x8x256xbf16, #tpu.memory_space<vmem>>, vector<1x8x256xbf16>
    %120 = vector.shape_cast %119 : vector<1x8x256xbf16> to vector<8x256xbf16>
    %121 = arith.extf %120 : vector<8x256xbf16> to vector<8x256xf32>
    %122 = arith.truncf %117 : vector<8x64xf32> to vector<8x64xbf16>
    %cst_24 = arith.constant dense<0.000000e+00> : vector<8x256xf32>
    %123 = tpu.matmul %122, %0, %cst_24 {dimension_numbers = #tpu.dot_dimension_numbers<[1], [0], [0], [1], [0, 0, 1, 1], [], []>} : vector<8x64xbf16>, vector<64x256xbf16>, vector<8x256xf32> -> vector<8x256xf32>
    %124 = arith.addf %121, %123 : vector<8x256xf32>
    %125 = vector.extract_strided_slice %124 {offsets = [0, 0], sizes = [8, 192], strides = [1, 1]} : vector<8x256xf32> to vector<8x192xf32>
    %126 = arith.negf %125 : vector<8x192xf32>
    %127 = math.exp %126 : vector<8x192xf32>
    %cst_25 = arith.constant 1.000000e+00 : f32
    %128 = vector.broadcast %cst_25 : f32 to vector<8x192xf32>
    %129 = arith.addf %128, %127 : vector<8x192xf32>
    %130 = arith.divf %128, %129 : vector<8x192xf32>
    %131 = vector.extract_strided_slice %124 {offsets = [0, 192], sizes = [8, 64], strides = [1, 1]} : vector<8x256xf32> to vector<8x64xf32>
    %132 = math.tanh %131 : vector<8x64xf32>
    %133 = vector.extract_strided_slice %130 {offsets = [0, 0], sizes = [8, 64], strides = [1, 1]} : vector<8x192xf32> to vector<8x64xf32>
    %134 = vector.extract_strided_slice %130 {offsets = [0, 64], sizes = [8, 64], strides = [1, 1]} : vector<8x192xf32> to vector<8x64xf32>
    %135 = vector.extract_strided_slice %130 {offsets = [0, 128], sizes = [8, 64], strides = [1, 1]} : vector<8x192xf32> to vector<8x64xf32>
    %136 = arith.mulf %134, %115 : vector<8x64xf32>
    %137 = arith.mulf %133, %132 : vector<8x64xf32>
    %138 = arith.addf %136, %137 : vector<8x64xf32>
    %139 = math.tanh %138 : vector<8x64xf32>
    %140 = arith.mulf %135, %139 : vector<8x64xf32>
    %c6_i32 = arith.constant 6 : i32
    %141 = arith.index_cast %c6_i32 : i32 to index
    %c0_26 = arith.constant 0 : index
    %c0_27 = arith.constant 0 : index
    %142 = vector.load %arg1[%141, %c0_26, %c0_27] : memref<8x8x256xbf16, #tpu.memory_space<vmem>>, vector<1x8x256xbf16>
    %143 = vector.shape_cast %142 : vector<1x8x256xbf16> to vector<8x256xbf16>
    %144 = arith.extf %143 : vector<8x256xbf16> to vector<8x256xf32>
    %145 = arith.truncf %140 : vector<8x64xf32> to vector<8x64xbf16>
    %cst_28 = arith.constant dense<0.000000e+00> : vector<8x256xf32>
    %146 = tpu.matmul %145, %0, %cst_28 {dimension_numbers = #tpu.dot_dimension_numbers<[1], [0], [0], [1], [0, 0, 1, 1], [], []>} : vector<8x64xbf16>, vector<64x256xbf16>, vector<8x256xf32> -> vector<8x256xf32>
    %147 = arith.addf %144, %146 : vector<8x256xf32>
    %148 = vector.extract_strided_slice %147 {offsets = [0, 0], sizes = [8, 192], strides = [1, 1]} : vector<8x256xf32> to vector<8x192xf32>
    %149 = arith.negf %148 : vector<8x192xf32>
    %150 = math.exp %149 : vector<8x192xf32>
    %cst_29 = arith.constant 1.000000e+00 : f32
    %151 = vector.broadcast %cst_29 : f32 to vector<8x192xf32>
    %152 = arith.addf %151, %150 : vector<8x192xf32>
    %153 = arith.divf %151, %152 : vector<8x192xf32>
    %154 = vector.extract_strided_slice %147 {offsets = [0, 192], sizes = [8, 64], strides = [1, 1]} : vector<8x256xf32> to vector<8x64xf32>
    %155 = math.tanh %154 : vector<8x64xf32>
    %156 = vector.extract_strided_slice %153 {offsets = [0, 0], sizes = [8, 64], strides = [1, 1]} : vector<8x192xf32> to vector<8x64xf32>
    %157 = vector.extract_strided_slice %153 {offsets = [0, 64], sizes = [8, 64], strides = [1, 1]} : vector<8x192xf32> to vector<8x64xf32>
    %158 = vector.extract_strided_slice %153 {offsets = [0, 128], sizes = [8, 64], strides = [1, 1]} : vector<8x192xf32> to vector<8x64xf32>
    %159 = arith.mulf %157, %138 : vector<8x64xf32>
    %160 = arith.mulf %156, %155 : vector<8x64xf32>
    %161 = arith.addf %159, %160 : vector<8x64xf32>
    %162 = math.tanh %161 : vector<8x64xf32>
    %163 = arith.mulf %158, %162 : vector<8x64xf32>
    %c7_i32 = arith.constant 7 : i32
    %164 = arith.index_cast %c7_i32 : i32 to index
    %c0_30 = arith.constant 0 : index
    %c0_31 = arith.constant 0 : index
    %165 = vector.load %arg1[%164, %c0_30, %c0_31] : memref<8x8x256xbf16, #tpu.memory_space<vmem>>, vector<1x8x256xbf16>
    %166 = vector.shape_cast %165 : vector<1x8x256xbf16> to vector<8x256xbf16>
    %167 = arith.extf %166 : vector<8x256xbf16> to vector<8x256xf32>
    %168 = arith.truncf %163 : vector<8x64xf32> to vector<8x64xbf16>
    %cst_32 = arith.constant dense<0.000000e+00> : vector<8x256xf32>
    %169 = tpu.matmul %168, %0, %cst_32 {dimension_numbers = #tpu.dot_dimension_numbers<[1], [0], [0], [1], [0, 0, 1, 1], [], []>} : vector<8x64xbf16>, vector<64x256xbf16>, vector<8x256xf32> -> vector<8x256xf32>
    %170 = arith.addf %167, %169 : vector<8x256xf32>
    %171 = vector.extract_strided_slice %170 {offsets = [0, 0], sizes = [8, 192], strides = [1, 1]} : vector<8x256xf32> to vector<8x192xf32>
    %172 = arith.negf %171 : vector<8x192xf32>
    %173 = math.exp %172 : vector<8x192xf32>
    %cst_33 = arith.constant 1.000000e+00 : f32
    %174 = vector.broadcast %cst_33 : f32 to vector<8x192xf32>
    %175 = arith.addf %174, %173 : vector<8x192xf32>
    %176 = arith.divf %174, %175 : vector<8x192xf32>
    %177 = vector.extract_strided_slice %170 {offsets = [0, 192], sizes = [8, 64], strides = [1, 1]} : vector<8x256xf32> to vector<8x64xf32>
    %178 = math.tanh %177 : vector<8x64xf32>
    %179 = vector.extract_strided_slice %176 {offsets = [0, 0], sizes = [8, 64], strides = [1, 1]} : vector<8x192xf32> to vector<8x64xf32>
    %180 = vector.extract_strided_slice %176 {offsets = [0, 64], sizes = [8, 64], strides = [1, 1]} : vector<8x192xf32> to vector<8x64xf32>
    %181 = vector.extract_strided_slice %176 {offsets = [0, 128], sizes = [8, 64], strides = [1, 1]} : vector<8x192xf32> to vector<8x64xf32>
    %182 = arith.mulf %180, %161 : vector<8x64xf32>
    %183 = arith.mulf %179, %178 : vector<8x64xf32>
    %184 = arith.addf %182, %183 : vector<8x64xf32>
    %185 = math.tanh %184 : vector<8x64xf32>
    %186 = arith.mulf %181, %185 : vector<8x64xf32>
    %c8_i32 = arith.constant 8 : i32
    %187 = arith.truncf %186 : vector<8x64xf32> to vector<8x64xbf16>
    %c0_34 = arith.constant 0 : index
    %c0_35 = arith.constant 0 : index
    %188 = vector.load %arg3[%c0_34, %c0_35] : memref<64x8xbf16, #tpu.memory_space<vmem>>, vector<64x8xbf16>
    %cst_36 = arith.constant dense<0.000000e+00> : vector<8x8xf32>
    %189 = tpu.matmul %187, %188, %cst_36 {dimension_numbers = #tpu.dot_dimension_numbers<[1], [0], [0], [1], [0, 0, 1, 1], [], []>} : vector<8x64xbf16>, vector<64x8xbf16>, vector<8x8xf32> -> vector<8x8xf32>
    %c0_37 = arith.constant 0 : index
    %c0_38 = arith.constant 0 : index
    %190 = vector.load %arg4[%c0_37, %c0_38] : memref<1x8xf32, #tpu.memory_space<vmem>>, vector<1x8xf32>
    %191 = vector.broadcast %190 : vector<1x8xf32> to vector<8x8xf32>
    %192 = arith.addf %189, %191 : vector<8x8xf32>
    %c0_39 = arith.constant 0 : index
    %c0_40 = arith.constant 0 : index
    %193 = vector.load %arg5[%c0_39, %c0_40] : memref<8x8xf32, #tpu.memory_space<vmem>>, vector<8x8xf32>
    tpu.vector_store %arg5[%c0_39, %c0_40], %192 {strides = array<i32>} : memref<8x8xf32, #tpu.memory_space<vmem>>, vector<8x8xf32>,
    return
  }
  func.func @transform_0(%arg0: i32) -> (i32, i32, i32) {
    %c0_i32 = arith.constant 0 : i32
    %c0_i32_0 = arith.constant 0 : i32
    %c0_i32_1 = arith.constant 0 : i32
    return %c0_i32, %arg0, %c0_i32_0 : i32, i32, i32
  }
  func.func @transform_1(%arg0: i32) -> (i32, i32) {
    %c0_i32 = arith.constant 0 : i32
    %c0_i32_0 = arith.constant 0 : i32
    %c0_i32_1 = arith.constant 0 : i32
    return %c0_i32, %c0_i32_0 : i32, i32
  }
  func.func @transform_2(%arg0: i32) -> (i32, i32) {
    %c0_i32 = arith.constant 0 : i32
    %c0_i32_0 = arith.constant 0 : i32
    %c0_i32_1 = arith.constant 0 : i32
    return %c0_i32, %c0_i32_0 : i32, i32
  }
  func.func @transform_3(%arg0: i32) -> (i32, i32) {
    %c0_i32 = arith.constant 0 : i32
    %c0_i32_0 = arith.constant 0 : i32
    %c0_i32_1 = arith.constant 0 : i32
    return %c0_i32, %c0_i32_0 : i32, i32
  }
  func.func @transform_4(%arg0: i32) -> (i32, i32) {
    %c0_i32 = arith.constant 0 : i32
    %c0_i32_0 = arith.constant 0 : i32
    return %arg0, %c0_i32 : i32, i32
  }
}

</mosaic_0001>

<bundles_post_ra>
// kernel: rnn_forward.5
= control target key start
LH: loop header
LB: loop body
LE: loop exit
PB: predicated region body
PF: predicated region fallthrough
CT: control target
= control target key end

     0   :  { %11 = vsyncpa [#allocation3], 0  ;;  %s1562_s0 = inlined_call_operand.hbm [shape: bf16[8,8,256], index: 0, kind: input, shape index: {}]   ;;  %s1563_s1 = inlined_call_operand.hbm [shape: bf16[64,256], index: 1, kind: input, shape index: {}]   ;;  %s1564_s2 = inlined_call_operand.hbm [shape: bf16[8,8,32], index: 2, kind: output, shape index: {0}]   ;;  %s1565_s3 = inlined_call_operand.hbm [shape: bf16[8,8,32], index: 3, kind: output, shape index: {1}]   ;;  %s1566_s4 = inlined_call_operand.hbm [shape: bf16[8,8,32], index: 4, kind: output, shape index: {2}]   ;;  %s1567_s5 = inlined_call_operand.hbm [shape: bf16[8,8,32], index: 5, kind: output, shape index: {3}]  }
   0x1   :  { %12 = vsyncpa [#allocation6], 0 }
   0x2   :  { %13 = vsyncpa [#allocation4], 0 }
   0x3   :  { %14 = vsyncpa [#allocation9], 0 }
   0x4   :  { %15 = vsyncpa [#allocation12], 0  ;;  %s1226_s18 = smov [#allocation2]   ;;  %s1084_s22 = scalar_lea.hbm %s1562_s0, 1024 }
   0x5   :  { %s21_s19 = sshll.u32 %s1226_s18, 4  ;;  %p1085_p0 = scmp.ne.s32.totalorder %s1562_s0, %s1084_s22  ;;  %s22_s19 = int_to_ptr.vmem [resolvable:$true] %s21_s19 }
   0x6   :  { %p1088_p1 = scmp.lt.u32.totalorder %s1084_s22, %s1562_s0 }
   0x8   :  { %p1090_p2 = pnand %p1088_p1, %p1085_p0 }
   0xa   :  { %1093 = shalt.err (!%p1090_p2)
}
   0xb   :  { %s1094_s27 = scalar_lea.vmem %s22_s19, 1024  ;;  %p1099_p4 = scmp.lt.s32.totalorder %s22_s19, %s22_s19 }
   0xc   :  { %p1095_p3 = scmp.ne.s32.totalorder %s22_s19, %s1094_s27  ;;  %p1100_p5 = scmp.lt.s32.totalorder %s1094_s27, %s1094_s27 }
   0xe   :  { %p1101_p6 = por %p1100_p5, %p1099_p4 }
  0x10   :  { %p1102_p7 = pnand %p1101_p6, %p1095_p3 }
  0x12   :  { %1105 = shalt.err (!%p1102_p7)
}
  0x13   :  { %s1227_s28 = smov 128   ;;  %s1228_s29 = smov 8  }
  0x14   :  { %27 = dma.hbm_to_vmem [thread:$0]  %s1562_s0, 1024, %s22_s19, [#allocation3], %s1227_s28, %s1227_s28, %s1228_s29  }
  0x15   :  { %s1229_s7 = smov [#allocation5]   ;;  %s1106_s11 = scalar_lea.hbm %s1563_s1, 1024 }
  0x16   :  { %s33_s8 = sshll.u32 %s1229_s7, 4  ;;  %p1107_p8 = scmp.ne.s32.totalorder %s1563_s1, %s1106_s11  ;;  %s34_s8 = int_to_ptr.vmem [resolvable:$true] %s33_s8 }
  0x17   :  { %p1110_p9 = scmp.lt.u32.totalorder %s1106_s11, %s1563_s1 }
  0x19   :  { %p1112_p10 = pnand %p1110_p9, %p1107_p8 }
  0x1b   :  { %1115 = shalt.err (!%p1112_p10)
}
  0x1c   :  { %s1116_s16 = scalar_lea.vmem %s34_s8, 1024  ;;  %p1121_p12 = scmp.lt.s32.totalorder %s34_s8, %s34_s8 }
  0x1d   :  { %p1117_p11 = scmp.ne.s32.totalorder %s34_s8, %s1116_s16  ;;  %p1122_p13 = scmp.lt.s32.totalorder %s1116_s16, %s1116_s16 }
  0x1f   :  { %p1123_p0 = por %p1122_p13, %p1121_p12 }
  0x21   :  { %p1124_p1 = pnand %p1123_p0, %p1117_p11 }
  0x23   :  { %1127 = shalt.err (!%p1124_p1)
}
  0x24   :  { %39 = dma.hbm_to_vmem [thread:$0]  %s1563_s1, 1024, %s34_s8, [#allocation6], %s1227_s28, %s1227_s28, %s1228_s29  }
  0x25   :  { %1216 = dma.done.wait [#allocation3], 1024  }
  0x26   :  { %1217 = vsyncadd [#allocation3], 4294966272 }
  0x27   :  { %1218 = dma.done.wait [#allocation6], 1024  }
  0x28   :  { %1219 = vsyncadd [#allocation6], 4294966272  ;;  %v1230_v0 = vmov 0   ;;  %v1294_v1 = vld [vmem:[#allocation5 + $0x4] ss:$8 sps:$4 sm:$0xff]   ;;  %s1231_s1 = smov 64  }
  0x29   :  { %134 = vmatprep.mubr.bf16.mxu0 %v1230_v0  ;;  %228 = vmatprep.mubr.bf16.mxu1 %v1230_v0  ;;  %v1296_v2 = vld [vmem:[#allocation5] ss:$8 sps:$4 sm:$0xff]   ;;  %v1299_v3 = vld [vmem:[#allocation5 + $0x14] ss:$8 sps:$4 sm:$0xff]   ;;  %v1303_v4 = vld [vmem:[#allocation5 + $0x10] ss:$8 sps:$4 sm:$0xff]  }
  0x2a   :  { %102 = vmatprep.subr.bf16.mxu0 %v1294_v1  ;;  %196 = vmatprep.subr.bf16.mxu1 %v1294_v1  ;;  %v1307_v5 = vld [vmem:[#allocation5 + $0x24] ss:$8 sps:$4 sm:$0xff]   ;;  %v1311_v6 = vld [vmem:[#allocation5 + $0x20] ss:$8 sps:$4 sm:$0xff]   ;;  %v1315_v7 = vld [vmem:[#allocation5 + $0x34] ss:$8 sps:$4 sm:$0xff]  }
  0x2b   :  { %103 = vmatpush1.bf16.msra.mxu0 %v1296_v2  ;;  %197 = vmatpush1.bf16.msra.mxu1 %v1296_v2  ;;  %v1319_v8 = vld [vmem:[#allocation5 + $0x30] ss:$8 sps:$4 sm:$0xff]   ;;  %v55_v9 = vld [vmem:[#allocation2] sm:$0xff]  ;;  %vm176_vm0 = vcmask 257024   ;;  %vm98_vm1 = vcmask 523264   ;;  %v190_v36 = vld [vmem:[#allocation2 + $0x8] sm:$0xff] }
  0x2c   :  { %104 = vmatprep.subr.bf16.mxu0 %v1299_v3  ;;  %198 = vmatprep.subr.bf16.mxu1 %v1299_v3  ;;  %v57_v10 = vunpack.c.h.bf16 %v55_v9  ;;  %v56_v17 = vunpack.c.l.bf16 %v55_v9  ;;  %v192_v37 = vunpack.c.h.bf16 %v190_v36  ;;  %v191_v44 = vunpack.c.l.bf16 %v190_v36  ;;  %v285_v63 = vld [vmem:[#allocation2 + $0x10] sm:$0xff]  ;;  %v380_v36 = vld [vmem:[#allocation2 + $0x18] sm:$0xff]  ;;  %s1232_s18 = smov 96   ;;  %s1233_s19 = smov [#allocation7]  }
  0x2d   :  { %v287_v9 = vunpack.c.h.bf16 %v285_v63  ;;  %s857_s20 = sshll.u32 %s1233_s19, 4  ;;  %s858_s20 = int_to_ptr.vmem [resolvable:$true] %s857_s20 }
  0x2e   :  { %s1128_s21 = scalar_lea.vmem %s858_s20, 512  ;;  %p1133_p3 = scmp.lt.s32.totalorder %s858_s20, %s858_s20 }
  0x2f   :  { %105 = vmatpush1.bf16.msra.mxu0 %v1303_v4  ;;  %199 = vmatpush1.bf16.msra.mxu1 %v1303_v4  ;;  %p1129_p2 = scmp.ne.s32.totalorder %s858_s20, %s1128_s21  ;;  %p1134_p4 = scmp.lt.s32.totalorder %s1128_s21, %s1128_s21 }
  0x30   :  { %106 = vmatprep.subr.bf16.mxu0 %v1307_v5  ;;  %200 = vmatprep.subr.bf16.mxu1 %v1307_v5 }
  0x31   :  { %p1135_p5 = por %p1134_p4, %p1133_p3 }
  0x33   :  { %107 = vmatpush1.bf16.msra.mxu0 %v1311_v6  ;;  %201 = vmatpush1.bf16.msra.mxu1 %v1311_v6  ;;  %p1136_p6 = pnand %p1135_p5, %p1129_p2 }
  0x34   :  { %108 = vmatprep.subr.bf16.mxu0 %v1315_v7  ;;  %202 = vmatprep.subr.bf16.mxu1 %v1315_v7 }
  0x37   :  { %109 = vmatpush1.bf16.msra.mxu0 %v1319_v8  ;;  %203 = vmatpush1.bf16.msra.mxu1 %v1319_v8 }
  0x38   :  { %291 = vmatprep.subr.bf16.mxu0 %v1294_v1  ;;  %386 = vmatprep.subr.bf16.mxu1 %v1294_v1 }
  0x3a   :  { %135 = vmatmul.mubr.bf16.vlgmr.msra.gmra.mrb[0].mxu0 %v1230_v0 }
  0x3b   :  { %292 = vmatpush1.bf16.msra.mxu0 %v1296_v2  ;;  %323 = vmatprep.mubr.bf16.mxu0 %v1230_v0 }
  0x3c   :  { %293 = vmatprep.subr.bf16.mxu0 %v1299_v3 }
  0x3f   :  { %294 = vmatpush1.bf16.msra.mxu0 %v1303_v4 }
  0x40   :  { %295 = vmatprep.subr.bf16.mxu0 %v1307_v5 }
  0x43   :  { %296 = vmatpush1.bf16.msra.mxu0 %v1311_v6 }
  0x44   :  { %297 = vmatprep.subr.bf16.mxu0 %v1315_v7 }
  0x47   :  { %298 = vmatpush1.bf16.msra.mxu0 %v1319_v8 }
  0x48   :  { %481 = vmatprep.subr.bf16.mxu0 %v1294_v1 }
 0x10d   :  { %v136_v11 = vpop.f32.mrb[0].mxu0 }
 0x10e   :  { %v138_v12 = vpop.f32.mrb[1].mxu0  ;;  %v143_v18 = vadd.f32 %v136_v11, %v56_v17 }
 0x10f   :  { %v144_v13 = vadd.f32 %v138_v12, %v57_v10  ;;  %v140_v14 = vpop.f32.mrb[2].mxu0 }
 0x110   :  { %v141_v15 = vpop.f32.mrb[3].mxu0  ;;  %v925_v19 = vmul.f32 -1.442695, %v143_v18 }
 0x111   :  { %988 = vtanh.f32 %v144_v13  ;;  %v926_v29 = vmul.f32 -1.442695, %v144_v13 }
 0x112   :  { %990 = vpow2.f32 %v925_v19 }
 0x11b   :  { %v989_v16 = vpop.eup %988 }
 0x11c   :  { %160 = vrot.lane.b32.xlu0 %v989_v16, %s1231_s1  ;;  %v991_v20 = vpop.eup %990  ;;  %v286_v16 = vunpack.c.l.bf16 %v285_v63  ;;  %v475_v63 = vld [vmem:[#allocation2 + $0x20] sm:$0xff] }
 0x11d   :  { %v151_v21 = vadd.f32 1.0, %v991_v20 }
 0x11f   :  { %992 = vrcp.f32 %v151_v21 }
 0x129   :  { %v993_v22 = vpop.eup %992 }
 0x12a   :  { %v158_v25 = vmul.f32 0.0, %v993_v22 }
 0x18e   :  { %v161_v23 = vpop.permute.xlu0 %160 }
 0x18f   :  { %v163_v24 = vmul.f32 %v993_v22, %v161_v23 }
 0x191   :  { %165 = vrot.lane.b32.xlu0 %v163_v24, %s1231_s1 }
 0x203   :  { %v166_v26 = vpop.permute.xlu0 %165 }
 0x204   :  { %v168_v27 = vadd.f32 %v166_v26, %v158_v25 }
 0x206   :  { %994 = vtanh.f32 %v168_v27 }
 0x207   :  { %996 = vpow2.f32 %v926_v29 }
 0x210   :  { %v995_v28 = vpop.eup %994 }
 0x211   :  { %171 = vrot.lane.b32.xlu1 %v995_v28, %s1231_s1  ;;  %v997_v30 = vpop.eup %996 }
 0x212   :  { %v152_v31 = vadd.f32 1.0, %v997_v30 }
 0x214   :  { %998 = vrcp.f32 %v152_v31 }
 0x21e   :  { %v999_v32 = vpop.eup %998 }
 0x283   :  { %v172_v33 = vpop.permute.xlu1 %171 }
 0x284   :  { %v174_v34 = vmul.f32 %v999_v32, %v172_v33 }
 0x286   :  { %v1341_v35 = vpack.c.bf16 %v174_v34, %v174_v34 }
 0x288   :  { %177 = vst.msk [vmem:[#allocation7] sm:$0xf] %vm176_vm0, %v1341_v35  ;;  %179 = vst.msk [vmem:[#allocation10 + $0x1c] sm:$0xf] %vm176_vm0, %v1341_v35  ;;  %928 = vmatmul.mubr.msk.bf16.vlgmr.msra.gmra.mrb[0].mxu1 %vm98_vm1, %v1341_v35 }
 0x289   :  { %387 = vmatpush1.bf16.msra.mxu1 %v1296_v2  ;;  %418 = vmatprep.mubr.bf16.mxu1 %v1230_v0 }
 0x28a   :  { %388 = vmatprep.subr.bf16.mxu1 %v1299_v3 }
 0x28d   :  { %389 = vmatpush1.bf16.msra.mxu1 %v1303_v4 }
 0x28e   :  { %390 = vmatprep.subr.bf16.mxu1 %v1307_v5 }
 0x291   :  { %391 = vmatpush1.bf16.msra.mxu1 %v1311_v6 }
 0x292   :  { %392 = vmatprep.subr.bf16.mxu1 %v1315_v7 }
 0x295   :  { %393 = vmatpush1.bf16.msra.mxu1 %v1319_v8 }
 0x296   :  { %576 = vmatprep.subr.bf16.mxu1 %v1294_v1 }
 0x35b   :  { %v230_v38 = vpop.f32.mrb[0].mxu1 }
 0x35c   :  { %v232_v39 = vpop.f32.mrb[1].mxu1  ;;  %v237_v45 = vadd.f32 %v230_v38, %v191_v44  ;;  %v381_v44 = vunpack.c.l.bf16 %v380_v36 }
 0x35d   :  { %v238_v40 = vadd.f32 %v232_v39, %v192_v37  ;;  %v234_v41 = vpop.f32.mrb[2].mxu1  ;;  %v382_v37 = vunpack.c.h.bf16 %v380_v36 }
 0x35e   :  { %v235_v42 = vpop.f32.mrb[3].mxu1  ;;  %v929_v46 = vmul.f32 -1.442695, %v237_v45 }
 0x35f   :  { %1000 = vtanh.f32 %v238_v40  ;;  %v930_v56 = vmul.f32 -1.442695, %v238_v40 }
 0x360   :  { %1002 = vpow2.f32 %v929_v46 }
 0x369   :  { %v1001_v43 = vpop.eup %1000 }
 0x36a   :  { %254 = vrot.lane.b32.xlu1 %v1001_v43, %s1231_s1  ;;  %v1003_v47 = vpop.eup %1002 }
 0x36b   :  { %v245_v48 = vadd.f32 1.0, %v1003_v47 }
 0x36d   :  { %1004 = vrcp.f32 %v245_v48 }
 0x377   :  { %v1005_v49 = vpop.eup %1004 }
 0x378   :  { %v252_v52 = vmul.f32 %v1005_v49, %v168_v27 }
 0x3dc   :  { %v255_v50 = vpop.permute.xlu1 %254 }
 0x3dd   :  { %v257_v51 = vmul.f32 %v1005_v49, %v255_v50 }
 0x3df   :  { %259 = vrot.lane.b32.xlu0 %v257_v51, %s1231_s1 }
 0x451   :  { %v260_v53 = vpop.permute.xlu0 %259 }
 0x452   :  { %v262_v54 = vadd.f32 %v260_v53, %v252_v52 }
 0x454   :  { %1006 = vtanh.f32 %v262_v54 }
 0x455   :  { %1008 = vpow2.f32 %v930_v56 }
 0x45e   :  { %v1007_v55 = vpop.eup %1006 }
 0x45f   :  { %265 = vrot.lane.b32.xlu1 %v1007_v55, %s1231_s1  ;;  %v1009_v57 = vpop.eup %1008 }
 0x460   :  { %v246_v58 = vadd.f32 1.0, %v1009_v57 }
 0x462   :  { %1010 = vrcp.f32 %v246_v58 }
 0x46c   :  { %v1011_v59 = vpop.eup %1010 }
 0x4d1   :  { %v266_v60 = vpop.permute.xlu1 %265 }
 0x4d2   :  { %v268_v61 = vmul.f32 %v1011_v59, %v266_v60 }
 0x4d4   :  { %v1361_v62 = vpack.c.bf16 %v268_v61, %v268_v61 }
 0x4d6   :  { %271 = vst.msk [vmem:[#allocation7 + $0x4] sm:$0xf] %vm176_vm0, %v1361_v62  ;;  %273 = vst.msk [vmem:[#allocation10 + $0x18] sm:$0xf] %vm176_vm0, %v1361_v62  ;;  %932 = vmatmul.mubr.msk.bf16.vlgmr.msra.gmra.mrb[4].mxu0 %vm98_vm1, %v1361_v62 }
 0x4d7   :  { %482 = vmatpush1.bf16.msra.mxu0 %v1296_v2  ;;  %513 = vmatprep.mubr.bf16.mxu0 %v1230_v0 }
 0x4d8   :  { %483 = vmatprep.subr.bf16.mxu0 %v1299_v3 }
 0x4db   :  { %484 = vmatpush1.bf16.msra.mxu0 %v1303_v4 }
 0x4dc   :  { %485 = vmatprep.subr.bf16.mxu0 %v1307_v5 }
 0x4df   :  { %486 = vmatpush1.bf16.msra.mxu0 %v1311_v6 }
 0x4e0   :  { %487 = vmatprep.subr.bf16.mxu0 %v1315_v7 }
 0x4e3   :  { %488 = vmatpush1.bf16.msra.mxu0 %v1319_v8 }
 0x4e4   :  { %671 = vmatprep.subr.bf16.mxu0 %v1294_v1 }
 0x5a9   :  { %v325_v10 = vpop.f32.mrb[4].mxu0 }
 0x5aa   :  { %v327_v11 = vpop.f32.mrb[5].mxu0  ;;  %v332_v17 = vadd.f32 %v325_v10, %v286_v16  ;;  %v476_v16 = vunpack.c.l.bf16 %v475_v63 }
 0x5ab   :  { %v333_v12 = vadd.f32 %v327_v11, %v287_v9  ;;  %v329_v13 = vpop.f32.mrb[6].mxu0  ;;  %v477_v9 = vunpack.c.h.bf16 %v475_v63 }
 0x5ac   :  { %v330_v14 = vpop.f32.mrb[7].mxu0  ;;  %v933_v18 = vmul.f32 -1.442695, %v332_v17 }
 0x5ad   :  { %1012 = vtanh.f32 %v333_v12  ;;  %v934_v28 = vmul.f32 -1.442695, %v333_v12 }
 0x5ae   :  { %1014 = vpow2.f32 %v933_v18 }
 0x5b7   :  { %v1013_v15 = vpop.eup %1012 }
 0x5b8   :  { %349 = vrot.lane.b32.xlu0 %v1013_v15, %s1231_s1  ;;  %v1015_v19 = vpop.eup %1014 }
 0x5b9   :  { %v340_v20 = vadd.f32 1.0, %v1015_v19 }
 0x5bb   :  { %1016 = vrcp.f32 %v340_v20 }
 0x5c5   :  { %v1017_v21 = vpop.eup %1016 }
 0x5c6   :  { %v347_v24 = vmul.f32 %v1017_v21, %v262_v54 }
 0x62a   :  { %v350_v22 = vpop.permute.xlu0 %349 }
 0x62b   :  { %v352_v23 = vmul.f32 %v1017_v21, %v350_v22 }
 0x62d   :  { %354 = vrot.lane.b32.xlu1 %v352_v23, %s1231_s1 }
 0x69f   :  { %v355_v25 = vpop.permute.xlu1 %354 }
 0x6a0   :  { %v357_v26 = vadd.f32 %v355_v25, %v347_v24 }
 0x6a2   :  { %1018 = vtanh.f32 %v357_v26 }
 0x6a3   :  { %1020 = vpow2.f32 %v934_v28 }
 0x6ac   :  { %v1019_v27 = vpop.eup %1018 }
 0x6ad   :  { %360 = vrot.lane.b32.xlu0 %v1019_v27, %s1231_s1  ;;  %v1021_v29 = vpop.eup %1020 }
 0x6ae   :  { %v341_v30 = vadd.f32 1.0, %v1021_v29 }
 0x6b0   :  { %1022 = vrcp.f32 %v341_v30 }
 0x6ba   :  { %v1023_v31 = vpop.eup %1022 }
 0x71f   :  { %v361_v32 = vpop.permute.xlu0 %360 }
 0x720   :  { %v363_v33 = vmul.f32 %v1023_v31, %v361_v32 }
 0x722   :  { %v1381_v34 = vpack.c.bf16 %v363_v33, %v363_v33 }
 0x724   :  { %366 = vst.msk [vmem:[#allocation7 + $0x8] sm:$0xf] %vm176_vm0, %v1381_v34  ;;  %368 = vst.msk [vmem:[#allocation10 + $0x14] sm:$0xf] %vm176_vm0, %v1381_v34  ;;  %936 = vmatmul.mubr.msk.bf16.vlgmr.msra.gmra.mrb[4].mxu1 %vm98_vm1, %v1381_v34 }
 0x725   :  { %577 = vmatpush1.bf16.msra.mxu1 %v1296_v2  ;;  %608 = vmatprep.mubr.bf16.mxu1 %v1230_v0 }
 0x726   :  { %578 = vmatprep.subr.bf16.mxu1 %v1299_v3 }
 0x729   :  { %579 = vmatpush1.bf16.msra.mxu1 %v1303_v4 }
 0x72a   :  { %580 = vmatprep.subr.bf16.mxu1 %v1307_v5 }
 0x72d   :  { %581 = vmatpush1.bf16.msra.mxu1 %v1311_v6 }
 0x72e   :  { %582 = vmatprep.subr.bf16.mxu1 %v1315_v7 }
 0x731   :  { %583 = vmatpush1.bf16.msra.mxu1 %v1319_v8 }
 0x732   :  { %766 = vmatprep.subr.bf16.mxu1 %v1294_v1 }
 0x7f7   :  { %v420_v38 = vpop.f32.mrb[4].mxu1 }
 0x7f8   :  { %v422_v39 = vpop.f32.mrb[5].mxu1  ;;  %v427_v45 = vadd.f32 %v420_v38, %v381_v44 }
 0x7f9   :  { %v428_v40 = vadd.f32 %v422_v39, %v382_v37  ;;  %v424_v41 = vpop.f32.mrb[6].mxu1  ;;  %v570_v37 = vld [vmem:[#allocation2 + $0x28] sm:$0xff] }
 0x7fa   :  { %v425_v42 = vpop.f32.mrb[7].mxu1  ;;  %v937_v46 = vmul.f32 -1.442695, %v427_v45  ;;  %v572_v38 = vunpack.c.h.bf16 %v570_v37 }
 0x7fb   :  { %1024 = vtanh.f32 %v428_v40  ;;  %v938_v55 = vmul.f32 -1.442695, %v428_v40 }
 0x7fc   :  { %1026 = vpow2.f32 %v937_v46 }
 0x805   :  { %v1025_v43 = vpop.eup %1024 }
 0x806   :  { %444 = vrot.lane.b32.xlu1 %v1025_v43, %s1231_s1  ;;  %v1027_v47 = vpop.eup %1026 }
 0x807   :  { %v435_v48 = vadd.f32 1.0, %v1027_v47 }
 0x809   :  { %1028 = vrcp.f32 %v435_v48 }
 0x813   :  { %v1029_v49 = vpop.eup %1028 }
 0x814   :  { %v442_v51 = vmul.f32 %v1029_v49, %v357_v26 }
 0x878   :  { %v445_v1 = vpop.permute.xlu1 %444 }
 0x879   :  { %v447_v50 = vmul.f32 %v1029_v49, %v445_v1 }
 0x87b   :  { %449 = vrot.lane.b32.xlu0 %v447_v50, %s1231_s1 }
 0x8ed   :  { %v450_v52 = vpop.permute.xlu0 %449 }
 0x8ee   :  { %v452_v53 = vadd.f32 %v450_v52, %v442_v51 }
 0x8f0   :  { %1030 = vtanh.f32 %v452_v53 }
 0x8f1   :  { %1032 = vpow2.f32 %v938_v55  ;;  %v665_v55 = vld [vmem:[#allocation2 + $0x30] sm:$0xff] }
 0x8fa   :  { %v1031_v54 = vpop.eup %1030 }
 0x8fb   :  { %455 = vrot.lane.b32.xlu1 %v1031_v54, %s1231_s1  ;;  %v1033_v56 = vpop.eup %1032 }
 0x8fc   :  { %v436_v57 = vadd.f32 1.0, %v1033_v56  ;;  %v667_v56 = vunpack.c.h.bf16 %v665_v55 }
 0x8fe   :  { %1034 = vrcp.f32 %v436_v57 }
 0x908   :  { %v1035_v58 = vpop.eup %1034 }
 0x96d   :  { %v456_v59 = vpop.permute.xlu1 %455 }
 0x96e   :  { %v458_v60 = vmul.f32 %v1035_v58, %v456_v59 }
 0x970   :  { %v1401_v61 = vpack.c.bf16 %v458_v60, %v458_v60 }
 0x972   :  { %461 = vst.msk [vmem:[#allocation7 + $0xc] sm:$0xf] %vm176_vm0, %v1401_v61  ;;  %463 = vst.msk [vmem:[#allocation10 + $0x10] sm:$0xf] %vm176_vm0, %v1401_v61  ;;  %940 = vmatmul.mubr.msk.bf16.vlgmr.msra.gmra.mrb[8].mxu0 %vm98_vm1, %v1401_v61 }
 0x973   :  { %672 = vmatpush1.bf16.msra.mxu0 %v1296_v2  ;;  %703 = vmatprep.mubr.bf16.mxu0 %v1230_v0 }
 0x974   :  { %673 = vmatprep.subr.bf16.mxu0 %v1299_v3 }
 0x977   :  { %674 = vmatpush1.bf16.msra.mxu0 %v1303_v4 }
 0x978   :  { %675 = vmatprep.subr.bf16.mxu0 %v1307_v5 }
 0x97b   :  { %676 = vmatpush1.bf16.msra.mxu0 %v1311_v6 }
 0x97c   :  { %677 = vmatprep.subr.bf16.mxu0 %v1315_v7 }
 0x97f   :  { %678 = vmatpush1.bf16.msra.mxu0 %v1319_v8 }
 0xa45   :  { %v515_v10 = vpop.f32.mrb[8].mxu0 }
 0xa46   :  { %v517_v11 = vpop.f32.mrb[9].mxu0  ;;  %v522_v17 = vadd.f32 %v515_v10, %v476_v16  ;;  %v666_v10 = vunpack.c.l.bf16 %v665_v55 }
 0xa47   :  { %v523_v12 = vadd.f32 %v517_v11, %v477_v9  ;;  %v519_v13 = vpop.f32.mrb[10].mxu0 }
 0xa48   :  { %v520_v14 = vpop.f32.mrb[11].mxu0  ;;  %v941_v18 = vmul.f32 -1.442695, %v522_v17 }
 0xa49   :  { %1036 = vtanh.f32 %v523_v12  ;;  %v942_v28 = vmul.f32 -1.442695, %v523_v12 }
 0xa4a   :  { %1038 = vpow2.f32 %v941_v18 }
 0xa53   :  { %v1037_v15 = vpop.eup %1036 }
 0xa54   :  { %539 = vrot.lane.b32.xlu0 %v1037_v15, %s1231_s1  ;;  %v1039_v19 = vpop.eup %1038 }
 0xa55   :  { %v530_v20 = vadd.f32 1.0, %v1039_v19 }
 0xa57   :  { %1040 = vrcp.f32 %v530_v20 }
 0xa61   :  { %v1041_v21 = vpop.eup %1040 }
 0xa62   :  { %v537_v24 = vmul.f32 %v1041_v21, %v452_v53 }
 0xac6   :  { %v540_v22 = vpop.permute.xlu0 %539 }
 0xac7   :  { %v542_v23 = vmul.f32 %v1041_v21, %v540_v22 }
 0xac9   :  { %544 = vrot.lane.b32.xlu1 %v542_v23, %s1231_s1 }
 0xb3b   :  { %v545_v25 = vpop.permute.xlu1 %544 }
 0xb3c   :  { %v547_v26 = vadd.f32 %v545_v25, %v537_v24 }
 0xb3e   :  { %1042 = vtanh.f32 %v547_v26 }
 0xb3f   :  { %1044 = vpow2.f32 %v942_v28 }
 0xb48   :  { %v1043_v27 = vpop.eup %1042 }
 0xb49   :  { %550 = vrot.lane.b32.xlu0 %v1043_v27, %s1231_s1  ;;  %v1045_v29 = vpop.eup %1044 }
 0xb4a   :  { %v531_v30 = vadd.f32 1.0, %v1045_v29  ;;  %v760_v29 = vld [vmem:[#allocation2 + $0x38] sm:$0xff] }
 0xb4c   :  { %1046 = vrcp.f32 %v531_v30  ;;  %v762_v30 = vunpack.c.h.bf16 %v760_v29 }
 0xb56   :  { %v1047_v31 = vpop.eup %1046 }
 0xbbb   :  { %v551_v32 = vpop.permute.xlu0 %550 }
 0xbbc   :  { %v553_v33 = vmul.f32 %v1047_v31, %v551_v32 }
 0xbbe   :  { %v1420_v36 = vpack.c.bf16 %v553_v33, %v553_v33 }
 0xbc0   :  { %556 = vst.msk [vmem:[#allocation7 + $0x10] sm:$0xf] %vm176_vm0, %v1420_v36  ;;  %558 = vst.msk [vmem:[#allocation10 + $0xc] sm:$0xf] %vm176_vm0, %v1420_v36  ;;  %944 = vmatmul.mubr.msk.bf16.vlgmr.msra.gmra.mrb[8].mxu1 %vm98_vm1, %v1420_v36 }
 0xbc1   :  { %767 = vmatpush1.bf16.msra.mxu1 %v1296_v2  ;;  %798 = vmatprep.mubr.bf16.mxu1 %v1230_v0 }
 0xbc2   :  { %768 = vmatprep.subr.bf16.mxu1 %v1299_v3  ;;  %v571_v3 = vunpack.c.l.bf16 %v570_v37 }
 0xbc5   :  { %769 = vmatpush1.bf16.msra.mxu1 %v1303_v4 }
 0xbc6   :  { %770 = vmatprep.subr.bf16.mxu1 %v1307_v5 }
 0xbc9   :  { %771 = vmatpush1.bf16.msra.mxu1 %v1311_v6 }
 0xbca   :  { %772 = vmatprep.subr.bf16.mxu1 %v1315_v7 }
 0xbcd   :  { %773 = vmatpush1.bf16.msra.mxu1 %v1319_v8 }
 0xc93   :  { %v610_v39 = vpop.f32.mrb[8].mxu1 }
 0xc94   :  { %v612_v40 = vpop.f32.mrb[9].mxu1  ;;  %v617_v4 = vadd.f32 %v610_v39, %v571_v3 }
 0xc95   :  { %v618_v41 = vadd.f32 %v612_v40, %v572_v38  ;;  %v614_v2 = vpop.f32.mrb[10].mxu1  ;;  %v761_v40 = vunpack.c.l.bf16 %v760_v29 }
 0xc96   :  { %v615_v42 = vpop.f32.mrb[11].mxu1  ;;  %v945_v5 = vmul.f32 -1.442695, %v617_v4 }
 0xc97   :  { %1048 = vtanh.f32 %v618_v41  ;;  %v946_v49 = vmul.f32 -1.442695, %v618_v41 }
 0xc98   :  { %1050 = vpow2.f32 %v945_v5 }
 0xca1   :  { %v1049_v0 = vpop.eup %1048 }
 0xca2   :  { %634 = vrot.lane.b32.xlu1 %v1049_v0, %s1231_s1  ;;  %v1051_v6 = vpop.eup %1050 }
 0xca3   :  { %v625_v43 = vadd.f32 1.0, %v1051_v6 }
 0xca5   :  { %1052 = vrcp.f32 %v625_v43 }
 0xcaf   :  { %v1053_v7 = vpop.eup %1052 }
 0xcb0   :  { %v632_v45 = vmul.f32 %v1053_v7, %v547_v26 }
 0xd14   :  { %v635_v8 = vpop.permute.xlu1 %634 }
 0xd15   :  { %v637_v44 = vmul.f32 %v1053_v7, %v635_v8 }
 0xd17   :  { %639 = vrot.lane.b32.xlu0 %v637_v44, %s1231_s1 }
 0xd89   :  { %v640_v46 = vpop.permute.xlu0 %639 }
 0xd8a   :  { %v642_v47 = vadd.f32 %v640_v46, %v632_v45 }
 0xd8c   :  { %1054 = vtanh.f32 %v642_v47 }
 0xd8d   :  { %1056 = vpow2.f32 %v946_v49 }
 0xd96   :  { %v1055_v48 = vpop.eup %1054 }
 0xd97   :  { %645 = vrot.lane.b32.xlu1 %v1055_v48, %s1231_s1  ;;  %v1057_v1 = vpop.eup %1056 }
 0xd98   :  { %v626_v50 = vadd.f32 1.0, %v1057_v1 }
 0xd9a   :  { %1058 = vrcp.f32 %v626_v50 }
 0xda4   :  { %v1059_v51 = vpop.eup %1058 }
 0xe09   :  { %v646_v52 = vpop.permute.xlu1 %645 }
 0xe0a   :  { %v648_v53 = vmul.f32 %v1059_v51, %v646_v52 }
 0xe0c   :  { %v1439_v54 = vpack.c.bf16 %v648_v53, %v648_v53 }
 0xe0e   :  { %651 = vst.msk [vmem:[#allocation7 + $0x14] sm:$0xf] %vm176_vm0, %v1439_v54  ;;  %653 = vst.msk [vmem:[#allocation10 + $0x8] sm:$0xf] %vm176_vm0, %v1439_v54  ;;  %948 = vmatmul.mubr.msk.bf16.vlgmr.msra.gmra.mrb[12].mxu0 %vm98_vm1, %v1439_v54 }
 0xee1   :  { %v705_v57 = vpop.f32.mrb[12].mxu0 }
 0xee2   :  { %v707_v58 = vpop.f32.mrb[13].mxu0  ;;  %v712_v11 = vadd.f32 %v705_v57, %v666_v10 }
 0xee3   :  { %v713_v59 = vadd.f32 %v707_v58, %v667_v56  ;;  %v709_v60 = vpop.f32.mrb[14].mxu0 }
 0xee4   :  { %v710_v63 = vpop.f32.mrb[15].mxu0  ;;  %v949_v12 = vmul.f32 -1.442695, %v712_v11 }
 0xee5   :  { %1060 = vtanh.f32 %v713_v59  ;;  %v950_v22 = vmul.f32 -1.442695, %v713_v59 }
 0xee6   :  { %1062 = vpow2.f32 %v949_v12 }
 0xeef   :  { %v1061_v9 = vpop.eup %1060 }
 0xef0   :  { %729 = vrot.lane.b32.xlu0 %v1061_v9, %s1231_s1  ;;  %v1063_v13 = vpop.eup %1062 }
 0xef1   :  { %v720_v14 = vadd.f32 1.0, %v1063_v13 }
 0xef3   :  { %1064 = vrcp.f32 %v720_v14 }
 0xefd   :  { %v1065_v15 = vpop.eup %1064 }
 0xefe   :  { %v727_v18 = vmul.f32 %v1065_v15, %v642_v47 }
 0xf62   :  { %v730_v16 = vpop.permute.xlu0 %729 }
 0xf63   :  { %v732_v17 = vmul.f32 %v1065_v15, %v730_v16 }
 0xf65   :  { %734 = vrot.lane.b32.xlu1 %v732_v17, %s1231_s1 }
 0xfd7   :  { %v735_v19 = vpop.permute.xlu1 %734 }
 0xfd8   :  { %v737_v20 = vadd.f32 %v735_v19, %v727_v18 }
 0xfda   :  { %1066 = vtanh.f32 %v737_v20 }
 0xfdb   :  { %1068 = vpow2.f32 %v950_v22 }
 0xfe4   :  { %v1067_v21 = vpop.eup %1066 }
 0xfe5   :  { %740 = vrot.lane.b32.xlu0 %v1067_v21, %s1231_s1  ;;  %v1069_v23 = vpop.eup %1068 }
 0xfe6   :  { %v721_v24 = vadd.f32 1.0, %v1069_v23 }
 0xfe8   :  { %1070 = vrcp.f32 %v721_v24 }
 0xff2   :  { %v1071_v25 = vpop.eup %1070 }
0x1057   :  { %v741_v26 = vpop.permute.xlu0 %740 }
0x1058   :  { %v743_v27 = vmul.f32 %v1071_v25, %v741_v26 }
0x105a   :  { %v744_v28 = vpack.c.bf16 %v743_v27, %v743_v27 }
0x105c   :  { %746 = vst.msk [vmem:[#allocation7 + $0x18] sm:$0xf] %vm176_vm0, %v744_v28  ;;  %748 = vst.msk [vmem:[#allocation10 + $0x4] sm:$0xf] %vm176_vm0, %v744_v28  ;;  %952 = vmatmul.mubr.msk.bf16.vlgmr.msra.gmra.mrb[12].mxu1 %vm98_vm1, %v744_v28 }
0x112f   :  { %v800_v31 = vpop.f32.mrb[12].mxu1 }
0x1130   :  { %v802_v32 = vpop.f32.mrb[13].mxu1  ;;  %v807_v41 = vadd.f32 %v800_v31, %v761_v40 }
0x1131   :  { %v808_v33 = vadd.f32 %v802_v32, %v762_v30  ;;  %v804_v37 = vpop.f32.mrb[14].mxu1 }
0x1132   :  { %v805_v38 = vpop.f32.mrb[15].mxu1  ;;  %v953_v2 = vmul.f32 -1.442695, %v807_v41 }
0x1133   :  { %1072 = vtanh.f32 %v808_v33  ;;  %v954_v45 = vmul.f32 -1.442695, %v808_v33 }
0x1134   :  { %1074 = vpow2.f32 %v953_v2 }
0x113d   :  { %v1073_v39 = vpop.eup %1072 }
0x113e   :  { %824 = vrot.lane.b32.xlu1 %v1073_v39, %s1231_s1  ;;  %v1075_v42 = vpop.eup %1074 }
0x113f   :  { %v815_v0 = vadd.f32 1.0, %v1075_v42 }
0x1141   :  { %1076 = vrcp.f32 %v815_v0 }
0x114b   :  { %v1077_v3 = vpop.eup %1076 }
0x114c   :  { %v822_v6 = vmul.f32 %v1077_v3, %v737_v20 }
0x11b0   :  { %v825_v4 = vpop.permute.xlu1 %824 }
0x11b1   :  { %v827_v5 = vmul.f32 %v1077_v3, %v825_v4 }
0x11b3   :  { %829 = vrot.lane.b32.xlu0 %v827_v5, %s1231_s1 }
0x11b7   :  { %183 = vrot.lane.b32.xlu0 %v1341_v35, %s1232_s18 }
0x11bb   :  { %372 = vrot.lane.b32.xlu0 %v1381_v34, %s1232_s18 }
0x11bf   :  { %562 = vrot.lane.b32.xlu0 %v1420_v36, %s1232_s18 }
0x11c3   :  { %752 = vrot.lane.b32.xlu0 %v744_v28, %s1232_s18 }
0x1225   :  { %v830_v43 = vpop.permute.xlu0 %829 }
0x1226   :  { %v832_v7 = vadd.f32 %v830_v43, %v822_v6 }
0x1228   :  { %1078 = vtanh.f32 %v832_v7 }
0x1229   :  { %v184_v8 = vpop.permute.xlu0 %183  ;;  %1080 = vpow2.f32 %v954_v45 }
0x122a   :  { %187 = vst.msk [vmem:[#allocation8 + $0x1c] sm:$0xf] %vm176_vm0, %v184_v8  ;;  %188 = vst.msk [vmem:[#allocation11] sm:$0xf] %vm176_vm0, %v184_v8 }
0x122d   :  { %v373_v44 = vpop.permute.xlu0 %372 }
0x122e   :  { %376 = vst.msk [vmem:[#allocation8 + $0x14] sm:$0xf] %vm176_vm0, %v373_v44  ;;  %378 = vst.msk [vmem:[#allocation11 + $0x8] sm:$0xf] %vm176_vm0, %v373_v44 }
0x1231   :  { %v563_v35 = vpop.permute.xlu0 %562 }
0x1232   :  { %v1079_v34 = vpop.eup %1078  ;;  %566 = vst.msk [vmem:[#allocation8 + $0xc] sm:$0xf] %vm176_vm0, %v563_v35  ;;  %568 = vst.msk [vmem:[#allocation11 + $0x10] sm:$0xf] %vm176_vm0, %v563_v35 }
0x1233   :  { %835 = vrot.lane.b32.xlu1 %v1079_v34, %s1231_s1  ;;  %v1081_v46 = vpop.eup %1080 }
0x1234   :  { %v816_v47 = vadd.f32 1.0, %v1081_v46 }
0x1235   :  { %v753_v36 = vpop.permute.xlu0 %752 }
0x1236   :  { %756 = vst.msk [vmem:[#allocation8 + $0x4] sm:$0xf] %vm176_vm0, %v753_v36  ;;  %758 = vst.msk [vmem:[#allocation11 + $0x18] sm:$0xf] %vm176_vm0, %v753_v36  ;;  %1082 = vrcp.f32 %v816_v47 }
0x1237   :  { %277 = vrot.lane.b32.xlu1 %v1361_v62, %s1232_s18 }
0x123b   :  { %467 = vrot.lane.b32.xlu1 %v1401_v61, %s1232_s18 }
0x123f   :  { %657 = vrot.lane.b32.xlu1 %v1439_v54, %s1232_s18 }
0x1240   :  { %v1083_v48 = vpop.eup %1082 }
0x12a5   :  { %v836_v49 = vpop.permute.xlu1 %835 }
0x12a6   :  { %v838_v1 = vmul.f32 %v1083_v48, %v836_v49 }
0x12a8   :  { %v839_v50 = vpack.c.bf16 %v838_v1, %v838_v1 }
0x12a9   :  { %v278_v51 = vpop.permute.xlu1 %277 }
0x12aa   :  { %841 = vst.msk [vmem:[#allocation7 + $0x1c] sm:$0xf] %vm176_vm0, %v839_v50  ;;  %842 = vst.msk [vmem:[#allocation10] sm:$0xf] %vm176_vm0, %v839_v50  ;;  %846 = vrot.lane.b32.xlu1 %v839_v50, %s1232_s18 }
0x12ab   :  { %281 = vst.msk [vmem:[#allocation8 + $0x18] sm:$0xf] %vm176_vm0, %v278_v51  ;;  %283 = vst.msk [vmem:[#allocation11 + $0x4] sm:$0xf] %vm176_vm0, %v278_v51 }
0x12ac   :  { %1139 = shalt.err (!%p1136_p6)
}
0x12ad   :  { %s1140_s24 = scalar_lea.hbm %s1564_s2, 512 }
0x12ae   :  { %p1141_p7 = scmp.ne.s32.totalorder %s1564_s2, %s1140_s24  ;;  %p1144_p8 = scmp.lt.u32.totalorder %s1140_s24, %s1564_s2 }
0x12b0   :  { %p1146_p9 = pnand %p1144_p8, %p1141_p7 }
0x12b2   :  { %1149 = shalt.err (!%p1146_p9)
}
0x12b3   :  { %s1234_s29 = smov 4   ;;  %v468_v62 = vpop.permute.xlu1 %467  ;;  %s1235_s7 = smov [#allocation8]  }
0x12b4   :  { %863 = dma.vmem_to_hbm [thread:$0]  %s858_s20, 512, %s1564_s2, [#allocation4], %s1231_s1, %s1231_s1, %s1234_s29   ;;  %471 = vst.msk [vmem:[#allocation8 + $0x10] sm:$0xf] %vm176_vm0, %v468_v62  ;;  %473 = vst.msk [vmem:[#allocation11 + $0xc] sm:$0xf] %vm176_vm0, %v468_v62 }
0x12b5   :  { %s869_s8 = sshll.u32 %s1235_s7, 4  ;;  %s1236_s9 = smov [#allocation10]   ;;  %s870_s8 = int_to_ptr.vmem [resolvable:$true] %s869_s8 }
0x12b6   :  { %s881_s10 = sshll.u32 %s1236_s9, 4  ;;  %s1237_s11 = smov [#allocation11]   ;;  %s1501_s10 = int_to_ptr.vmem [resolvable:$true] %s881_s10 }
0x12b7   :  { %v658_v61 = vpop.permute.xlu1 %657  ;;  %s893_s12 = sshll.u32 %s1237_s11, 4  ;;  %s1150_s2 = scalar_lea.vmem %s870_s8, 512  ;;  %s1505_s12 = int_to_ptr.vmem [resolvable:$true] %s893_s12 }
0x12b8   :  { %661 = vst.msk [vmem:[#allocation8 + $0x8] sm:$0xf] %vm176_vm0, %v658_v61  ;;  %663 = vst.msk [vmem:[#allocation11 + $0x14] sm:$0xf] %vm176_vm0, %v658_v61  ;;  %p1151_p10 = scmp.ne.s32.totalorder %s870_s8, %s1150_s2  ;;  %p1155_p11 = scmp.lt.s32.totalorder %s870_s8, %s870_s8 }
0x12b9   :  { %p1156_p12 = scmp.lt.s32.totalorder %s1150_s2, %s1150_s2 }
0x12bb   :  { %p1157_p13 = por %p1156_p12, %p1155_p11 }
0x12bd   :  { %p1158_p0 = pnand %p1157_p13, %p1151_p10 }
0x131c   :  { %v847_v52 = vpop.permute.xlu1 %846 }
0x131d   :  { %849 = vst.msk [vmem:[#allocation8] sm:$0xf] %vm176_vm0, %v847_v52  ;;  %851 = vst.msk [vmem:[#allocation11 + $0x1c] sm:$0xf] %vm176_vm0, %v847_v52 }
0x131e   :  { %1161 = shalt.err (!%p1158_p0)
}
0x131f   :  { %s1162_s15 = scalar_lea.hbm %s1565_s3, 512 }
0x1320   :  { %p1163_p1 = scmp.ne.s32.totalorder %s1565_s3, %s1162_s15  ;;  %p1166_p2 = scmp.lt.u32.totalorder %s1162_s15, %s1565_s3 }
0x1322   :  { %p1168_p3 = pnand %p1166_p2, %p1163_p1 }
0x1324   :  { %1171 = shalt.err (!%p1168_p3)
}
0x1325   :  { %875 = dma.vmem_to_hbm [thread:$0]  %s870_s8, 512, %s1565_s3, [#allocation9], %s1231_s1, %s1231_s1, %s1234_s29  }
0x1326   :  { %s1172_s21 = scalar_lea.vmem %s1501_s10, 512  ;;  %p1177_p5 = scmp.lt.s32.totalorder %s1501_s10, %s1501_s10 }
0x1327   :  { %p1173_p4 = scmp.ne.s32.totalorder %s1501_s10, %s1172_s21  ;;  %p1178_p6 = scmp.lt.s32.totalorder %s1172_s21, %s1172_s21 }
0x1329   :  { %p1179_p7 = por %p1178_p6, %p1177_p5 }
0x132b   :  { %p1180_p8 = pnand %p1179_p7, %p1173_p4 }
0x132d   :  { %1183 = shalt.err (!%p1180_p8)
}
0x132e   :  { %s1184_s24 = scalar_lea.hbm %s1566_s4, 512 }
0x132f   :  { %p1185_p9 = scmp.ne.s32.totalorder %s1566_s4, %s1184_s24  ;;  %p1188_p10 = scmp.lt.u32.totalorder %s1184_s24, %s1566_s4 }
0x1331   :  { %p1190_p11 = pnand %p1188_p10, %p1185_p9 }
0x1333   :  { %1193 = shalt.err (!%p1190_p11)
}
0x1334   :  { %887 = dma.vmem_to_hbm [thread:$0]  %s1501_s10, 512, %s1566_s4, [#allocation9], %s1231_s1, %s1231_s1, %s1234_s29  }
0x1335   :  { %s1194_s6 = scalar_lea.vmem %s1505_s12, 512  ;;  %p1199_p13 = scmp.lt.s32.totalorder %s1505_s12, %s1505_s12 }
0x1336   :  { %p1195_p12 = scmp.ne.s32.totalorder %s1505_s12, %s1194_s6  ;;  %p1200_p0 = scmp.lt.s32.totalorder %s1194_s6, %s1194_s6 }
0x1338   :  { %p1201_p1 = por %p1200_p0, %p1199_p13 }
0x133a   :  { %p1202_p2 = pnand %p1201_p1, %p1195_p12 }
0x133c   :  { %1205 = shalt.err (!%p1202_p2)
}
0x133d   :  { %s1206_s9 = scalar_lea.hbm %s1567_s5, 512 }
0x133e   :  { %p1207_p3 = scmp.ne.s32.totalorder %s1567_s5, %s1206_s9  ;;  %p1210_p4 = scmp.lt.u32.totalorder %s1206_s9, %s1567_s5 }
0x1340   :  { %p1212_p5 = pnand %p1210_p4, %p1207_p3 }
0x1342   :  { %1215 = shalt.err (!%p1212_p5)
}
0x1343   :  { %899 = dma.vmem_to_hbm [thread:$0]  %s1505_s12, 512, %s1567_s5, [#allocation12], %s1231_s1, %s1231_s1, %s1234_s29  }
0x1344   :  { %1220 = dma.done.wait [#allocation4], 512  }
0x1345   :  { %1221 = vsyncadd [#allocation4], 4294966784 }
0x1346   :  { %1222 = dma.done.wait [#allocation9], 1024  }
0x1347   :  { %1223 = vsyncadd [#allocation9], 4294966272 }
0x1348   :  { %1224 = dma.done.wait [#allocation12], 512  }
0x1349   :  { %1225 = vsyncadd [#allocation12], 4294966784 }
0x134a   :  { %912 = vsyncpa [#allocation3], 1 }
0x134b   :  { %913 = vsyncpa [#allocation6], 1 }
0x134c   :  { %914 = vsyncpa [#allocation4], 1 }
0x134d   :  { %915 = vsyncpa [#allocation9], 1 }
0x134e   :  { %916 = vsyncpa [#allocation12], 1 }

// kernel: rnn_forward.4
= control target key start
LH: loop header
LB: loop body
LE: loop exit
PB: predicated region body
PF: predicated region fallthrough
CT: control target
= control target key end

     0   :  { %11 = vsyncpa [#allocation3], 0  ;;  %s1271_s0 = inlined_call_operand.hbm [shape: bf16[64,32], index: 0, kind: input, shape index: {}]   ;;  %s1272_s1 = inlined_call_operand.hbm [shape: bf16[64,32], index: 1, kind: input, shape index: {}]   ;;  %s1273_s2 = inlined_call_operand.hbm [shape: bf16[32,128], index: 2, kind: input, shape index: {}]   ;;  %s1274_s3 = inlined_call_operand.hbm [shape: bf16[32,128], index: 3, kind: input, shape index: {}]   ;;  %s1275_s4 = inlined_call_operand.hbm [shape: f32[1,128], index: 4, kind: input, shape index: {}]   ;;  %s1276_s5 = inlined_call_operand.hbm [shape: f32[1,128], index: 5, kind: input, shape index: {}]   ;;  %s1277_s6 = inlined_call_operand.hbm [shape: bf16[64,256], index: 6, kind: output, shape index: {}]  }
   0x1   :  { %12 = vsyncpa [#allocation6], 0 }
   0x2   :  { %13 = vsyncpa [#allocation9], 0 }
   0x3   :  { %14 = vsyncpa [#allocation12], 0 }
   0x4   :  { %15 = vsyncpa [#allocation4], 0  ;;  %s935_s21 = smov [#allocation5]   ;;  %s936_s23 = smov [#allocation8]  }
   0x5   :  { %s33_s22 = sshll.u32 %s935_s21, 4  ;;  %s57_s24 = sshll.u32 %s936_s23, 4  ;;  %s34_s22 = int_to_ptr.vmem [resolvable:$true] %s33_s22  ;;  %s983_s24 = int_to_ptr.vmem [resolvable:$true] %s57_s24 }
   0x6   :  { %s771_s27 = scalar_lea.hbm %s1272_s1, 512 }
   0x7   :  { %p772_p0 = scmp.ne.s32.totalorder %s1272_s1, %s771_s27  ;;  %p775_p1 = scmp.lt.u32.totalorder %s771_s27, %s1272_s1 }
   0x9   :  { %p777_p2 = pnand %p775_p1, %p772_p0 }
   0xb   :  { %780 = shalt.err (!%p777_p2)
}
   0xc   :  { %s781_s8 = scalar_lea.vmem %s34_s22, 512  ;;  %p786_p4 = scmp.lt.s32.totalorder %s34_s22, %s34_s22 }
   0xd   :  { %p782_p3 = scmp.ne.s32.totalorder %s34_s22, %s781_s8  ;;  %p787_p5 = scmp.lt.s32.totalorder %s781_s8, %s781_s8 }
   0xf   :  { %p788_p6 = por %p787_p5, %p786_p4 }
  0x11   :  { %p789_p7 = pnand %p788_p6, %p782_p3 }
  0x13   :  { %792 = shalt.err (!%p789_p7)
}
  0x14   :  { %s937_s9 = smov 64   ;;  %s938_s10 = smov 4  }
  0x15   :  { %39 = dma.hbm_to_vmem [thread:$0]  %s1272_s1, 512, %s34_s22, [#allocation6], %s937_s9, %s937_s9, %s938_s10  }
  0x16   :  { %s793_s15 = scalar_lea.hbm %s1274_s3, 256 }
  0x17   :  { %p794_p8 = scmp.ne.s32.totalorder %s1274_s3, %s793_s15  ;;  %p797_p9 = scmp.lt.u32.totalorder %s793_s15, %s1274_s3 }
  0x19   :  { %p799_p10 = pnand %p797_p9, %p794_p8 }
  0x1b   :  { %802 = shalt.err (!%p799_p10)
}
  0x1c   :  { %s803_s20 = scalar_lea.vmem %s983_s24, 256  ;;  %p808_p12 = scmp.lt.s32.totalorder %s983_s24, %s983_s24 }
  0x1d   :  { %p804_p11 = scmp.ne.s32.totalorder %s983_s24, %s803_s20  ;;  %p809_p13 = scmp.lt.s32.totalorder %s803_s20, %s803_s20 }
  0x1f   :  { %p810_p0 = por %p809_p13, %p808_p12 }
  0x21   :  { %p811_p1 = pnand %p810_p0, %p804_p11 }
  0x23   :  { %814 = shalt.err (!%p811_p1)
}
  0x24   :  { %63 = dma.hbm_to_vmem [thread:$0]  %s1274_s3, 256, %s983_s24, [#allocation9], %s937_s9, %s937_s9, %s938_s10  }
  0x25   :  { %s939_s22 = smov [#allocation2]   ;;  %s940_s25 = smov [#allocation7]  }
  0x26   :  { %s21_s23 = sshll.u32 %s939_s22, 4  ;;  %s45_s26 = sshll.u32 %s940_s25, 4  ;;  %s22_s23 = int_to_ptr.vmem [resolvable:$true] %s21_s23  ;;  %s1020_s26 = int_to_ptr.vmem [resolvable:$true] %s45_s26 }
  0x27   :  { %s815_s29 = scalar_lea.hbm %s1271_s0, 512 }
  0x28   :  { %p816_p2 = scmp.ne.s32.totalorder %s1271_s0, %s815_s29  ;;  %p819_p3 = scmp.lt.u32.totalorder %s815_s29, %s1271_s0 }
  0x2a   :  { %p821_p4 = pnand %p819_p3, %p816_p2 }
  0x2c   :  { %824 = shalt.err (!%p821_p4)
}
  0x2d   :  { %s825_s3 = scalar_lea.vmem %s22_s23, 512  ;;  %p830_p6 = scmp.lt.s32.totalorder %s22_s23, %s22_s23 }
  0x2e   :  { %p826_p5 = scmp.ne.s32.totalorder %s22_s23, %s825_s3  ;;  %p831_p7 = scmp.lt.s32.totalorder %s825_s3, %s825_s3 }
  0x30   :  { %p832_p8 = por %p831_p7, %p830_p6 }
  0x32   :  { %p833_p9 = pnand %p832_p8, %p826_p5 }
  0x34   :  { %836 = shalt.err (!%p833_p9)
}
  0x35   :  { %27 = dma.hbm_to_vmem [thread:$0]  %s1271_s0, 512, %s22_s23, [#allocation3], %s937_s9, %s937_s9, %s938_s10  }
  0x36   :  { %s837_s15 = scalar_lea.hbm %s1273_s2, 256 }
  0x37   :  { %p838_p10 = scmp.ne.s32.totalorder %s1273_s2, %s837_s15  ;;  %p841_p11 = scmp.lt.u32.totalorder %s837_s15, %s1273_s2 }
  0x39   :  { %p843_p12 = pnand %p841_p11, %p838_p10 }
  0x3b   :  { %846 = shalt.err (!%p843_p12)
}
  0x3c   :  { %s847_s20 = scalar_lea.vmem %s1020_s26, 256  ;;  %p852_p0 = scmp.lt.s32.totalorder %s1020_s26, %s1020_s26 }
  0x3d   :  { %p848_p13 = scmp.ne.s32.totalorder %s1020_s26, %s847_s20  ;;  %p853_p1 = scmp.lt.s32.totalorder %s847_s20, %s847_s20 }
  0x3f   :  { %p854_p2 = por %p853_p1, %p852_p0 }
  0x41   :  { %p855_p3 = pnand %p854_p2, %p848_p13 }
  0x43   :  { %858 = shalt.err (!%p855_p3)
}
  0x44   :  { %51 = dma.hbm_to_vmem [thread:$0]  %s1273_s2, 256, %s1020_s26, [#allocation6], %s937_s9, %s937_s9, %s938_s10  }
  0x45   :  { %s941_s21 = smov [#allocation10]   ;;  %s942_s23 = smov [#allocation11]  }
  0x46   :  { %s70_s22 = sshll.u32 %s941_s21, 4  ;;  %s80_s25 = sshll.u32 %s942_s23, 4  ;;  %s71_s22 = int_to_ptr.vmem [resolvable:$true] %s70_s22  ;;  %s81_s25 = int_to_ptr.vmem [resolvable:$true] %s80_s25 }
  0x47   :  { %s859_s29 = scalar_lea.hbm %s1275_s4, 16 }
  0x48   :  { %p860_p4 = scmp.ne.s32.totalorder %s1275_s4, %s859_s29  ;;  %p863_p5 = scmp.lt.u32.totalorder %s859_s29, %s1275_s4 }
  0x4a   :  { %p865_p6 = pnand %p863_p5, %p860_p4 }
  0x4c   :  { %868 = shalt.err (!%p865_p6)
}
  0x4d   :  { %s869_s2 = scalar_lea.vmem %s71_s22, 16  ;;  %s873_s10 = scalar_lea.vmem %s71_s22, 32 }
  0x4e   :  { %p870_p7 = scmp.ne.s32.totalorder %s71_s22, %s869_s2  ;;  %p874_p8 = scmp.lt.s32.totalorder %s71_s22, %s71_s22 }
  0x4f   :  { %p875_p9 = scmp.lt.s32.totalorder %s873_s10, %s869_s2 }
  0x51   :  { %p876_p10 = por %p875_p9, %p874_p8 }
  0x53   :  { %p877_p11 = pnand %p876_p10, %p870_p7 }
  0x55   :  { %880 = shalt.err (!%p877_p11)
}
  0x56   :  { %73 = dma.hbm_to_vmem [thread:$0]  %s1275_s4, 16, %s71_s22, [#allocation9]  }
  0x57   :  { %s881_s13 = scalar_lea.hbm %s1276_s5, 16 }
  0x58   :  { %p882_p12 = scmp.ne.s32.totalorder %s1276_s5, %s881_s13  ;;  %p885_p13 = scmp.lt.u32.totalorder %s881_s13, %s1276_s5 }
  0x5a   :  { %p887_p0 = pnand %p885_p13, %p882_p12 }
  0x5c   :  { %890 = shalt.err (!%p887_p0)
}
  0x5d   :  { %s891_s18 = scalar_lea.vmem %s81_s25, 16  ;;  %s895_s19 = scalar_lea.vmem %s81_s25, 32 }
  0x5e   :  { %p892_p1 = scmp.ne.s32.totalorder %s81_s25, %s891_s18  ;;  %p896_p2 = scmp.lt.s32.totalorder %s81_s25, %s81_s25 }
  0x5f   :  { %p897_p3 = scmp.lt.s32.totalorder %s895_s19, %s891_s18 }
  0x61   :  { %p898_p4 = por %p897_p3, %p896_p2 }
  0x63   :  { %p899_p5 = pnand %p898_p4, %p892_p1 }
  0x65   :  { %902 = shalt.err (!%p899_p5)
}
  0x66   :  { %83 = dma.hbm_to_vmem [thread:$0]  %s1276_s5, 16, %s81_s25, [#allocation12]  }
  0x67   :  { %925 = dma.done.wait [#allocation3], 512  }
  0x68   :  { %926 = vsyncadd [#allocation3], 4294966784 }
  0x69   :  { %927 = dma.done.wait [#allocation6], 768  }
  0x6a   :  { %928 = vsyncadd [#allocation6], 4294966528 }
  0x6b   :  { %929 = dma.done.wait [#allocation9], 272  }
  0x6c   :  { %930 = vsyncadd [#allocation9], 4294967024 }
  0x6d   :  { %931 = dma.done.wait [#allocation12], 16  }
  0x6e   :  { %932 = vsyncadd [#allocation12], 4294967280  ;;  %v759_v0 = vld [vmem:[#allocation7] sm:$0xff]   ;;  %v760_v1 = vld [vmem:[#allocation8] sm:$0xff]   ;;  %vm154_vm0 = vcmask 261120   ;;  %vm392_vm1 = vcmask 257024  }
  0x6f   :  { %722 = vmatprep.subr.bf16.mxu0 %v759_v0  ;;  %v761_v2 = vld [vmem:[#allocation7 + $0x8] sm:$0xff]   ;;  %734 = vmatprep.subr.bf16.mxu1 %v760_v1  ;;  %v762_v3 = vld [vmem:[#allocation8 + $0x8] sm:$0xff]   ;;  %v763_v4 = vld [vmem:[#allocation2] sm:$0xff]   ;;  %s943_s5 = smov 32   ;;  %s944_s0 = smov 96   ;;  %vm449_vm2 = vcmask 519424  }
  0x70   :  { %723 = vmatpush3.bf16.msra.mxu0 %v759_v0  ;;  %735 = vmatpush3.bf16.msra.mxu1 %v760_v1  ;;  %v764_v5 = vld [vmem:[#allocation5] sm:$0xff]   ;;  %v765_v6 = vld [vmem:[#allocation2 + $0x8] sm:$0xff]   ;;  %v767_v8 = vld [vmem:[#allocation2 + $0x10] sm:$0xff]   ;;  %vm482_vm3 = vcmask 781824   ;;  %vm515_vm4 = vcmask 1044224  }
  0x71   :  { %724 = vmatprep.subr.bf16.mxu0 %v761_v2  ;;  %736 = vmatprep.subr.bf16.mxu1 %v762_v3  ;;  %v766_v7 = vld [vmem:[#allocation5 + $0x8] sm:$0xff]   ;;  %v768_v9 = vld [vmem:[#allocation5 + $0x10] sm:$0xff]   ;;  %v769_v10 = vld [vmem:[#allocation2 + $0x18] sm:$0xff]  }
  0x72   :  { %726 = vmatprep.mubr.msk.bf16.mxu0 %vm154_vm0, %v763_v4  ;;  %738 = vmatprep.mubr.msk.bf16.mxu1 %vm154_vm0, %v764_v5  ;;  %v770_v11 = vld [vmem:[#allocation5 + $0x18] sm:$0xff]   ;;  %v656_v12 = vld [vmem:[#allocation10] ss:$0 sm:$0xff]  ;;  %v1089_v13 = vld [vmem:[#allocation11] ss:$0 sm:$0xff] }
  0x74   :  { %725 = vmatpush3.bf16.msra.mxu0 %v761_v2  ;;  %737 = vmatpush3.bf16.msra.mxu1 %v762_v3 }
  0x77   :  { %727 = vmatmul.mubr.msk.bf16.vlgmr.msra.gmra.mrb[0].mxu0 %vm154_vm0, %v765_v6  ;;  %739 = vmatmul.mubr.msk.bf16.vlgmr.msra.gmra.mrb[0].mxu1 %vm154_vm0, %v766_v7 }
  0x78   :  { %730 = vmatprep.mubr.msk.bf16.mxu0 %vm154_vm0, %v767_v8  ;;  %742 = vmatprep.mubr.msk.bf16.mxu1 %vm154_vm0, %v768_v9 }
  0x7f   :  { %731 = vmatmul.mubr.msk.bf16.gmra.mrb[4].mxu0 %vm154_vm0, %v769_v10  ;;  %743 = vmatmul.mubr.msk.bf16.gmra.mrb[4].mxu1 %vm154_vm0, %v770_v11 }
 0x14a   :  { %v728_v14 = vpop.f32.mrb[0].mxu0  ;;  %v740_v16 = vpop.f32.mrb[0].mxu1 }
 0x14b   :  { %v210_v15 = vadd.f32 %v728_v14, %v656_v12  ;;  %v201_v17 = vpop.f32.mrb[1].mxu0  ;;  %v338_v18 = vadd.f32 %v740_v16, %v1089_v13  ;;  %v329_v20 = vpop.f32.mrb[1].mxu1 }
 0x14c   :  { %v202_v19 = vadd.f32 %v656_v12, %v201_v17  ;;  %v729_v21 = vpop.f32.mrb[2].mxu0  ;;  %v741_v24 = vpop.f32.mrb[2].mxu1  ;;  %v330_v32 = vadd.f32 %v1089_v13, %v329_v20 }
 0x14d   :  { %v696_v22 = vpack.c.bf16 %v210_v15, %v210_v15  ;;  %v213_v23 = vadd.f32 %v729_v21, %v656_v12  ;;  %v204_v25 = vpop.f32.mrb[3].mxu0  ;;  %v1092_v26 = vpack.c.bf16 %v338_v18, %v338_v18  ;;  %v332_v29 = vpop.f32.mrb[3].mxu1  ;;  %v341_v52 = vadd.f32 %v741_v24, %v1089_v13 }
 0x14e   :  { %v694_v27 = vpack.c.bf16 %v202_v19, %v202_v19  ;;  %v205_v28 = vadd.f32 %v656_v12, %v204_v25  ;;  %v1105_v40 = vpack.c.bf16 %v330_v32, %v330_v32  ;;  %v333_v54 = vadd.f32 %v1089_v13, %v332_v29 }
 0x14f   :  { %v697_v30 = vpack.c.bf16 %v213_v23, %v213_v23  ;;  %462 = vrot.lane.b32.xlu0 %v696_v22, %s943_s5  ;;  %395 = vst.msk [vmem:[#allocation13 + $0x10] sm:$0xf] %vm392_vm1, %v696_v22  ;;  %429 = vrot.lane.b32.xlu1 %v1092_v26, %s943_s5  ;;  %v1126_v53 = vpack.c.bf16 %v341_v52, %v341_v52 }
 0x150   :  { %v695_v31 = vpack.c.bf16 %v205_v28, %v205_v28  ;;  %393 = vst.msk [vmem:[#allocation13] sm:$0xf] %vm392_vm1, %v694_v27  ;;  %v1135_v55 = vpack.c.bf16 %v333_v54, %v333_v54 }
 0x151   :  { %396 = vst.msk [vmem:[#allocation13 + $0x18] sm:$0xf] %vm392_vm1, %v697_v30 }
 0x152   :  { %v732_v33 = vpop.f32.mrb[4].mxu0  ;;  %394 = vst.msk [vmem:[#allocation13 + $0x8] sm:$0xf] %vm392_vm1, %v695_v31  ;;  %v744_v35 = vpop.f32.mrb[4].mxu1 }
 0x153   :  { %495 = vrot.lane.b32.xlu0 %v1092_v26, %s937_s9  ;;  %v226_v34 = vadd.f32 %v732_v33, %v656_v12  ;;  %v217_v36 = vpop.f32.mrb[5].mxu0  ;;  %528 = vrot.lane.b32.xlu1 %v696_v22, %s937_s9  ;;  %v345_v38 = vpop.f32.mrb[5].mxu1  ;;  %v354_v56 = vadd.f32 %v744_v35, %v1089_v13 }
 0x154   :  { %v218_v37 = vadd.f32 %v656_v12, %v217_v36  ;;  %v733_v39 = vpop.f32.mrb[6].mxu0  ;;  %v745_v43 = vpop.f32.mrb[6].mxu1  ;;  %v346_v58 = vadd.f32 %v1089_v13, %v345_v38 }
 0x155   :  { %v700_v41 = vpack.c.bf16 %v226_v34, %v226_v34  ;;  %v229_v42 = vadd.f32 %v733_v39, %v656_v12  ;;  %v220_v44 = vpop.f32.mrb[7].mxu0  ;;  %v357_v46 = vadd.f32 %v745_v43, %v1089_v13  ;;  %v348_v48 = vpop.f32.mrb[7].mxu1  ;;  %v1147_v57 = vpack.c.bf16 %v354_v56, %v354_v56 }
 0x156   :  { %v698_v45 = vpack.c.bf16 %v218_v37, %v218_v37  ;;  %v221_v47 = vadd.f32 %v656_v12, %v220_v44  ;;  %v349_v50 = vadd.f32 %v1089_v13, %v348_v48  ;;  %v1159_v59 = vpack.c.bf16 %v346_v58, %v346_v58 }
 0x157   :  { %425 = vrot.lane.b32.xlu0 %v1105_v40, %s943_s5  ;;  %v701_v49 = vpack.c.bf16 %v229_v42, %v229_v42  ;;  %399 = vst.msk [vmem:[#allocation13 + $0x30] sm:$0xf] %vm392_vm1, %v700_v41  ;;  %560 = vrot.lane.b32.xlu1 %v1092_v26, %s944_s0  ;;  %v1172_v60 = vpack.c.bf16 %v357_v46, %v357_v46 }
 0x158   :  { %v699_v51 = vpack.c.bf16 %v221_v47, %v221_v47  ;;  %397 = vst.msk [vmem:[#allocation13 + $0x20] sm:$0xf] %vm392_vm1, %v698_v45  ;;  %v1180_v61 = vpack.c.bf16 %v349_v50, %v349_v50 }
 0x159   :  { %400 = vst.msk [vmem:[#allocation13 + $0x38] sm:$0xf] %vm392_vm1, %v701_v49 }
 0x15a   :  { %398 = vst.msk [vmem:[#allocation13 + $0x28] sm:$0xf] %vm392_vm1, %v699_v51 }
 0x15b   :  { %458 = vrot.lane.b32.xlu0 %v694_v27, %s943_s5  ;;  %592 = vrot.lane.b32.xlu1 %v696_v22, %s944_s0 }
 0x15f   :  { %491 = vrot.lane.b32.xlu0 %v1105_v40, %s937_s9  ;;  %524 = vrot.lane.b32.xlu1 %v694_v27, %s937_s9 }
 0x163   :  { %530 = vrot.lane.b32.xlu0 %v697_v30, %s937_s9  ;;  %556 = vrot.lane.b32.xlu1 %v1105_v40, %s944_s0 }
 0x167   :  { %562 = vrot.lane.b32.xlu0 %v1126_v53, %s944_s0  ;;  %588 = vrot.lane.b32.xlu1 %v694_v27, %s944_s0 }
 0x16b   :  { %594 = vrot.lane.b32.xlu0 %v697_v30, %s944_s0  ;;  %431 = vrot.lane.b32.xlu1 %v1126_v53, %s943_s5 }
 0x16f   :  { %427 = vrot.lane.b32.xlu0 %v1135_v55, %s943_s5  ;;  %464 = vrot.lane.b32.xlu1 %v697_v30, %s943_s5 }
 0x173   :  { %526 = vrot.lane.b32.xlu0 %v695_v31, %s937_s9  ;;  %497 = vrot.lane.b32.xlu1 %v1126_v53, %s937_s9 }
 0x177   :  { %558 = vrot.lane.b32.xlu0 %v1135_v55, %s944_s0  ;;  %460 = vrot.lane.b32.xlu1 %v695_v31, %s943_s5 }
 0x17b   :  { %590 = vrot.lane.b32.xlu0 %v695_v31, %s944_s0  ;;  %493 = vrot.lane.b32.xlu1 %v1135_v55, %s937_s9 }
 0x17f   :  { %437 = vrot.lane.b32.xlu0 %v1147_v57, %s943_s5  ;;  %536 = vrot.lane.b32.xlu1 %v700_v41, %s937_s9 }
 0x183   :  { %470 = vrot.lane.b32.xlu0 %v700_v41, %s943_s5  ;;  %568 = vrot.lane.b32.xlu1 %v1147_v57, %s944_s0 }
 0x187   :  { %433 = vrot.lane.b32.xlu0 %v1159_v59, %s943_s5  ;;  %600 = vrot.lane.b32.xlu1 %v700_v41, %s944_s0 }
 0x18b   :  { %466 = vrot.lane.b32.xlu0 %v698_v45, %s943_s5  ;;  %532 = vrot.lane.b32.xlu1 %v698_v45, %s937_s9 }
 0x18f   :  { %499 = vrot.lane.b32.xlu0 %v1159_v59, %s937_s9  ;;  %564 = vrot.lane.b32.xlu1 %v1159_v59, %s944_s0 }
 0x193   :  { %538 = vrot.lane.b32.xlu0 %v701_v49, %s937_s9  ;;  %596 = vrot.lane.b32.xlu1 %v698_v45, %s944_s0 }
 0x197   :  { %570 = vrot.lane.b32.xlu0 %v1172_v60, %s944_s0  ;;  %439 = vrot.lane.b32.xlu1 %v1172_v60, %s943_s5 }
 0x19b   :  { %602 = vrot.lane.b32.xlu0 %v701_v49, %s944_s0  ;;  %472 = vrot.lane.b32.xlu1 %v701_v49, %s943_s5 }
 0x19f   :  { %534 = vrot.lane.b32.xlu0 %v699_v51, %s937_s9  ;;  %435 = vrot.lane.b32.xlu1 %v1180_v61, %s943_s5 }
 0x1a3   :  { %566 = vrot.lane.b32.xlu0 %v1180_v61, %s944_s0  ;;  %468 = vrot.lane.b32.xlu1 %v699_v51, %s943_s5 }
 0x1a7   :  { %598 = vrot.lane.b32.xlu0 %v699_v51, %s944_s0  ;;  %501 = vrot.lane.b32.xlu1 %v1180_v61, %s937_s9 }
 0x1ab   :  { %503 = vrot.lane.b32.xlu0 %v1147_v57, %s937_s9  ;;  %505 = vrot.lane.b32.xlu1 %v1172_v60, %s937_s9  ;;  %s945_s9 = smov [#allocation13]  }
 0x1ac   :  { %s641_s1 = sshll.u32 %s945_s9, 4  ;;  %s642_s1 = int_to_ptr.vmem [resolvable:$true] %s641_s1 }
 0x1ad   :  { %s903_s21 = scalar_lea.vmem %s642_s1, 1024  ;;  %p908_p7 = scmp.lt.s32.totalorder %s642_s1, %s642_s1 }
 0x1ae   :  { %p904_p6 = scmp.ne.s32.totalorder %s642_s1, %s903_s21  ;;  %p909_p8 = scmp.lt.s32.totalorder %s903_s21, %s903_s21 }
 0x1b0   :  { %p910_p9 = por %p909_p8, %p908_p7 }
 0x1b2   :  { %p911_p10 = pnand %p910_p9, %p904_p6 }
 0x1c1   :  { %v463_v62 = vpop.permute.xlu0 %462  ;;  %v430_v63 = vpop.permute.xlu1 %429 }
 0x1c2   :  { %452 = vst.msk [vmem:[#allocation13 + $0x10] sm:$0xf] %vm449_vm2, %v430_v63 }
 0x1c3   :  { %485 = vst.msk [vmem:[#allocation13 + $0x10] sm:$0xf] %vm482_vm3, %v463_v62 }
 0x1c5   :  { %v496_v0 = vpop.permute.xlu0 %495  ;;  %v529_v1 = vpop.permute.xlu1 %528 }
 0x1c6   :  { %518 = vst.msk [vmem:[#allocation13 + $0x10] sm:$0xf] %vm515_vm4, %v496_v0 }
 0x1c7   :  { %550 = vst.msk [vmem:[#allocation13 + $0x14] sm:$0xf] %vm392_vm1, %v529_v1 }
 0x1c9   :  { %v426_v2 = vpop.permute.xlu0 %425  ;;  %v561_v3 = vpop.permute.xlu1 %560 }
 0x1ca   :  { %450 = vst.msk [vmem:[#allocation13] sm:$0xf] %vm449_vm2, %v426_v2  ;;  %582 = vst.msk [vmem:[#allocation13 + $0x14] sm:$0xf] %vm449_vm2, %v561_v3 }
 0x1cd   :  { %v459_v4 = vpop.permute.xlu0 %458  ;;  %v593_v5 = vpop.permute.xlu1 %592 }
 0x1ce   :  { %483 = vst.msk [vmem:[#allocation13] sm:$0xf] %vm482_vm3, %v459_v4  ;;  %614 = vst.msk [vmem:[#allocation13 + $0x14] sm:$0xf] %vm482_vm3, %v593_v5 }
 0x1cf   :  { %630 = vst.msk [vmem:[#allocation13 + $0x14] sm:$0xf] %vm515_vm4, %v1092_v26 }
 0x1d1   :  { %v492_v6 = vpop.permute.xlu0 %491  ;;  %v525_v7 = vpop.permute.xlu1 %524 }
 0x1d2   :  { %516 = vst.msk [vmem:[#allocation13] sm:$0xf] %vm515_vm4, %v492_v6 }
 0x1d3   :  { %548 = vst.msk [vmem:[#allocation13 + $0x4] sm:$0xf] %vm392_vm1, %v525_v7 }
 0x1d5   :  { %v531_v8 = vpop.permute.xlu0 %530  ;;  %v557_v9 = vpop.permute.xlu1 %556 }
 0x1d6   :  { %551 = vst.msk [vmem:[#allocation13 + $0x1c] sm:$0xf] %vm392_vm1, %v531_v8 }
 0x1d7   :  { %580 = vst.msk [vmem:[#allocation13 + $0x4] sm:$0xf] %vm449_vm2, %v557_v9 }
 0x1d9   :  { %v563_v10 = vpop.permute.xlu0 %562  ;;  %v589_v11 = vpop.permute.xlu1 %588 }
 0x1da   :  { %583 = vst.msk [vmem:[#allocation13 + $0x1c] sm:$0xf] %vm449_vm2, %v563_v10 }
 0x1db   :  { %612 = vst.msk [vmem:[#allocation13 + $0x4] sm:$0xf] %vm482_vm3, %v589_v11 }
 0x1dc   :  { %628 = vst.msk [vmem:[#allocation13 + $0x4] sm:$0xf] %vm515_vm4, %v1105_v40 }
 0x1dd   :  { %v595_v12 = vpop.permute.xlu0 %594  ;;  %v432_v13 = vpop.permute.xlu1 %431 }
 0x1de   :  { %615 = vst.msk [vmem:[#allocation13 + $0x1c] sm:$0xf] %vm482_vm3, %v595_v12 }
 0x1df   :  { %453 = vst.msk [vmem:[#allocation13 + $0x18] sm:$0xf] %vm449_vm2, %v432_v13 }
 0x1e0   :  { %631 = vst.msk [vmem:[#allocation13 + $0x1c] sm:$0xf] %vm515_vm4, %v1126_v53 }
 0x1e1   :  { %v428_v14 = vpop.permute.xlu0 %427  ;;  %v465_v15 = vpop.permute.xlu1 %464 }
 0x1e2   :  { %451 = vst.msk [vmem:[#allocation13 + $0x8] sm:$0xf] %vm449_vm2, %v428_v14 }
 0x1e3   :  { %486 = vst.msk [vmem:[#allocation13 + $0x18] sm:$0xf] %vm482_vm3, %v465_v15 }
 0x1e5   :  { %v527_v16 = vpop.permute.xlu0 %526  ;;  %v498_v17 = vpop.permute.xlu1 %497 }
 0x1e6   :  { %549 = vst.msk [vmem:[#allocation13 + $0xc] sm:$0xf] %vm392_vm1, %v527_v16 }
 0x1e7   :  { %519 = vst.msk [vmem:[#allocation13 + $0x18] sm:$0xf] %vm515_vm4, %v498_v17 }
 0x1e9   :  { %v559_v18 = vpop.permute.xlu0 %558  ;;  %v461_v19 = vpop.permute.xlu1 %460 }
 0x1ea   :  { %581 = vst.msk [vmem:[#allocation13 + $0xc] sm:$0xf] %vm449_vm2, %v559_v18 }
 0x1eb   :  { %484 = vst.msk [vmem:[#allocation13 + $0x8] sm:$0xf] %vm482_vm3, %v461_v19 }
 0x1ed   :  { %v591_v20 = vpop.permute.xlu0 %590  ;;  %v494_v21 = vpop.permute.xlu1 %493 }
 0x1ee   :  { %613 = vst.msk [vmem:[#allocation13 + $0xc] sm:$0xf] %vm482_vm3, %v591_v20 }
 0x1ef   :  { %517 = vst.msk [vmem:[#allocation13 + $0x8] sm:$0xf] %vm515_vm4, %v494_v21  ;;  %629 = vst.msk [vmem:[#allocation13 + $0xc] sm:$0xf] %vm515_vm4, %v1135_v55 }
 0x1f1   :  { %v438_v22 = vpop.permute.xlu0 %437  ;;  %v537_v23 = vpop.permute.xlu1 %536 }
 0x1f2   :  { %456 = vst.msk [vmem:[#allocation13 + $0x30] sm:$0xf] %vm449_vm2, %v438_v22 }
 0x1f3   :  { %554 = vst.msk [vmem:[#allocation13 + $0x34] sm:$0xf] %vm392_vm1, %v537_v23 }
 0x1f5   :  { %v471_v24 = vpop.permute.xlu0 %470  ;;  %v569_v25 = vpop.permute.xlu1 %568 }
 0x1f6   :  { %489 = vst.msk [vmem:[#allocation13 + $0x30] sm:$0xf] %vm482_vm3, %v471_v24 }
 0x1f7   :  { %586 = vst.msk [vmem:[#allocation13 + $0x34] sm:$0xf] %vm449_vm2, %v569_v25 }
 0x1f9   :  { %v434_v26 = vpop.permute.xlu0 %433  ;;  %v601_v27 = vpop.permute.xlu1 %600 }
 0x1fa   :  { %454 = vst.msk [vmem:[#allocation13 + $0x20] sm:$0xf] %vm449_vm2, %v434_v26 }
 0x1fb   :  { %618 = vst.msk [vmem:[#allocation13 + $0x34] sm:$0xf] %vm482_vm3, %v601_v27 }
 0x1fc   :  { %634 = vst.msk [vmem:[#allocation13 + $0x34] sm:$0xf] %vm515_vm4, %v1147_v57 }
 0x1fd   :  { %v467_v28 = vpop.permute.xlu0 %466  ;;  %v533_v29 = vpop.permute.xlu1 %532 }
 0x1fe   :  { %487 = vst.msk [vmem:[#allocation13 + $0x20] sm:$0xf] %vm482_vm3, %v467_v28 }
 0x1ff   :  { %552 = vst.msk [vmem:[#allocation13 + $0x24] sm:$0xf] %vm392_vm1, %v533_v29 }
 0x201   :  { %v500_v30 = vpop.permute.xlu0 %499  ;;  %v565_v31 = vpop.permute.xlu1 %564 }
 0x202   :  { %520 = vst.msk [vmem:[#allocation13 + $0x20] sm:$0xf] %vm515_vm4, %v500_v30 }
 0x203   :  { %584 = vst.msk [vmem:[#allocation13 + $0x24] sm:$0xf] %vm449_vm2, %v565_v31 }
 0x205   :  { %v539_v32 = vpop.permute.xlu0 %538  ;;  %v597_v33 = vpop.permute.xlu1 %596 }
 0x206   :  { %555 = vst.msk [vmem:[#allocation13 + $0x3c] sm:$0xf] %vm392_vm1, %v539_v32 }
 0x207   :  { %616 = vst.msk [vmem:[#allocation13 + $0x24] sm:$0xf] %vm482_vm3, %v597_v33 }
 0x208   :  { %632 = vst.msk [vmem:[#allocation13 + $0x24] sm:$0xf] %vm515_vm4, %v1159_v59 }
 0x209   :  { %v571_v34 = vpop.permute.xlu0 %570  ;;  %v440_v35 = vpop.permute.xlu1 %439 }
 0x20a   :  { %587 = vst.msk [vmem:[#allocation13 + $0x3c] sm:$0xf] %vm449_vm2, %v571_v34  ;;  %457 = vst.msk [vmem:[#allocation13 + $0x38] sm:$0xf] %vm449_vm2, %v440_v35 }
 0x20d   :  { %v603_v36 = vpop.permute.xlu0 %602  ;;  %v473_v37 = vpop.permute.xlu1 %472 }
 0x20e   :  { %619 = vst.msk [vmem:[#allocation13 + $0x3c] sm:$0xf] %vm482_vm3, %v603_v36  ;;  %490 = vst.msk [vmem:[#allocation13 + $0x38] sm:$0xf] %vm482_vm3, %v473_v37 }
 0x20f   :  { %635 = vst.msk [vmem:[#allocation13 + $0x3c] sm:$0xf] %vm515_vm4, %v1172_v60 }
 0x211   :  { %v535_v38 = vpop.permute.xlu0 %534  ;;  %v436_v39 = vpop.permute.xlu1 %435 }
 0x212   :  { %553 = vst.msk [vmem:[#allocation13 + $0x2c] sm:$0xf] %vm392_vm1, %v535_v38 }
 0x213   :  { %455 = vst.msk [vmem:[#allocation13 + $0x28] sm:$0xf] %vm449_vm2, %v436_v39 }
 0x215   :  { %v567_v40 = vpop.permute.xlu0 %566  ;;  %v469_v41 = vpop.permute.xlu1 %468 }
 0x216   :  { %585 = vst.msk [vmem:[#allocation13 + $0x2c] sm:$0xf] %vm449_vm2, %v567_v40 }
 0x217   :  { %488 = vst.msk [vmem:[#allocation13 + $0x28] sm:$0xf] %vm482_vm3, %v469_v41 }
 0x219   :  { %v599_v42 = vpop.permute.xlu0 %598  ;;  %v502_v43 = vpop.permute.xlu1 %501 }
 0x21a   :  { %617 = vst.msk [vmem:[#allocation13 + $0x2c] sm:$0xf] %vm482_vm3, %v599_v42 }
 0x21b   :  { %521 = vst.msk [vmem:[#allocation13 + $0x28] sm:$0xf] %vm515_vm4, %v502_v43  ;;  %633 = vst.msk [vmem:[#allocation13 + $0x2c] sm:$0xf] %vm515_vm4, %v1180_v61 }
 0x21d   :  { %v504_v44 = vpop.permute.xlu0 %503  ;;  %v506_v45 = vpop.permute.xlu1 %505 }
 0x21e   :  { %522 = vst.msk [vmem:[#allocation13 + $0x30] sm:$0xf] %vm515_vm4, %v504_v44  ;;  %523 = vst.msk [vmem:[#allocation13 + $0x38] sm:$0xf] %vm515_vm4, %v506_v45 }
 0x21f   :  { %914 = shalt.err (!%p911_p10)
}
 0x220   :  { %s915_s25 = scalar_lea.hbm %s1277_s6, 1024 }
 0x221   :  { %p916_p11 = scmp.ne.s32.totalorder %s1277_s6, %s915_s25  ;;  %p919_p12 = scmp.lt.u32.totalorder %s915_s25, %s1277_s6 }
 0x223   :  { %p921_p13 = pnand %p919_p12, %p916_p11 }
 0x225   :  { %924 = shalt.err (!%p921_p13)
}
 0x226   :  { %s946_s7 = smov 128   ;;  %s947_s8 = smov 8  }
 0x227   :  { %647 = dma.vmem_to_hbm [thread:$0]  %s642_s1, 1024, %s1277_s6, [#allocation4], %s946_s7, %s946_s7, %s947_s8  }
 0x228   :  { %933 = dma.done.wait [#allocation4], 1024  }
 0x229   :  { %934 = vsyncadd [#allocation4], 4294966272 }
 0x22a   :  { %651 = vsyncpa [#allocation3], 1 }
 0x22b   :  { %652 = vsyncpa [#allocation6], 1 }
 0x22c   :  { %653 = vsyncpa [#allocation9], 1 }
 0x22d   :  { %654 = vsyncpa [#allocation12], 1 }
 0x22e   :  { %655 = vsyncpa [#allocation4], 1 }

// kernel: rnn_forward.6
= control target key start
LH: loop header
LB: loop body
LE: loop exit
PB: predicated region body
PF: predicated region fallthrough
CT: control target
= control target key end

     0   :  { %15 = vsyncpa [#allocation3], 0  ;;  %s1883_s0 = inlined_call_operand.hbm [shape: bf16[64,32], index: 0, kind: input, shape index: {}]   ;;  %s1884_s1 = inlined_call_operand.hbm [shape: bf16[64,32], index: 1, kind: input, shape index: {}]   ;;  %s1885_s2 = inlined_call_operand.hbm [shape: bf16[64,32], index: 2, kind: input, shape index: {}]   ;;  %s1886_s3 = inlined_call_operand.hbm [shape: bf16[64,32], index: 3, kind: input, shape index: {}]   ;;  %s1887_s4 = inlined_call_operand.hbm [shape: bf16[32,128], index: 4, kind: input, shape index: {}]   ;;  %s1888_s5 = inlined_call_operand.hbm [shape: bf16[32,128], index: 5, kind: input, shape index: {}]   ;;  %s1889_s6 = inlined_call_operand.hbm [shape: bf16[32,128], index: 6, kind: input, shape index: {}]   ;;  %s1890_s7 = inlined_call_operand.hbm [shape: bf16[32,128], index: 7, kind: input, shape index: {}]   ;;  %s1891_s8 = inlined_call_operand.hbm [shape: f32[1,128], index: 8, kind: input, shape index: {}]   ;;  %s1892_s9 = inlined_call_operand.hbm [shape: f32[1,128], index: 9, kind: input, shape index: {}]   ;;  %s1893_s10 = inlined_call_operand.hbm [shape: bf16[64,256], index: 10, kind: output, shape index: {}]  }
   0x1   :  { %16 = vsyncpa [#allocation6], 0 }
   0x2   :  { %17 = vsyncpa [#allocation9], 0 }
   0x3   :  { %18 = vsyncpa [#allocation12], 0 }
   0x4   :  { %19 = vsyncpa [#allocation15], 0 }
   0x5   :  { %20 = vsyncpa [#allocation18], 0 }
   0x6   :  { %21 = vsyncpa [#allocation4], 0  ;;  %s1441_s13 = smov [#allocation5]   ;;  %s1442_s15 = smov [#allocation8]  }
   0x7   :  { %s39_s14 = sshll.u32 %s1441_s13, 4  ;;  %s63_s16 = sshll.u32 %s1442_s15, 4  ;;  %s40_s14 = int_to_ptr.vmem [resolvable:$true] %s39_s14  ;;  %s1513_s16 = int_to_ptr.vmem [resolvable:$true] %s63_s16 }
   0x8   :  { %s1185_s19 = scalar_lea.hbm %s1884_s1, 512 }
   0x9   :  { %p1186_p0 = scmp.ne.s32.totalorder %s1884_s1, %s1185_s19  ;;  %p1189_p1 = scmp.lt.u32.totalorder %s1185_s19, %s1884_s1 }
   0xb   :  { %p1191_p2 = pnand %p1189_p1, %p1186_p0 }
   0xd   :  { %1194 = shalt.err (!%p1191_p2)
}
   0xe   :  { %s1195_s24 = scalar_lea.vmem %s40_s14, 512  ;;  %p1200_p4 = scmp.lt.s32.totalorder %s40_s14, %s40_s14 }
   0xf   :  { %p1196_p3 = scmp.ne.s32.totalorder %s40_s14, %s1195_s24  ;;  %p1201_p5 = scmp.lt.s32.totalorder %s1195_s24, %s1195_s24 }
  0x11   :  { %p1202_p6 = por %p1201_p5, %p1200_p4 }
  0x13   :  { %p1203_p7 = pnand %p1202_p6, %p1196_p3 }
  0x15   :  { %1206 = shalt.err (!%p1203_p7)
}
  0x16   :  { %s1443_s25 = smov 64   ;;  %s1444_s26 = smov 4  }
  0x17   :  { %45 = dma.hbm_to_vmem [thread:$0]  %s1884_s1, 512, %s40_s14, [#allocation6], %s1443_s25, %s1443_s25, %s1444_s26  }
  0x18   :  { %s1207_s11 = scalar_lea.hbm %s1886_s3, 512 }
  0x19   :  { %p1208_p8 = scmp.ne.s32.totalorder %s1886_s3, %s1207_s11  ;;  %p1211_p9 = scmp.lt.u32.totalorder %s1207_s11, %s1886_s3 }
  0x1b   :  { %p1213_p10 = pnand %p1211_p9, %p1208_p8 }
  0x1d   :  { %1216 = shalt.err (!%p1213_p10)
}
  0x1e   :  { %s1217_s18 = scalar_lea.vmem %s1513_s16, 512  ;;  %p1222_p12 = scmp.lt.s32.totalorder %s1513_s16, %s1513_s16 }
  0x1f   :  { %p1218_p11 = scmp.ne.s32.totalorder %s1513_s16, %s1217_s18  ;;  %p1223_p13 = scmp.lt.s32.totalorder %s1217_s18, %s1217_s18 }
  0x21   :  { %p1224_p0 = por %p1223_p13, %p1222_p12 }
  0x23   :  { %p1225_p1 = pnand %p1224_p0, %p1218_p11 }
  0x25   :  { %1228 = shalt.err (!%p1225_p1)
}
  0x26   :  { %69 = dma.hbm_to_vmem [thread:$0]  %s1886_s3, 512, %s1513_s16, [#allocation9], %s1443_s25, %s1443_s25, %s1444_s26  }
  0x27   :  { %s1445_s19 = smov [#allocation11]   ;;  %s1446_s21 = smov [#allocation14]  }
  0x28   :  { %s87_s20 = sshll.u32 %s1445_s19, 4  ;;  %s111_s22 = sshll.u32 %s1446_s21, 4  ;;  %s88_s20 = int_to_ptr.vmem [resolvable:$true] %s87_s20  ;;  %s1550_s22 = int_to_ptr.vmem [resolvable:$true] %s111_s22 }
  0x29   :  { %s1229_s27 = scalar_lea.hbm %s1888_s5, 256 }
  0x2a   :  { %p1230_p2 = scmp.ne.s32.totalorder %s1888_s5, %s1229_s27  ;;  %p1233_p3 = scmp.lt.u32.totalorder %s1229_s27, %s1888_s5 }
  0x2c   :  { %p1235_p4 = pnand %p1233_p3, %p1230_p2 }
  0x2e   :  { %1238 = shalt.err (!%p1235_p4)
}
  0x2f   :  { %s1239_s3 = scalar_lea.vmem %s88_s20, 256  ;;  %p1244_p6 = scmp.lt.s32.totalorder %s88_s20, %s88_s20 }
  0x30   :  { %p1240_p5 = scmp.ne.s32.totalorder %s88_s20, %s1239_s3  ;;  %p1245_p7 = scmp.lt.s32.totalorder %s1239_s3, %s1239_s3 }
  0x32   :  { %p1246_p8 = por %p1245_p7, %p1244_p6 }
  0x34   :  { %p1247_p9 = pnand %p1246_p8, %p1240_p5 }
  0x36   :  { %1250 = shalt.err (!%p1247_p9)
}
  0x37   :  { %93 = dma.hbm_to_vmem [thread:$0]  %s1888_s5, 256, %s88_s20, [#allocation12], %s1443_s25, %s1443_s25, %s1444_s26  }
  0x38   :  { %s1251_s17 = scalar_lea.hbm %s1890_s7, 256 }
  0x39   :  { %p1252_p10 = scmp.ne.s32.totalorder %s1890_s7, %s1251_s17  ;;  %p1255_p11 = scmp.lt.u32.totalorder %s1251_s17, %s1890_s7 }
  0x3b   :  { %p1257_p12 = pnand %p1255_p11, %p1252_p10 }
  0x3d   :  { %1260 = shalt.err (!%p1257_p12)
}
  0x3e   :  { %s1261_s21 = scalar_lea.vmem %s1550_s22, 256  ;;  %p1266_p0 = scmp.lt.s32.totalorder %s1550_s22, %s1550_s22 }
  0x3f   :  { %p1262_p13 = scmp.ne.s32.totalorder %s1550_s22, %s1261_s21  ;;  %p1267_p1 = scmp.lt.s32.totalorder %s1261_s21, %s1261_s21 }
  0x41   :  { %p1268_p2 = por %p1267_p1, %p1266_p0 }
  0x43   :  { %p1269_p3 = pnand %p1268_p2, %p1262_p13 }
  0x45   :  { %1272 = shalt.err (!%p1269_p3)
}
  0x46   :  { %117 = dma.hbm_to_vmem [thread:$0]  %s1890_s7, 256, %s1550_s22, [#allocation15], %s1443_s25, %s1443_s25, %s1444_s26  }
  0x47   :  { %s1447_s23 = smov [#allocation2]   ;;  %s1448_s27 = smov [#allocation7]  }
  0x48   :  { %s27_s24 = sshll.u32 %s1447_s23, 4  ;;  %s51_s28 = sshll.u32 %s1448_s27, 4  ;;  %s28_s24 = int_to_ptr.vmem [resolvable:$true] %s27_s24  ;;  %s1587_s28 = int_to_ptr.vmem [resolvable:$true] %s51_s28 }
  0x49   :  { %s1273_s11 = scalar_lea.hbm %s1883_s0, 512 }
  0x4a   :  { %p1274_p4 = scmp.ne.s32.totalorder %s1883_s0, %s1273_s11  ;;  %p1277_p5 = scmp.lt.u32.totalorder %s1273_s11, %s1883_s0 }
  0x4c   :  { %p1279_p6 = pnand %p1277_p5, %p1274_p4 }
  0x4e   :  { %1282 = shalt.err (!%p1279_p6)
}
  0x4f   :  { %s1283_s7 = scalar_lea.vmem %s28_s24, 512  ;;  %p1288_p8 = scmp.lt.s32.totalorder %s28_s24, %s28_s24 }
  0x50   :  { %p1284_p7 = scmp.ne.s32.totalorder %s28_s24, %s1283_s7  ;;  %p1289_p9 = scmp.lt.s32.totalorder %s1283_s7, %s1283_s7 }
  0x52   :  { %p1290_p10 = por %p1289_p9, %p1288_p8 }
  0x54   :  { %p1291_p11 = pnand %p1290_p10, %p1284_p7 }
  0x56   :  { %1294 = shalt.err (!%p1291_p11)
}
  0x57   :  { %33 = dma.hbm_to_vmem [thread:$0]  %s1883_s0, 512, %s28_s24, [#allocation3], %s1443_s25, %s1443_s25, %s1444_s26  }
  0x58   :  { %s1295_s1 = scalar_lea.hbm %s1885_s2, 512 }
  0x59   :  { %p1296_p12 = scmp.ne.s32.totalorder %s1885_s2, %s1295_s1  ;;  %p1299_p13 = scmp.lt.u32.totalorder %s1295_s1, %s1885_s2 }
  0x5b   :  { %p1301_p0 = pnand %p1299_p13, %p1296_p12 }
  0x5d   :  { %1304 = shalt.err (!%p1301_p0)
}
  0x5e   :  { %s1305_s20 = scalar_lea.vmem %s1587_s28, 512  ;;  %p1310_p2 = scmp.lt.s32.totalorder %s1587_s28, %s1587_s28 }
  0x5f   :  { %p1306_p1 = scmp.ne.s32.totalorder %s1587_s28, %s1305_s20  ;;  %p1311_p3 = scmp.lt.s32.totalorder %s1305_s20, %s1305_s20 }
  0x61   :  { %p1312_p4 = por %p1311_p3, %p1310_p2 }
  0x63   :  { %p1313_p5 = pnand %p1312_p4, %p1306_p1 }
  0x65   :  { %1316 = shalt.err (!%p1313_p5)
}
  0x66   :  { %57 = dma.hbm_to_vmem [thread:$0]  %s1885_s2, 512, %s1587_s28, [#allocation6], %s1443_s25, %s1443_s25, %s1444_s26  }
  0x67   :  { %s1449_s24 = smov [#allocation10]   ;;  %s1450_s29 = smov [#allocation13]  }
  0x68   :  { %s75_s27 = sshll.u32 %s1449_s24, 4  ;;  %s99_s30 = sshll.u32 %s1450_s29, 4  ;;  %s76_s27 = int_to_ptr.vmem [resolvable:$true] %s75_s27  ;;  %s1624_s30 = int_to_ptr.vmem [resolvable:$true] %s99_s30 }
  0x69   :  { %s1317_s16 = scalar_lea.hbm %s1887_s4, 256 }
  0x6a   :  { %p1318_p6 = scmp.ne.s32.totalorder %s1887_s4, %s1317_s16  ;;  %p1321_p7 = scmp.lt.u32.totalorder %s1317_s16, %s1887_s4 }
  0x6c   :  { %p1323_p8 = pnand %p1321_p7, %p1318_p6 }
  0x6e   :  { %1326 = shalt.err (!%p1323_p8)
}
  0x6f   :  { %s1327_s2 = scalar_lea.vmem %s76_s27, 256  ;;  %p1332_p10 = scmp.lt.s32.totalorder %s76_s27, %s76_s27 }
  0x70   :  { %p1328_p9 = scmp.ne.s32.totalorder %s76_s27, %s1327_s2  ;;  %p1333_p11 = scmp.lt.s32.totalorder %s1327_s2, %s1327_s2 }
  0x72   :  { %p1334_p12 = por %p1333_p11, %p1332_p10 }
  0x74   :  { %p1335_p13 = pnand %p1334_p12, %p1328_p9 }
  0x76   :  { %1338 = shalt.err (!%p1335_p13)
}
  0x77   :  { %81 = dma.hbm_to_vmem [thread:$0]  %s1887_s4, 256, %s76_s27, [#allocation9], %s1443_s25, %s1443_s25, %s1444_s26  }
  0x78   :  { %s1339_s1 = scalar_lea.hbm %s1889_s6, 256 }
  0x79   :  { %p1340_p0 = scmp.ne.s32.totalorder %s1889_s6, %s1339_s1  ;;  %p1343_p1 = scmp.lt.u32.totalorder %s1339_s1, %s1889_s6 }
  0x7b   :  { %p1345_p2 = pnand %p1343_p1, %p1340_p0 }
  0x7d   :  { %1348 = shalt.err (!%p1345_p2)
}
  0x7e   :  { %s1349_s20 = scalar_lea.vmem %s1624_s30, 256  ;;  %p1354_p4 = scmp.lt.s32.totalorder %s1624_s30, %s1624_s30 }
  0x7f   :  { %p1350_p3 = scmp.ne.s32.totalorder %s1624_s30, %s1349_s20  ;;  %p1355_p5 = scmp.lt.s32.totalorder %s1349_s20, %s1349_s20 }
  0x81   :  { %p1356_p6 = por %p1355_p5, %p1354_p4 }
  0x83   :  { %p1357_p7 = pnand %p1356_p6, %p1350_p3 }
  0x85   :  { %1360 = shalt.err (!%p1357_p7)
}
  0x86   :  { %105 = dma.hbm_to_vmem [thread:$0]  %s1889_s6, 256, %s1624_s30, [#allocation12], %s1443_s25, %s1443_s25, %s1444_s26  }
  0x87   :  { %s1451_s23 = smov [#allocation16]   ;;  %s1452_s27 = smov [#allocation17]  }
  0x88   :  { %s124_s24 = sshll.u32 %s1451_s23, 4  ;;  %s134_s29 = sshll.u32 %s1452_s27, 4  ;;  %s125_s24 = int_to_ptr.vmem [resolvable:$true] %s124_s24  ;;  %s135_s29 = int_to_ptr.vmem [resolvable:$true] %s134_s29 }
  0x89   :  { %s1361_s16 = scalar_lea.hbm %s1891_s8, 16 }
  0x8a   :  { %p1362_p8 = scmp.ne.s32.totalorder %s1891_s8, %s1361_s16  ;;  %p1365_p9 = scmp.lt.u32.totalorder %s1361_s16, %s1891_s8 }
  0x8c   :  { %p1367_p10 = pnand %p1365_p9, %p1362_p8 }
  0x8e   :  { %1370 = shalt.err (!%p1367_p10)
}
  0x8f   :  { %s1371_s6 = scalar_lea.vmem %s125_s24, 16  ;;  %s1375_s26 = scalar_lea.vmem %s125_s24, 32 }
  0x90   :  { %p1372_p11 = scmp.ne.s32.totalorder %s125_s24, %s1371_s6  ;;  %p1376_p12 = scmp.lt.s32.totalorder %s125_s24, %s125_s24 }
  0x91   :  { %p1377_p13 = scmp.lt.s32.totalorder %s1375_s26, %s1371_s6 }
  0x93   :  { %p1378_p0 = por %p1377_p13, %p1376_p12 }
  0x95   :  { %p1379_p1 = pnand %p1378_p0, %p1372_p11 }
  0x97   :  { %1382 = shalt.err (!%p1379_p1)
}
  0x98   :  { %127 = dma.hbm_to_vmem [thread:$0]  %s1891_s8, 16, %s125_s24, [#allocation15]  }
  0x99   :  { %s1383_s17 = scalar_lea.hbm %s1892_s9, 16 }
  0x9a   :  { %p1384_p2 = scmp.ne.s32.totalorder %s1892_s9, %s1383_s17  ;;  %p1387_p3 = scmp.lt.u32.totalorder %s1383_s17, %s1892_s9 }
  0x9c   :  { %p1389_p4 = pnand %p1387_p3, %p1384_p2 }
  0x9e   :  { %1392 = shalt.err (!%p1389_p4)
}
  0x9f   :  { %s1393_s21 = scalar_lea.vmem %s135_s29, 16  ;;  %s1397_s5 = scalar_lea.vmem %s135_s29, 32 }
  0xa0   :  { %p1394_p5 = scmp.ne.s32.totalorder %s135_s29, %s1393_s21  ;;  %p1398_p6 = scmp.lt.s32.totalorder %s135_s29, %s135_s29 }
  0xa1   :  { %p1399_p7 = scmp.lt.s32.totalorder %s1397_s5, %s1393_s21 }
  0xa3   :  { %p1400_p8 = por %p1399_p7, %p1398_p6 }
  0xa5   :  { %p1401_p9 = pnand %p1400_p8, %p1394_p5 }
  0xa7   :  { %1404 = shalt.err (!%p1401_p9)
}
  0xa8   :  { %137 = dma.hbm_to_vmem [thread:$0]  %s1892_s9, 16, %s135_s29, [#allocation18]  }
  0xa9   :  { %1427 = dma.done.wait [#allocation3], 512  }
  0xaa   :  { %1428 = vsyncadd [#allocation3], 4294966784 }
  0xab   :  { %1429 = dma.done.wait [#allocation6], 1024  }
  0xac   :  { %1430 = vsyncadd [#allocation6], 4294966272 }
  0xad   :  { %1431 = dma.done.wait [#allocation9], 768  }
  0xae   :  { %1432 = vsyncadd [#allocation9], 4294966528 }
  0xaf   :  { %1433 = dma.done.wait [#allocation12], 512  }
  0xb0   :  { %1434 = vsyncadd [#allocation12], 4294966784 }
  0xb1   :  { %1435 = dma.done.wait [#allocation15], 272  }
  0xb2   :  { %1436 = vsyncadd [#allocation15], 4294967024 }
  0xb3   :  { %1437 = dma.done.wait [#allocation18], 16  }
  0xb4   :  { %1438 = vsyncadd [#allocation18], 4294967280  ;;  %v1161_v0 = vld [vmem:[#allocation11] sm:$0xff]   ;;  %v1163_v2 = vld [vmem:[#allocation11 + $0x8] sm:$0xff]   ;;  %vm225_vm0 = vcmask 261120   ;;  %vm716_vm1 = vcmask 257024  }
  0xb5   :  { %v1162_v1 = vld [vmem:[#allocation14] sm:$0xff]   ;;  %1080 = vmatprep.subr.bf16.mxu0 %v1161_v0  ;;  %v1164_v3 = vld [vmem:[#allocation14 + $0x8] sm:$0xff]   ;;  %v1165_v4 = vld [vmem:[#allocation5] sm:$0xff]   ;;  %s1453_s9 = smov 32   ;;  %s1454_s4 = smov 96   ;;  %vm773_vm2 = vcmask 519424  }
  0xb6   :  { %1104 = vmatprep.subr.bf16.mxu1 %v1162_v1  ;;  %1081 = vmatpush3.bf16.msra.mxu0 %v1161_v0  ;;  %v1166_v5 = vld [vmem:[#allocation8] sm:$0xff]   ;;  %v1167_v6 = vld [vmem:[#allocation5 + $0x8] sm:$0xff]   ;;  %v1171_v10 = vld [vmem:[#allocation5 + $0x10] sm:$0xff]   ;;  %vm806_vm3 = vcmask 781824   ;;  %vm839_vm4 = vcmask 1044224  }
  0xb7   :  { %1105 = vmatpush3.bf16.msra.mxu1 %v1162_v1  ;;  %1082 = vmatprep.subr.bf16.mxu0 %v1163_v2  ;;  %v1168_v7 = vld [vmem:[#allocation10] sm:$0xff]   ;;  %v1169_v8 = vld [vmem:[#allocation8 + $0x8] sm:$0xff]   ;;  %v1172_v11 = vld [vmem:[#allocation8 + $0x10] sm:$0xff]  }
  0xb8   :  { %1106 = vmatprep.subr.bf16.mxu1 %v1164_v3  ;;  %1084 = vmatprep.mubr.msk.bf16.mxu0 %vm225_vm0, %v1165_v4  ;;  %v1170_v9 = vld [vmem:[#allocation13] sm:$0xff]   ;;  %v1173_v12 = vld [vmem:[#allocation5 + $0x18] sm:$0xff]   ;;  %v1174_v13 = vld [vmem:[#allocation10 + $0x8] sm:$0xff]  }
  0xb9   :  { %1108 = vmatprep.mubr.msk.bf16.mxu1 %vm225_vm0, %v1166_v5  ;;  %v1175_v14 = vld [vmem:[#allocation8 + $0x18] sm:$0xff]   ;;  %v1176_v15 = vld [vmem:[#allocation13 + $0x8] sm:$0xff]   ;;  %v1177_v16 = vld [vmem:[#allocation2] sm:$0xff]  }
  0xba   :  { %1083 = vmatpush3.bf16.msra.mxu0 %v1163_v2  ;;  %v1178_v17 = vld [vmem:[#allocation7] sm:$0xff]   ;;  %v1179_v18 = vld [vmem:[#allocation2 + $0x8] sm:$0xff]   ;;  %v1181_v20 = vld [vmem:[#allocation2 + $0x10] sm:$0xff]  }
  0xbb   :  { %1107 = vmatpush3.bf16.msra.mxu1 %v1164_v3  ;;  %1092 = vmatprep.subr.bf16.mxu0 %v1168_v7  ;;  %v1180_v19 = vld [vmem:[#allocation7 + $0x8] sm:$0xff]   ;;  %v1182_v21 = vld [vmem:[#allocation7 + $0x10] sm:$0xff]   ;;  %v1183_v22 = vld [vmem:[#allocation2 + $0x18] sm:$0xff]  }
  0xbc   :  { %1116 = vmatprep.subr.bf16.mxu1 %v1170_v9  ;;  %v1184_v23 = vld [vmem:[#allocation7 + $0x18] sm:$0xff]   ;;  %v1002_v24 = vld [vmem:[#allocation16] ss:$0 sm:$0xff]  ;;  %v1701_v25 = vld [vmem:[#allocation17] ss:$0 sm:$0xff] }
  0xbd   :  { %1085 = vmatmul.mubr.msk.bf16.vlgmr.msra.gmra.mrb[0].mxu0 %vm225_vm0, %v1167_v6 }
  0xbe   :  { %1109 = vmatmul.mubr.msk.bf16.vlgmr.msra.gmra.mrb[0].mxu1 %vm225_vm0, %v1169_v8  ;;  %1093 = vmatpush3.bf16.msra.mxu0 %v1168_v7 }
  0xbf   :  { %1117 = vmatpush3.bf16.msra.mxu1 %v1170_v9  ;;  %1088 = vmatprep.mubr.msk.bf16.mxu0 %vm225_vm0, %v1171_v10 }
  0xc0   :  { %1112 = vmatprep.mubr.msk.bf16.mxu1 %vm225_vm0, %v1172_v11  ;;  %1094 = vmatprep.subr.bf16.mxu0 %v1174_v13 }
  0xc1   :  { %1118 = vmatprep.subr.bf16.mxu1 %v1176_v15 }
  0xc2   :  { %1095 = vmatpush3.bf16.msra.mxu0 %v1174_v13 }
  0xc3   :  { %1119 = vmatpush3.bf16.msra.mxu1 %v1176_v15 }
  0xc5   :  { %1089 = vmatmul.mubr.msk.bf16.gmra.mrb[4].mxu0 %vm225_vm0, %v1173_v12 }
  0xc6   :  { %1113 = vmatmul.mubr.msk.bf16.gmra.mrb[4].mxu1 %vm225_vm0, %v1175_v14  ;;  %1096 = vmatprep.mubr.msk.bf16.mxu0 %vm225_vm0, %v1177_v16 }
  0xc7   :  { %1120 = vmatprep.mubr.msk.bf16.mxu1 %vm225_vm0, %v1178_v17 }
  0xcd   :  { %1097 = vmatmul.mubr.msk.bf16.vlgmr.msra.gmra.mrb[0].mxu0 %vm225_vm0, %v1179_v18 }
  0xce   :  { %1121 = vmatmul.mubr.msk.bf16.vlgmr.msra.gmra.mrb[0].mxu1 %vm225_vm0, %v1180_v19  ;;  %1100 = vmatprep.mubr.msk.bf16.mxu0 %vm225_vm0, %v1181_v20 }
  0xcf   :  { %1124 = vmatprep.mubr.msk.bf16.mxu1 %vm225_vm0, %v1182_v21 }
  0xd5   :  { %1101 = vmatmul.mubr.msk.bf16.gmra.mrb[4].mxu0 %vm225_vm0, %v1183_v22 }
  0xd6   :  { %1125 = vmatmul.mubr.msk.bf16.gmra.mrb[4].mxu1 %vm225_vm0, %v1184_v23 }
 0x1a0   :  { %v1098_v26 = vpop.f32.mrb[0].mxu0 }
 0x1a1   :  { %v421_v27 = vadd.f32 %v1098_v26, %v1002_v24  ;;  %v1122_v28 = vpop.f32.mrb[0].mxu1  ;;  %v381_v29 = vpop.f32.mrb[1].mxu0 }
 0x1a2   :  { %v678_v30 = vadd.f32 %v1122_v28, %v1701_v25  ;;  %v419_v31 = vadd.f32 %v1002_v24, %v381_v29  ;;  %v638_v32 = vpop.f32.mrb[1].mxu1  ;;  %v1099_v33 = vpop.f32.mrb[2].mxu0 }
 0x1a3   :  { %v1042_v34 = vpack.c.bf16 %v421_v27, %v421_v27  ;;  %v422_v35 = vadd.f32 %v1099_v33, %v1002_v24  ;;  %v1123_v36 = vpop.f32.mrb[2].mxu1  ;;  %v384_v37 = vpop.f32.mrb[3].mxu0  ;;  %v676_v44 = vadd.f32 %v1701_v25, %v638_v32 }
 0x1a4   :  { %v1704_v38 = vpack.c.bf16 %v678_v30, %v678_v30  ;;  %v1040_v39 = vpack.c.bf16 %v419_v31, %v419_v31  ;;  %v420_v40 = vadd.f32 %v1002_v24, %v384_v37  ;;  %v641_v41 = vpop.f32.mrb[3].mxu1  ;;  %v679_v0 = vadd.f32 %v1123_v36, %v1701_v25 }
 0x1a5   :  { %v1043_v42 = vpack.c.bf16 %v422_v35, %v422_v35  ;;  %786 = vrot.lane.b32.xlu0 %v1042_v34, %s1453_s9  ;;  %719 = vst.msk [vmem:[#allocation19 + $0x10] sm:$0xf] %vm716_vm1, %v1042_v34  ;;  %v1717_v52 = vpack.c.bf16 %v676_v44, %v676_v44  ;;  %v677_v2 = vadd.f32 %v1701_v25, %v641_v41 }
 0x1a6   :  { %v1041_v43 = vpack.c.bf16 %v420_v40, %v420_v40  ;;  %753 = vrot.lane.b32.xlu1 %v1704_v38, %s1453_s9  ;;  %717 = vst.msk [vmem:[#allocation19] sm:$0xf] %vm716_vm1, %v1040_v39  ;;  %v1738_v1 = vpack.c.bf16 %v679_v0, %v679_v0 }
 0x1a7   :  { %720 = vst.msk [vmem:[#allocation19 + $0x18] sm:$0xf] %vm716_vm1, %v1043_v42  ;;  %v1747_v3 = vpack.c.bf16 %v677_v2, %v677_v2 }
 0x1a8   :  { %v1102_v45 = vpop.f32.mrb[4].mxu0  ;;  %718 = vst.msk [vmem:[#allocation19 + $0x8] sm:$0xf] %vm716_vm1, %v1041_v43 }
 0x1a9   :  { %v425_v46 = vadd.f32 %v1102_v45, %v1002_v24  ;;  %v1126_v47 = vpop.f32.mrb[4].mxu1  ;;  %819 = vrot.lane.b32.xlu0 %v1704_v38, %s1443_s25  ;;  %v397_v48 = vpop.f32.mrb[5].mxu0 }
 0x1aa   :  { %v654_v49 = vpop.f32.mrb[5].mxu1  ;;  %852 = vrot.lane.b32.xlu1 %v1042_v34, %s1443_s25  ;;  %v423_v50 = vadd.f32 %v1002_v24, %v397_v48  ;;  %v1103_v51 = vpop.f32.mrb[6].mxu0  ;;  %v682_v4 = vadd.f32 %v1126_v47, %v1701_v25 }
 0x1ab   :  { %v1046_v53 = vpack.c.bf16 %v425_v46, %v425_v46  ;;  %v426_v54 = vadd.f32 %v1103_v51, %v1002_v24  ;;  %v1127_v55 = vpop.f32.mrb[6].mxu1  ;;  %v400_v56 = vpop.f32.mrb[7].mxu0  ;;  %v680_v6 = vadd.f32 %v1701_v25, %v654_v49 }
 0x1ac   :  { %v1044_v57 = vpack.c.bf16 %v423_v50, %v423_v50  ;;  %v683_v58 = vadd.f32 %v1127_v55, %v1701_v25  ;;  %v424_v59 = vadd.f32 %v1002_v24, %v400_v56  ;;  %v657_v60 = vpop.f32.mrb[7].mxu1  ;;  %v1762_v5 = vpack.c.bf16 %v682_v4, %v682_v4 }
 0x1ad   :  { %v1047_v61 = vpack.c.bf16 %v426_v54, %v426_v54  ;;  %v681_v62 = vadd.f32 %v1701_v25, %v657_v60  ;;  %749 = vrot.lane.b32.xlu0 %v1717_v52, %s1453_s9  ;;  %723 = vst.msk [vmem:[#allocation19 + $0x30] sm:$0xf] %vm716_vm1, %v1046_v53  ;;  %v1771_v7 = vpack.c.bf16 %v680_v6, %v680_v6 }
 0x1ae   :  { %v1045_v63 = vpack.c.bf16 %v424_v59, %v424_v59  ;;  %884 = vrot.lane.b32.xlu1 %v1704_v38, %s1454_s4  ;;  %721 = vst.msk [vmem:[#allocation19 + $0x20] sm:$0xf] %vm716_vm1, %v1044_v57  ;;  %v1784_v8 = vpack.c.bf16 %v683_v58, %v683_v58 }
 0x1af   :  { %724 = vst.msk [vmem:[#allocation19 + $0x38] sm:$0xf] %vm716_vm1, %v1047_v61  ;;  %v1792_v9 = vpack.c.bf16 %v681_v62, %v681_v62 }
 0x1b0   :  { %722 = vst.msk [vmem:[#allocation19 + $0x28] sm:$0xf] %vm716_vm1, %v1045_v63 }
 0x1b1   :  { %782 = vrot.lane.b32.xlu0 %v1040_v39, %s1453_s9 }
 0x1b2   :  { %916 = vrot.lane.b32.xlu1 %v1042_v34, %s1454_s4 }
 0x1b5   :  { %815 = vrot.lane.b32.xlu0 %v1717_v52, %s1443_s25 }
 0x1b6   :  { %848 = vrot.lane.b32.xlu1 %v1040_v39, %s1443_s25 }
 0x1b9   :  { %854 = vrot.lane.b32.xlu0 %v1043_v42, %s1443_s25 }
 0x1ba   :  { %880 = vrot.lane.b32.xlu1 %v1717_v52, %s1454_s4 }
 0x1bd   :  { %886 = vrot.lane.b32.xlu0 %v1738_v1, %s1454_s4 }
 0x1be   :  { %912 = vrot.lane.b32.xlu1 %v1040_v39, %s1454_s4 }
 0x1c1   :  { %918 = vrot.lane.b32.xlu0 %v1043_v42, %s1454_s4 }
 0x1c2   :  { %755 = vrot.lane.b32.xlu1 %v1738_v1, %s1453_s9 }
 0x1c5   :  { %751 = vrot.lane.b32.xlu0 %v1747_v3, %s1453_s9 }
 0x1c6   :  { %788 = vrot.lane.b32.xlu1 %v1043_v42, %s1453_s9 }
 0x1c9   :  { %850 = vrot.lane.b32.xlu0 %v1041_v43, %s1443_s25 }
 0x1ca   :  { %821 = vrot.lane.b32.xlu1 %v1738_v1, %s1443_s25 }
 0x1cd   :  { %882 = vrot.lane.b32.xlu0 %v1747_v3, %s1454_s4 }
 0x1ce   :  { %784 = vrot.lane.b32.xlu1 %v1041_v43, %s1453_s9 }
 0x1d1   :  { %914 = vrot.lane.b32.xlu0 %v1041_v43, %s1454_s4 }
 0x1d2   :  { %817 = vrot.lane.b32.xlu1 %v1747_v3, %s1443_s25 }
 0x1d5   :  { %761 = vrot.lane.b32.xlu0 %v1762_v5, %s1453_s9 }
 0x1d6   :  { %860 = vrot.lane.b32.xlu1 %v1046_v53, %s1443_s25 }
 0x1d9   :  { %794 = vrot.lane.b32.xlu0 %v1046_v53, %s1453_s9 }
 0x1da   :  { %892 = vrot.lane.b32.xlu1 %v1762_v5, %s1454_s4 }
 0x1dd   :  { %757 = vrot.lane.b32.xlu0 %v1771_v7, %s1453_s9 }
 0x1de   :  { %924 = vrot.lane.b32.xlu1 %v1046_v53, %s1454_s4 }
 0x1e1   :  { %790 = vrot.lane.b32.xlu0 %v1044_v57, %s1453_s9 }
 0x1e2   :  { %856 = vrot.lane.b32.xlu1 %v1044_v57, %s1443_s25 }
 0x1e5   :  { %823 = vrot.lane.b32.xlu0 %v1771_v7, %s1443_s25 }
 0x1e6   :  { %888 = vrot.lane.b32.xlu1 %v1771_v7, %s1454_s4 }
 0x1e9   :  { %862 = vrot.lane.b32.xlu0 %v1047_v61, %s1443_s25 }
 0x1ea   :  { %920 = vrot.lane.b32.xlu1 %v1044_v57, %s1454_s4 }
 0x1ed   :  { %894 = vrot.lane.b32.xlu0 %v1784_v8, %s1454_s4 }
 0x1ee   :  { %763 = vrot.lane.b32.xlu1 %v1784_v8, %s1453_s9 }
 0x1f1   :  { %926 = vrot.lane.b32.xlu0 %v1047_v61, %s1454_s4 }
 0x1f2   :  { %796 = vrot.lane.b32.xlu1 %v1047_v61, %s1453_s9 }
 0x1f5   :  { %858 = vrot.lane.b32.xlu0 %v1045_v63, %s1443_s25 }
 0x1f6   :  { %759 = vrot.lane.b32.xlu1 %v1792_v9, %s1453_s9 }
 0x1f9   :  { %890 = vrot.lane.b32.xlu0 %v1792_v9, %s1454_s4 }
 0x1fa   :  { %792 = vrot.lane.b32.xlu1 %v1045_v63, %s1453_s9 }
 0x1fd   :  { %922 = vrot.lane.b32.xlu0 %v1045_v63, %s1454_s4 }
 0x1fe   :  { %825 = vrot.lane.b32.xlu1 %v1792_v9, %s1443_s25 }
 0x201   :  { %827 = vrot.lane.b32.xlu0 %v1762_v5, %s1443_s25 }
 0x202   :  { %829 = vrot.lane.b32.xlu1 %v1784_v8, %s1443_s25  ;;  %s1455_s25 = smov [#allocation19]  }
 0x203   :  { %s965_s0 = sshll.u32 %s1455_s25, 4  ;;  %s966_s0 = int_to_ptr.vmem [resolvable:$true] %s965_s0 }
 0x204   :  { %s1405_s23 = scalar_lea.vmem %s966_s0, 1024  ;;  %p1410_p11 = scmp.lt.s32.totalorder %s966_s0, %s966_s0 }
 0x205   :  { %p1406_p10 = scmp.ne.s32.totalorder %s966_s0, %s1405_s23  ;;  %p1411_p12 = scmp.lt.s32.totalorder %s1405_s23, %s1405_s23 }
 0x207   :  { %p1412_p13 = por %p1411_p12, %p1410_p11 }
 0x209   :  { %p1413_p0 = pnand %p1412_p13, %p1406_p10 }
 0x217   :  { %v787_v10 = vpop.permute.xlu0 %786 }
 0x218   :  { %v754_v11 = vpop.permute.xlu1 %753 }
 0x219   :  { %776 = vst.msk [vmem:[#allocation19 + $0x10] sm:$0xf] %vm773_vm2, %v754_v11 }
 0x21a   :  { %809 = vst.msk [vmem:[#allocation19 + $0x10] sm:$0xf] %vm806_vm3, %v787_v10 }
 0x21b   :  { %v820_v12 = vpop.permute.xlu0 %819 }
 0x21c   :  { %v853_v13 = vpop.permute.xlu1 %852  ;;  %842 = vst.msk [vmem:[#allocation19 + $0x10] sm:$0xf] %vm839_vm4, %v820_v12 }
 0x21d   :  { %874 = vst.msk [vmem:[#allocation19 + $0x14] sm:$0xf] %vm716_vm1, %v853_v13 }
 0x21f   :  { %v750_v14 = vpop.permute.xlu0 %749 }
 0x220   :  { %v885_v15 = vpop.permute.xlu1 %884  ;;  %774 = vst.msk [vmem:[#allocation19] sm:$0xf] %vm773_vm2, %v750_v14 }
 0x221   :  { %906 = vst.msk [vmem:[#allocation19 + $0x14] sm:$0xf] %vm773_vm2, %v885_v15 }
 0x223   :  { %v783_v16 = vpop.permute.xlu0 %782 }
 0x224   :  { %v917_v17 = vpop.permute.xlu1 %916  ;;  %807 = vst.msk [vmem:[#allocation19] sm:$0xf] %vm806_vm3, %v783_v16 }
 0x225   :  { %938 = vst.msk [vmem:[#allocation19 + $0x14] sm:$0xf] %vm806_vm3, %v917_v17 }
 0x226   :  { %954 = vst.msk [vmem:[#allocation19 + $0x14] sm:$0xf] %vm839_vm4, %v1704_v38 }
 0x227   :  { %v816_v18 = vpop.permute.xlu0 %815 }
 0x228   :  { %v849_v19 = vpop.permute.xlu1 %848  ;;  %840 = vst.msk [vmem:[#allocation19] sm:$0xf] %vm839_vm4, %v816_v18 }
 0x229   :  { %872 = vst.msk [vmem:[#allocation19 + $0x4] sm:$0xf] %vm716_vm1, %v849_v19 }
 0x22b   :  { %v855_v20 = vpop.permute.xlu0 %854 }
 0x22c   :  { %v881_v21 = vpop.permute.xlu1 %880  ;;  %875 = vst.msk [vmem:[#allocation19 + $0x1c] sm:$0xf] %vm716_vm1, %v855_v20 }
 0x22d   :  { %904 = vst.msk [vmem:[#allocation19 + $0x4] sm:$0xf] %vm773_vm2, %v881_v21 }
 0x22f   :  { %v887_v22 = vpop.permute.xlu0 %886 }
 0x230   :  { %v913_v23 = vpop.permute.xlu1 %912  ;;  %907 = vst.msk [vmem:[#allocation19 + $0x1c] sm:$0xf] %vm773_vm2, %v887_v22 }
 0x231   :  { %936 = vst.msk [vmem:[#allocation19 + $0x4] sm:$0xf] %vm806_vm3, %v913_v23 }
 0x232   :  { %952 = vst.msk [vmem:[#allocation19 + $0x4] sm:$0xf] %vm839_vm4, %v1717_v52 }
 0x233   :  { %v919_v24 = vpop.permute.xlu0 %918 }
 0x234   :  { %v756_v25 = vpop.permute.xlu1 %755  ;;  %939 = vst.msk [vmem:[#allocation19 + $0x1c] sm:$0xf] %vm806_vm3, %v919_v24 }
 0x235   :  { %777 = vst.msk [vmem:[#allocation19 + $0x18] sm:$0xf] %vm773_vm2, %v756_v25 }
 0x236   :  { %955 = vst.msk [vmem:[#allocation19 + $0x1c] sm:$0xf] %vm839_vm4, %v1738_v1 }
 0x237   :  { %v752_v26 = vpop.permute.xlu0 %751 }
 0x238   :  { %775 = vst.msk [vmem:[#allocation19 + $0x8] sm:$0xf] %vm773_vm2, %v752_v26  ;;  %v789_v27 = vpop.permute.xlu1 %788 }
 0x239   :  { %810 = vst.msk [vmem:[#allocation19 + $0x18] sm:$0xf] %vm806_vm3, %v789_v27 }
 0x23b   :  { %v851_v28 = vpop.permute.xlu0 %850 }
 0x23c   :  { %v822_v29 = vpop.permute.xlu1 %821  ;;  %873 = vst.msk [vmem:[#allocation19 + $0xc] sm:$0xf] %vm716_vm1, %v851_v28 }
 0x23d   :  { %843 = vst.msk [vmem:[#allocation19 + $0x18] sm:$0xf] %vm839_vm4, %v822_v29 }
 0x23f   :  { %v883_v30 = vpop.permute.xlu0 %882 }
 0x240   :  { %905 = vst.msk [vmem:[#allocation19 + $0xc] sm:$0xf] %vm773_vm2, %v883_v30  ;;  %v785_v31 = vpop.permute.xlu1 %784 }
 0x241   :  { %808 = vst.msk [vmem:[#allocation19 + $0x8] sm:$0xf] %vm806_vm3, %v785_v31 }
 0x243   :  { %v915_v32 = vpop.permute.xlu0 %914 }
 0x244   :  { %937 = vst.msk [vmem:[#allocation19 + $0xc] sm:$0xf] %vm806_vm3, %v915_v32  ;;  %v818_v33 = vpop.permute.xlu1 %817 }
 0x245   :  { %953 = vst.msk [vmem:[#allocation19 + $0xc] sm:$0xf] %vm839_vm4, %v1747_v3  ;;  %841 = vst.msk [vmem:[#allocation19 + $0x8] sm:$0xf] %vm839_vm4, %v818_v33 }
 0x247   :  { %v762_v34 = vpop.permute.xlu0 %761 }
 0x248   :  { %780 = vst.msk [vmem:[#allocation19 + $0x30] sm:$0xf] %vm773_vm2, %v762_v34  ;;  %v861_v35 = vpop.permute.xlu1 %860 }
 0x249   :  { %878 = vst.msk [vmem:[#allocation19 + $0x34] sm:$0xf] %vm716_vm1, %v861_v35 }
 0x24b   :  { %v795_v36 = vpop.permute.xlu0 %794 }
 0x24c   :  { %v893_v37 = vpop.permute.xlu1 %892  ;;  %813 = vst.msk [vmem:[#allocation19 + $0x30] sm:$0xf] %vm806_vm3, %v795_v36 }
 0x24d   :  { %910 = vst.msk [vmem:[#allocation19 + $0x34] sm:$0xf] %vm773_vm2, %v893_v37 }
 0x24f   :  { %v758_v38 = vpop.permute.xlu0 %757 }
 0x250   :  { %v925_v39 = vpop.permute.xlu1 %924  ;;  %778 = vst.msk [vmem:[#allocation19 + $0x20] sm:$0xf] %vm773_vm2, %v758_v38 }
 0x251   :  { %942 = vst.msk [vmem:[#allocation19 + $0x34] sm:$0xf] %vm806_vm3, %v925_v39 }
 0x252   :  { %958 = vst.msk [vmem:[#allocation19 + $0x34] sm:$0xf] %vm839_vm4, %v1762_v5 }
 0x253   :  { %v791_v40 = vpop.permute.xlu0 %790 }
 0x254   :  { %v857_v41 = vpop.permute.xlu1 %856  ;;  %811 = vst.msk [vmem:[#allocation19 + $0x20] sm:$0xf] %vm806_vm3, %v791_v40 }
 0x255   :  { %876 = vst.msk [vmem:[#allocation19 + $0x24] sm:$0xf] %vm716_vm1, %v857_v41 }
 0x257   :  { %v824_v42 = vpop.permute.xlu0 %823 }
 0x258   :  { %v889_v43 = vpop.permute.xlu1 %888  ;;  %844 = vst.msk [vmem:[#allocation19 + $0x20] sm:$0xf] %vm839_vm4, %v824_v42 }
 0x259   :  { %908 = vst.msk [vmem:[#allocation19 + $0x24] sm:$0xf] %vm773_vm2, %v889_v43 }
 0x25b   :  { %v863_v44 = vpop.permute.xlu0 %862 }
 0x25c   :  { %v921_v45 = vpop.permute.xlu1 %920  ;;  %879 = vst.msk [vmem:[#allocation19 + $0x3c] sm:$0xf] %vm716_vm1, %v863_v44 }
 0x25d   :  { %940 = vst.msk [vmem:[#allocation19 + $0x24] sm:$0xf] %vm806_vm3, %v921_v45 }
 0x25e   :  { %956 = vst.msk [vmem:[#allocation19 + $0x24] sm:$0xf] %vm839_vm4, %v1771_v7 }
 0x25f   :  { %v895_v46 = vpop.permute.xlu0 %894 }
 0x260   :  { %v764_v47 = vpop.permute.xlu1 %763  ;;  %911 = vst.msk [vmem:[#allocation19 + $0x3c] sm:$0xf] %vm773_vm2, %v895_v46 }
 0x261   :  { %781 = vst.msk [vmem:[#allocation19 + $0x38] sm:$0xf] %vm773_vm2, %v764_v47 }
 0x263   :  { %v927_v48 = vpop.permute.xlu0 %926 }
 0x264   :  { %943 = vst.msk [vmem:[#allocation19 + $0x3c] sm:$0xf] %vm806_vm3, %v927_v48  ;;  %v797_v49 = vpop.permute.xlu1 %796 }
 0x265   :  { %959 = vst.msk [vmem:[#allocation19 + $0x3c] sm:$0xf] %vm839_vm4, %v1784_v8 }
 0x266   :  { %814 = vst.msk [vmem:[#allocation19 + $0x38] sm:$0xf] %vm806_vm3, %v797_v49 }
 0x267   :  { %v859_v50 = vpop.permute.xlu0 %858 }
 0x268   :  { %v760_v51 = vpop.permute.xlu1 %759  ;;  %877 = vst.msk [vmem:[#allocation19 + $0x2c] sm:$0xf] %vm716_vm1, %v859_v50 }
 0x269   :  { %779 = vst.msk [vmem:[#allocation19 + $0x28] sm:$0xf] %vm773_vm2, %v760_v51 }
 0x26b   :  { %v891_v52 = vpop.permute.xlu0 %890 }
 0x26c   :  { %909 = vst.msk [vmem:[#allocation19 + $0x2c] sm:$0xf] %vm773_vm2, %v891_v52  ;;  %v793_v53 = vpop.permute.xlu1 %792 }
 0x26d   :  { %812 = vst.msk [vmem:[#allocation19 + $0x28] sm:$0xf] %vm806_vm3, %v793_v53 }
 0x26f   :  { %v923_v54 = vpop.permute.xlu0 %922 }
 0x270   :  { %941 = vst.msk [vmem:[#allocation19 + $0x2c] sm:$0xf] %vm806_vm3, %v923_v54  ;;  %v826_v55 = vpop.permute.xlu1 %825 }
 0x271   :  { %957 = vst.msk [vmem:[#allocation19 + $0x2c] sm:$0xf] %vm839_vm4, %v1792_v9  ;;  %845 = vst.msk [vmem:[#allocation19 + $0x28] sm:$0xf] %vm839_vm4, %v826_v55 }
 0x273   :  { %v828_v56 = vpop.permute.xlu0 %827 }
 0x274   :  { %846 = vst.msk [vmem:[#allocation19 + $0x30] sm:$0xf] %vm839_vm4, %v828_v56  ;;  %v830_v57 = vpop.permute.xlu1 %829 }
 0x275   :  { %847 = vst.msk [vmem:[#allocation19 + $0x38] sm:$0xf] %vm839_vm4, %v830_v57 }
 0x276   :  { %1416 = shalt.err (!%p1413_p0)
}
 0x277   :  { %s1417_s29 = scalar_lea.hbm %s1893_s10, 1024 }
 0x278   :  { %p1418_p1 = scmp.ne.s32.totalorder %s1893_s10, %s1417_s29  ;;  %p1421_p2 = scmp.lt.u32.totalorder %s1417_s29, %s1893_s10 }
 0x27a   :  { %p1423_p3 = pnand %p1421_p2, %p1418_p1 }
 0x27c   :  { %1426 = shalt.err (!%p1423_p3)
}
 0x27d   :  { %s1456_s13 = smov 128   ;;  %s1457_s7 = smov 8  }
 0x27e   :  { %971 = dma.vmem_to_hbm [thread:$0]  %s966_s0, 1024, %s1893_s10, [#allocation4], %s1456_s13, %s1456_s13, %s1457_s7  }
 0x27f   :  { %1439 = dma.done.wait [#allocation4], 1024  }
 0x280   :  { %1440 = vsyncadd [#allocation4], 4294966272 }
 0x281   :  { %975 = vsyncpa [#allocation3], 1 }
 0x282   :  { %976 = vsyncpa [#allocation6], 1 }
 0x283   :  { %977 = vsyncpa [#allocation9], 1 }
 0x284   :  { %978 = vsyncpa [#allocation12], 1 }
 0x285   :  { %979 = vsyncpa [#allocation15], 1 }
 0x286   :  { %980 = vsyncpa [#allocation18], 1 }
 0x287   :  { %981 = vsyncpa [#allocation4], 1 }

// kernel: rnn_forward.7
= control target key start
LH: loop header
LB: loop body
LE: loop exit
PB: predicated region body
PF: predicated region fallthrough
CT: control target
= control target key end

     0   :  { %9 = vsyncpa [#allocation3], 0  ;;  %s1392_s0 = inlined_call_operand.hbm [shape: bf16[8,8,256], index: 0, kind: input, shape index: {}]   ;;  %s1393_s1 = inlined_call_operand.hbm [shape: bf16[64,256], index: 1, kind: input, shape index: {}]   ;;  %s1394_s2 = inlined_call_operand.hbm [shape: bf16[64,8], index: 2, kind: input, shape index: {}]   ;;  %s1395_s3 = inlined_call_operand.hbm [shape: f32[1,8], index: 3, kind: input, shape index: {}]   ;;  %s1396_s4 = inlined_call_operand.hbm [shape: f32[8,8], index: 4, kind: output, shape index: {}]  }
   0x1   :  { %10 = vsyncpa [#allocation6], 0 }
   0x2   :  { %11 = vsyncpa [#allocation9], 0 }
   0x3   :  { %12 = vsyncpa [#allocation4], 0  ;;  %s1165_s15 = smov [#allocation5]   ;;  %s1166_s17 = smov [#allocation2]  }
   0x4   :  { %s30_s16 = sshll.u32 %s1165_s15, 4  ;;  %s18_s18 = sshll.u32 %s1166_s17, 4  ;;  %s31_s16 = int_to_ptr.vmem [resolvable:$true] %s30_s16  ;;  %s1202_s18 = int_to_ptr.vmem [resolvable:$true] %s18_s18 }
   0x5   :  { %s1047_s21 = scalar_lea.hbm %s1393_s1, 1024 }
   0x6   :  { %p1048_p0 = scmp.ne.s32.totalorder %s1393_s1, %s1047_s21  ;;  %p1051_p1 = scmp.lt.u32.totalorder %s1047_s21, %s1393_s1 }
   0x8   :  { %p1053_p2 = pnand %p1051_p1, %p1048_p0 }
   0xa   :  { %1056 = shalt.err (!%p1053_p2)
}
   0xb   :  { %s1057_s26 = scalar_lea.vmem %s31_s16, 1024  ;;  %p1062_p4 = scmp.lt.s32.totalorder %s31_s16, %s31_s16 }
   0xc   :  { %p1058_p3 = scmp.ne.s32.totalorder %s31_s16, %s1057_s26  ;;  %p1063_p5 = scmp.lt.s32.totalorder %s1057_s26, %s1057_s26 }
   0xe   :  { %p1064_p6 = por %p1063_p5, %p1062_p4 }
  0x10   :  { %p1065_p7 = pnand %p1064_p6, %p1058_p3 }
  0x12   :  { %1068 = shalt.err (!%p1065_p7)
}
  0x13   :  { %s1167_s27 = smov 128   ;;  %s1168_s28 = smov 8  }
  0x14   :  { %36 = dma.hbm_to_vmem [thread:$0]  %s1393_s1, 1024, %s31_s16, [#allocation6], %s1167_s27, %s1167_s27, %s1168_s28  }
  0x15   :  { %s1069_s7 = scalar_lea.hbm %s1392_s0, 1024 }
  0x16   :  { %p1070_p8 = scmp.ne.s32.totalorder %s1392_s0, %s1069_s7  ;;  %p1073_p9 = scmp.lt.u32.totalorder %s1069_s7, %s1392_s0 }
  0x18   :  { %p1075_p10 = pnand %p1073_p9, %p1070_p8 }
  0x1a   :  { %1078 = shalt.err (!%p1075_p10)
}
  0x1b   :  { %s1079_s12 = scalar_lea.vmem %s1202_s18, 1024  ;;  %p1084_p12 = scmp.lt.s32.totalorder %s1202_s18, %s1202_s18 }
  0x1c   :  { %p1080_p11 = scmp.ne.s32.totalorder %s1202_s18, %s1079_s12  ;;  %p1085_p13 = scmp.lt.s32.totalorder %s1079_s12, %s1079_s12 }
  0x1e   :  { %p1086_p0 = por %p1085_p13, %p1084_p12 }
  0x20   :  { %p1087_p1 = pnand %p1086_p0, %p1080_p11 }
  0x22   :  { %1090 = shalt.err (!%p1087_p1)
}
  0x23   :  { %24 = dma.hbm_to_vmem [thread:$0]  %s1392_s0, 1024, %s1202_s18, [#allocation3], %s1167_s27, %s1167_s27, %s1168_s28  }
  0x24   :  { %s1169_s14 = smov [#allocation7]   ;;  %s1091_s19 = scalar_lea.hbm %s1394_s2, 512 }
  0x25   :  { %s42_s15 = sshll.u32 %s1169_s14, 4  ;;  %p1092_p2 = scmp.ne.s32.totalorder %s1394_s2, %s1091_s19  ;;  %s43_s15 = int_to_ptr.vmem [resolvable:$true] %s42_s15 }
  0x26   :  { %p1095_p3 = scmp.lt.u32.totalorder %s1091_s19, %s1394_s2 }
  0x28   :  { %p1097_p4 = pnand %p1095_p3, %p1092_p2 }
  0x2a   :  { %1100 = shalt.err (!%p1097_p4)
}
  0x2b   :  { %s1101_s24 = scalar_lea.vmem %s43_s15, 512  ;;  %p1106_p6 = scmp.lt.s32.totalorder %s43_s15, %s43_s15 }
  0x2c   :  { %p1102_p5 = scmp.ne.s32.totalorder %s43_s15, %s1101_s24  ;;  %p1107_p7 = scmp.lt.s32.totalorder %s1101_s24, %s1101_s24 }
  0x2e   :  { %p1108_p8 = por %p1107_p7, %p1106_p6 }
  0x30   :  { %p1109_p9 = pnand %p1108_p8, %p1102_p5 }
  0x32   :  { %1112 = shalt.err (!%p1109_p9)
}
  0x33   :  { %s1170_s0 = smov 64   ;;  %s1171_s18 = smov 4  }
  0x34   :  { %48 = dma.hbm_to_vmem [thread:$0]  %s1394_s2, 512, %s43_s15, [#allocation6], %s1170_s0, %s1170_s0, %s1171_s18  }
  0x35   :  { %s1172_s27 = smov [#allocation8]   ;;  %s1113_s5 = scalar_lea.hbm %s1395_s3, 16 }
  0x36   :  { %s55_s28 = sshll.u32 %s1172_s27, 4  ;;  %p1114_p10 = scmp.ne.s32.totalorder %s1395_s3, %s1113_s5  ;;  %s56_s28 = int_to_ptr.vmem [resolvable:$true] %s55_s28 }
  0x37   :  { %p1117_p11 = scmp.lt.u32.totalorder %s1113_s5, %s1395_s3 }
  0x39   :  { %p1119_p12 = pnand %p1117_p11, %p1114_p10 }
  0x3b   :  { %1122 = shalt.err (!%p1119_p12)
}
  0x3c   :  { %s1123_s10 = scalar_lea.vmem %s56_s28, 16  ;;  %s1127_s2 = scalar_lea.vmem %s56_s28, 32 }
  0x3d   :  { %p1124_p13 = scmp.ne.s32.totalorder %s56_s28, %s1123_s10  ;;  %p1128_p0 = scmp.lt.s32.totalorder %s56_s28, %s56_s28 }
  0x3e   :  { %p1129_p1 = scmp.lt.s32.totalorder %s1127_s2, %s1123_s10 }
  0x40   :  { %p1130_p2 = por %p1129_p1, %p1128_p0 }
  0x42   :  { %p1131_p3 = pnand %p1130_p2, %p1124_p13 }
  0x44   :  { %1134 = shalt.err (!%p1131_p3)
}
  0x45   :  { %58 = dma.hbm_to_vmem [thread:$0]  %s1395_s3, 16, %s56_s28, [#allocation9]  }
  0x46   :  { %1157 = dma.done.wait [#allocation3], 1024  }
  0x47   :  { %1158 = vsyncadd [#allocation3], 4294966272 }
  0x48   :  { %1159 = dma.done.wait [#allocation6], 1536  }
  0x49   :  { %1160 = vsyncadd [#allocation6], 4294965760 }
  0x4a   :  { %1161 = dma.done.wait [#allocation9], 16  }
  0x4b   :  { %1162 = vsyncadd [#allocation9], 4294967280  ;;  %v1173_v0 = vmov 0   ;;  %v1261_v1 = vld [vmem:[#allocation5 + $0x4] ss:$8 sps:$4 sm:$0xff]   ;;  %vm123_vm0 = vcmask 523264  }
  0x4c   :  { %159 = vmatprep.mubr.bf16.mxu0 %v1173_v0  ;;  %240 = vmatprep.mubr.bf16.mxu1 %v1173_v0  ;;  %v1263_v2 = vld [vmem:[#allocation5] ss:$8 sps:$4 sm:$0xff]   ;;  %v1266_v3 = vld [vmem:[#allocation5 + $0x14] ss:$8 sps:$4 sm:$0xff]   ;;  %v1270_v4 = vld [vmem:[#allocation5 + $0x10] ss:$8 sps:$4 sm:$0xff]  }
  0x4d   :  { %127 = vmatprep.subr.bf16.mxu0 %v1261_v1  ;;  %208 = vmatprep.subr.bf16.mxu1 %v1261_v1  ;;  %v1274_v5 = vld [vmem:[#allocation5 + $0x24] ss:$8 sps:$4 sm:$0xff]   ;;  %v1277_v6 = vld [vmem:[#allocation5 + $0x20] ss:$8 sps:$4 sm:$0xff]   ;;  %v1282_v7 = vld [vmem:[#allocation5 + $0x34] ss:$8 sps:$4 sm:$0xff]  }
  0x4e   :  { %128 = vmatpush1.bf16.msra.mxu0 %v1263_v2  ;;  %209 = vmatpush1.bf16.msra.mxu1 %v1263_v2  ;;  %v1286_v8 = vld [vmem:[#allocation5 + $0x30] ss:$8 sps:$4 sm:$0xff]   ;;  %v80_v9 = vld [vmem:[#allocation2] sm:$0xff]  ;;  %v201_v36 = vld [vmem:[#allocation2 + $0x8] sm:$0xff]  ;;  %vm1175_vm1 = vmmov 0   ;;  %s1176_s3 = smov [#allocation10]  }
  0x4f   :  { %129 = vmatprep.subr.bf16.mxu0 %v1266_v3  ;;  %210 = vmatprep.subr.bf16.mxu1 %v1266_v3  ;;  %v82_v10 = vunpack.c.h.bf16 %v80_v9  ;;  %v81_v17 = vunpack.c.l.bf16 %v80_v9  ;;  %v203_v37 = vunpack.c.h.bf16 %v201_v36  ;;  %v202_v44 = vunpack.c.l.bf16 %v201_v36  ;;  %v282_v63 = vld [vmem:[#allocation2 + $0x10] sm:$0xff]  ;;  %s858_s1 = sshll.u32 %s1176_s3, 4  ;;  %s859_s1 = int_to_ptr.vmem [resolvable:$true] %s858_s1 }
  0x50   :  { %v284_v9 = vunpack.c.h.bf16 %v282_v63  ;;  %vm850_vm2 = vcmask 64512   ;;  %s1135_s13 = scalar_lea.vmem %s859_s1, 128  ;;  %p1140_p5 = scmp.lt.s32.totalorder %s859_s1, %s859_s1 }
  0x51   :  { %p1136_p4 = scmp.ne.s32.totalorder %s859_s1, %s1135_s13  ;;  %p1141_p6 = scmp.lt.s32.totalorder %s1135_s13, %s1135_s13 }
  0x52   :  { %130 = vmatpush1.bf16.msra.mxu0 %v1270_v4  ;;  %211 = vmatpush1.bf16.msra.mxu1 %v1270_v4 }
  0x53   :  { %131 = vmatprep.subr.bf16.mxu0 %v1274_v5  ;;  %212 = vmatprep.subr.bf16.mxu1 %v1274_v5  ;;  %p1142_p7 = por %p1141_p6, %p1140_p5 }
  0x55   :  { %p1143_p8 = pnand %p1142_p7, %p1136_p4 }
  0x56   :  { %132 = vmatpush1.bf16.msra.mxu0 %v1277_v6  ;;  %213 = vmatpush1.bf16.msra.mxu1 %v1277_v6 }
  0x57   :  { %133 = vmatprep.subr.bf16.mxu0 %v1282_v7  ;;  %214 = vmatprep.subr.bf16.mxu1 %v1282_v7 }
  0x5a   :  { %134 = vmatpush1.bf16.msra.mxu0 %v1286_v8  ;;  %215 = vmatpush1.bf16.msra.mxu1 %v1286_v8 }
  0x5b   :  { %289 = vmatprep.subr.bf16.mxu0 %v1261_v1  ;;  %370 = vmatprep.subr.bf16.mxu1 %v1261_v1 }
  0x5d   :  { %160 = vmatmul.mubr.bf16.vlgmr.msra.gmra.mrb[0].mxu0 %v1173_v0 }
  0x5e   :  { %290 = vmatpush1.bf16.msra.mxu0 %v1263_v2  ;;  %321 = vmatprep.mubr.bf16.mxu0 %v1173_v0 }
  0x5f   :  { %291 = vmatprep.subr.bf16.mxu0 %v1266_v3 }
  0x62   :  { %292 = vmatpush1.bf16.msra.mxu0 %v1270_v4 }
  0x63   :  { %293 = vmatprep.subr.bf16.mxu0 %v1274_v5 }
  0x66   :  { %294 = vmatpush1.bf16.msra.mxu0 %v1277_v6 }
  0x67   :  { %295 = vmatprep.subr.bf16.mxu0 %v1282_v7 }
  0x6a   :  { %296 = vmatpush1.bf16.msra.mxu0 %v1286_v8 }
  0x6b   :  { %451 = vmatprep.subr.bf16.mxu0 %v1261_v1 }
 0x130   :  { %v161_v11 = vpop.f32.mrb[0].mxu0 }
 0x131   :  { %v163_v12 = vpop.f32.mrb[1].mxu0  ;;  %v168_v18 = vadd.f32 %v161_v11, %v81_v17 }
 0x132   :  { %v169_v13 = vadd.f32 %v163_v12, %v82_v10  ;;  %v165_v14 = vpop.f32.mrb[2].mxu0 }
 0x133   :  { %v166_v15 = vpop.f32.mrb[3].mxu0  ;;  %v877_v19 = vmul.f32 -1.442695, %v168_v18 }
 0x134   :  { %951 = vtanh.f32 %v169_v13  ;;  %v878_v29 = vmul.f32 -1.442695, %v169_v13 }
 0x135   :  { %953 = vpow2.f32 %v877_v19 }
 0x13e   :  { %v952_v16 = vpop.eup %951 }
 0x13f   :  { %185 = vrot.lane.b32.xlu0 %v952_v16, %s1170_s0  ;;  %v954_v20 = vpop.eup %953  ;;  %v283_v16 = vunpack.c.l.bf16 %v282_v63 }
 0x140   :  { %v176_v21 = vadd.f32 1.0, %v954_v20 }
 0x142   :  { %955 = vrcp.f32 %v176_v21 }
 0x14c   :  { %v956_v22 = vpop.eup %955 }
 0x14d   :  { %v183_v25 = vmul.f32 0.0, %v956_v22 }
 0x1b1   :  { %v186_v23 = vpop.permute.xlu0 %185 }
 0x1b2   :  { %v188_v24 = vmul.f32 %v956_v22, %v186_v23 }
 0x1b4   :  { %190 = vrot.lane.b32.xlu0 %v188_v24, %s1170_s0 }
 0x226   :  { %v191_v26 = vpop.permute.xlu0 %190 }
 0x227   :  { %v193_v27 = vadd.f32 %v191_v26, %v183_v25 }
 0x229   :  { %957 = vtanh.f32 %v193_v27 }
 0x22a   :  { %959 = vpow2.f32 %v878_v29 }
 0x233   :  { %v958_v28 = vpop.eup %957 }
 0x234   :  { %196 = vrot.lane.b32.xlu1 %v958_v28, %s1170_s0  ;;  %v960_v30 = vpop.eup %959 }
 0x235   :  { %v177_v31 = vadd.f32 1.0, %v960_v30 }
 0x237   :  { %961 = vrcp.f32 %v177_v31 }
 0x241   :  { %v962_v32 = vpop.eup %961 }
 0x2a6   :  { %v197_v33 = vpop.permute.xlu1 %196 }
 0x2a7   :  { %v199_v34 = vmul.f32 %v962_v32, %v197_v33 }
 0x2a9   :  { %v204_v35 = vpack.c.bf16 %v199_v34, %v199_v34 }
 0x2ab   :  { %879 = vmatmul.mubr.msk.bf16.vlgmr.msra.gmra.mrb[0].mxu1 %vm123_vm0, %v204_v35  ;;  %v363_v35 = vld [vmem:[#allocation2 + $0x18] sm:$0xff] }
 0x2ac   :  { %371 = vmatpush1.bf16.msra.mxu1 %v1263_v2  ;;  %402 = vmatprep.mubr.bf16.mxu1 %v1173_v0  ;;  %v365_v36 = vunpack.c.h.bf16 %v363_v35 }
 0x2ad   :  { %372 = vmatprep.subr.bf16.mxu1 %v1266_v3 }
 0x2b0   :  { %373 = vmatpush1.bf16.msra.mxu1 %v1270_v4 }
 0x2b1   :  { %374 = vmatprep.subr.bf16.mxu1 %v1274_v5 }
 0x2b4   :  { %375 = vmatpush1.bf16.msra.mxu1 %v1277_v6 }
 0x2b5   :  { %376 = vmatprep.subr.bf16.mxu1 %v1282_v7 }
 0x2b8   :  { %377 = vmatpush1.bf16.msra.mxu1 %v1286_v8 }
 0x2b9   :  { %532 = vmatprep.subr.bf16.mxu1 %v1261_v1 }
 0x37e   :  { %v242_v38 = vpop.f32.mrb[0].mxu1 }
 0x37f   :  { %v244_v39 = vpop.f32.mrb[1].mxu1  ;;  %v249_v45 = vadd.f32 %v242_v38, %v202_v44 }
 0x380   :  { %v250_v40 = vadd.f32 %v244_v39, %v203_v37  ;;  %v246_v41 = vpop.f32.mrb[2].mxu1 }
 0x381   :  { %v247_v42 = vpop.f32.mrb[3].mxu1  ;;  %v880_v46 = vmul.f32 -1.442695, %v249_v45 }
 0x382   :  { %963 = vtanh.f32 %v250_v40  ;;  %v881_v56 = vmul.f32 -1.442695, %v250_v40 }
 0x383   :  { %965 = vpow2.f32 %v880_v46 }
 0x38c   :  { %v964_v43 = vpop.eup %963 }
 0x38d   :  { %266 = vrot.lane.b32.xlu1 %v964_v43, %s1170_s0  ;;  %v966_v47 = vpop.eup %965  ;;  %v364_v43 = vunpack.c.l.bf16 %v363_v35 }
 0x38e   :  { %v257_v48 = vadd.f32 1.0, %v966_v47 }
 0x390   :  { %967 = vrcp.f32 %v257_v48 }
 0x39a   :  { %v968_v49 = vpop.eup %967 }
 0x39b   :  { %v264_v52 = vmul.f32 %v968_v49, %v193_v27 }
 0x3ff   :  { %v267_v50 = vpop.permute.xlu1 %266 }
 0x400   :  { %v269_v51 = vmul.f32 %v968_v49, %v267_v50 }
 0x402   :  { %271 = vrot.lane.b32.xlu0 %v269_v51, %s1170_s0 }
 0x474   :  { %v272_v53 = vpop.permute.xlu0 %271 }
 0x475   :  { %v274_v54 = vadd.f32 %v272_v53, %v264_v52 }
 0x477   :  { %969 = vtanh.f32 %v274_v54 }
 0x478   :  { %971 = vpow2.f32 %v881_v56 }
 0x481   :  { %v970_v55 = vpop.eup %969 }
 0x482   :  { %277 = vrot.lane.b32.xlu1 %v970_v55, %s1170_s0  ;;  %v972_v57 = vpop.eup %971 }
 0x483   :  { %v258_v58 = vadd.f32 1.0, %v972_v57 }
 0x485   :  { %973 = vrcp.f32 %v258_v58 }
 0x48f   :  { %v974_v59 = vpop.eup %973 }
 0x4f4   :  { %v278_v60 = vpop.permute.xlu1 %277 }
 0x4f5   :  { %v280_v61 = vmul.f32 %v974_v59, %v278_v60 }
 0x4f7   :  { %v285_v62 = vpack.c.bf16 %v280_v61, %v280_v61  ;;  %v444_v61 = vld [vmem:[#allocation2 + $0x20] sm:$0xff] }
 0x4f9   :  { %882 = vmatmul.mubr.msk.bf16.vlgmr.msra.gmra.mrb[4].mxu0 %vm123_vm0, %v285_v62  ;;  %v446_v62 = vunpack.c.h.bf16 %v444_v61 }
 0x4fa   :  { %452 = vmatpush1.bf16.msra.mxu0 %v1263_v2  ;;  %483 = vmatprep.mubr.bf16.mxu0 %v1173_v0 }
 0x4fb   :  { %453 = vmatprep.subr.bf16.mxu0 %v1266_v3 }
 0x4fe   :  { %454 = vmatpush1.bf16.msra.mxu0 %v1270_v4 }
 0x4ff   :  { %455 = vmatprep.subr.bf16.mxu0 %v1274_v5 }
 0x502   :  { %456 = vmatpush1.bf16.msra.mxu0 %v1277_v6 }
 0x503   :  { %457 = vmatprep.subr.bf16.mxu0 %v1282_v7 }
 0x506   :  { %458 = vmatpush1.bf16.msra.mxu0 %v1286_v8 }
 0x507   :  { %613 = vmatprep.subr.bf16.mxu0 %v1261_v1 }
 0x5cc   :  { %v323_v10 = vpop.f32.mrb[4].mxu0 }
 0x5cd   :  { %v325_v11 = vpop.f32.mrb[5].mxu0  ;;  %v330_v17 = vadd.f32 %v323_v10, %v283_v16 }
 0x5ce   :  { %v331_v12 = vadd.f32 %v325_v11, %v284_v9  ;;  %v327_v13 = vpop.f32.mrb[6].mxu0 }
 0x5cf   :  { %v328_v14 = vpop.f32.mrb[7].mxu0  ;;  %v883_v18 = vmul.f32 -1.442695, %v330_v17 }
 0x5d0   :  { %975 = vtanh.f32 %v331_v12  ;;  %v884_v28 = vmul.f32 -1.442695, %v331_v12  ;;  %v445_v14 = vunpack.c.l.bf16 %v444_v61 }
 0x5d1   :  { %977 = vpow2.f32 %v883_v18 }
 0x5da   :  { %v976_v15 = vpop.eup %975 }
 0x5db   :  { %347 = vrot.lane.b32.xlu0 %v976_v15, %s1170_s0  ;;  %v978_v19 = vpop.eup %977 }
 0x5dc   :  { %v338_v20 = vadd.f32 1.0, %v978_v19 }
 0x5de   :  { %979 = vrcp.f32 %v338_v20 }
 0x5e8   :  { %v980_v21 = vpop.eup %979 }
 0x5e9   :  { %v345_v24 = vmul.f32 %v980_v21, %v274_v54 }
 0x64d   :  { %v348_v22 = vpop.permute.xlu0 %347 }
 0x64e   :  { %v350_v23 = vmul.f32 %v980_v21, %v348_v22 }
 0x650   :  { %352 = vrot.lane.b32.xlu1 %v350_v23, %s1170_s0 }
 0x6c2   :  { %v353_v25 = vpop.permute.xlu1 %352 }
 0x6c3   :  { %v355_v26 = vadd.f32 %v353_v25, %v345_v24 }
 0x6c5   :  { %981 = vtanh.f32 %v355_v26 }
 0x6c6   :  { %983 = vpow2.f32 %v884_v28 }
 0x6cf   :  { %v982_v27 = vpop.eup %981 }
 0x6d0   :  { %358 = vrot.lane.b32.xlu0 %v982_v27, %s1170_s0  ;;  %v984_v29 = vpop.eup %983 }
 0x6d1   :  { %v339_v30 = vadd.f32 1.0, %v984_v29 }
 0x6d3   :  { %985 = vrcp.f32 %v339_v30 }
 0x6dd   :  { %v986_v31 = vpop.eup %985 }
 0x742   :  { %v359_v32 = vpop.permute.xlu0 %358 }
 0x743   :  { %v361_v33 = vmul.f32 %v986_v31, %v359_v32 }
 0x745   :  { %v366_v34 = vpack.c.bf16 %v361_v33, %v361_v33  ;;  %v525_v33 = vld [vmem:[#allocation2 + $0x28] sm:$0xff] }
 0x747   :  { %885 = vmatmul.mubr.msk.bf16.vlgmr.msra.gmra.mrb[4].mxu1 %vm123_vm0, %v366_v34  ;;  %v527_v34 = vunpack.c.h.bf16 %v525_v33 }
 0x748   :  { %533 = vmatpush1.bf16.msra.mxu1 %v1263_v2  ;;  %564 = vmatprep.mubr.bf16.mxu1 %v1173_v0 }
 0x749   :  { %534 = vmatprep.subr.bf16.mxu1 %v1266_v3 }
 0x74c   :  { %535 = vmatpush1.bf16.msra.mxu1 %v1270_v4 }
 0x74d   :  { %536 = vmatprep.subr.bf16.mxu1 %v1274_v5 }
 0x750   :  { %537 = vmatpush1.bf16.msra.mxu1 %v1277_v6 }
 0x751   :  { %538 = vmatprep.subr.bf16.mxu1 %v1282_v7 }
 0x754   :  { %539 = vmatpush1.bf16.msra.mxu1 %v1286_v8 }
 0x755   :  { %694 = vmatprep.subr.bf16.mxu1 %v1261_v1 }
 0x81a   :  { %v404_v37 = vpop.f32.mrb[4].mxu1 }
 0x81b   :  { %v406_v38 = vpop.f32.mrb[5].mxu1  ;;  %v411_v44 = vadd.f32 %v404_v37, %v364_v43 }
 0x81c   :  { %v412_v39 = vadd.f32 %v406_v38, %v365_v36  ;;  %v408_v40 = vpop.f32.mrb[6].mxu1 }
 0x81d   :  { %v409_v41 = vpop.f32.mrb[7].mxu1  ;;  %v886_v45 = vmul.f32 -1.442695, %v411_v44 }
 0x81e   :  { %987 = vtanh.f32 %v412_v39  ;;  %v887_v54 = vmul.f32 -1.442695, %v412_v39 }
 0x81f   :  { %989 = vpow2.f32 %v886_v45 }
 0x828   :  { %v988_v42 = vpop.eup %987 }
 0x829   :  { %428 = vrot.lane.b32.xlu1 %v988_v42, %s1170_s0  ;;  %v990_v46 = vpop.eup %989 }
 0x82a   :  { %v419_v47 = vadd.f32 1.0, %v990_v46 }
 0x82c   :  { %991 = vrcp.f32 %v419_v47 }
 0x836   :  { %v992_v48 = vpop.eup %991 }
 0x837   :  { %v426_v50 = vmul.f32 %v992_v48, %v355_v26 }
 0x89b   :  { %v429_v1 = vpop.permute.xlu1 %428 }
 0x89c   :  { %v431_v49 = vmul.f32 %v992_v48, %v429_v1 }
 0x89e   :  { %433 = vrot.lane.b32.xlu0 %v431_v49, %s1170_s0 }
 0x910   :  { %v434_v51 = vpop.permute.xlu0 %433 }
 0x911   :  { %v436_v52 = vadd.f32 %v434_v51, %v426_v50  ;;  %v606_v51 = vld [vmem:[#allocation2 + $0x30] sm:$0xff] }
 0x913   :  { %993 = vtanh.f32 %v436_v52 }
 0x914   :  { %995 = vpow2.f32 %v887_v54 }
 0x91d   :  { %v994_v53 = vpop.eup %993 }
 0x91e   :  { %439 = vrot.lane.b32.xlu1 %v994_v53, %s1170_s0  ;;  %v996_v55 = vpop.eup %995 }
 0x91f   :  { %v420_v56 = vadd.f32 1.0, %v996_v55 }
 0x921   :  { %997 = vrcp.f32 %v420_v56 }
 0x92b   :  { %v998_v57 = vpop.eup %997 }
 0x990   :  { %v440_v58 = vpop.permute.xlu1 %439 }
 0x991   :  { %v442_v59 = vmul.f32 %v998_v57, %v440_v58 }
 0x993   :  { %v447_v60 = vpack.c.bf16 %v442_v59, %v442_v59  ;;  %v607_v59 = vunpack.c.l.bf16 %v606_v51 }
 0x995   :  { %888 = vmatmul.mubr.msk.bf16.vlgmr.msra.gmra.mrb[8].mxu0 %vm123_vm0, %v447_v60 }
 0x996   :  { %614 = vmatpush1.bf16.msra.mxu0 %v1263_v2  ;;  %645 = vmatprep.mubr.bf16.mxu0 %v1173_v0 }
 0x997   :  { %615 = vmatprep.subr.bf16.mxu0 %v1266_v3 }
 0x99a   :  { %616 = vmatpush1.bf16.msra.mxu0 %v1270_v4 }
 0x99b   :  { %617 = vmatprep.subr.bf16.mxu0 %v1274_v5 }
 0x99e   :  { %618 = vmatpush1.bf16.msra.mxu0 %v1277_v6 }
 0x99f   :  { %619 = vmatprep.subr.bf16.mxu0 %v1282_v7 }
 0x9a2   :  { %620 = vmatpush1.bf16.msra.mxu0 %v1286_v8 }
 0xa68   :  { %v485_v63 = vpop.f32.mrb[8].mxu0 }
 0xa69   :  { %v487_v9 = vpop.f32.mrb[9].mxu0  ;;  %v492_v15 = vadd.f32 %v485_v63, %v445_v14 }
 0xa6a   :  { %v493_v10 = vadd.f32 %v487_v9, %v446_v62  ;;  %v489_v11 = vpop.f32.mrb[10].mxu0 }
 0xa6b   :  { %v490_v12 = vpop.f32.mrb[11].mxu0  ;;  %v889_v16 = vmul.f32 -1.442695, %v492_v15 }
 0xa6c   :  { %999 = vtanh.f32 %v493_v10  ;;  %v890_v26 = vmul.f32 -1.442695, %v493_v10 }
 0xa6d   :  { %1001 = vpow2.f32 %v889_v16 }
 0xa76   :  { %v1000_v13 = vpop.eup %999 }
 0xa77   :  { %509 = vrot.lane.b32.xlu0 %v1000_v13, %s1170_s0  ;;  %v1002_v17 = vpop.eup %1001 }
 0xa78   :  { %v500_v18 = vadd.f32 1.0, %v1002_v17 }
 0xa7a   :  { %1003 = vrcp.f32 %v500_v18 }
 0xa84   :  { %v1004_v19 = vpop.eup %1003 }
 0xa85   :  { %v507_v22 = vmul.f32 %v1004_v19, %v436_v52  ;;  %v608_v52 = vunpack.c.h.bf16 %v606_v51 }
 0xae9   :  { %v510_v20 = vpop.permute.xlu0 %509 }
 0xaea   :  { %v512_v21 = vmul.f32 %v1004_v19, %v510_v20 }
 0xaec   :  { %514 = vrot.lane.b32.xlu1 %v512_v21, %s1170_s0 }
 0xb5e   :  { %v515_v23 = vpop.permute.xlu1 %514 }
 0xb5f   :  { %v517_v24 = vadd.f32 %v515_v23, %v507_v22  ;;  %v687_v23 = vld [vmem:[#allocation2 + $0x38] sm:$0xff] }
 0xb61   :  { %1005 = vtanh.f32 %v517_v24 }
 0xb62   :  { %1007 = vpow2.f32 %v890_v26 }
 0xb6b   :  { %v1006_v25 = vpop.eup %1005 }
 0xb6c   :  { %520 = vrot.lane.b32.xlu0 %v1006_v25, %s1170_s0  ;;  %v1008_v27 = vpop.eup %1007 }
 0xb6d   :  { %v501_v28 = vadd.f32 1.0, %v1008_v27 }
 0xb6f   :  { %1009 = vrcp.f32 %v501_v28 }
 0xb79   :  { %v1010_v29 = vpop.eup %1009 }
 0xbde   :  { %v521_v30 = vpop.permute.xlu0 %520 }
 0xbdf   :  { %v523_v31 = vmul.f32 %v1010_v29, %v521_v30 }
 0xbe1   :  { %v528_v32 = vpack.c.bf16 %v523_v31, %v523_v31  ;;  %v688_v31 = vunpack.c.l.bf16 %v687_v23 }
 0xbe3   :  { %891 = vmatmul.mubr.msk.bf16.vlgmr.msra.gmra.mrb[8].mxu1 %vm123_vm0, %v528_v32 }
 0xbe4   :  { %695 = vmatpush1.bf16.msra.mxu1 %v1263_v2  ;;  %726 = vmatprep.mubr.bf16.mxu1 %v1173_v0 }
 0xbe5   :  { %696 = vmatprep.subr.bf16.mxu1 %v1266_v3  ;;  %v526_v3 = vunpack.c.l.bf16 %v525_v33 }
 0xbe8   :  { %697 = vmatpush1.bf16.msra.mxu1 %v1270_v4 }
 0xbe9   :  { %698 = vmatprep.subr.bf16.mxu1 %v1274_v5 }
 0xbec   :  { %699 = vmatpush1.bf16.msra.mxu1 %v1277_v6 }
 0xbed   :  { %700 = vmatprep.subr.bf16.mxu1 %v1282_v7 }
 0xbf0   :  { %701 = vmatpush1.bf16.msra.mxu1 %v1286_v8 }
 0xcb6   :  { %v566_v35 = vpop.f32.mrb[8].mxu1 }
 0xcb7   :  { %v568_v36 = vpop.f32.mrb[9].mxu1  ;;  %v573_v4 = vadd.f32 %v566_v35, %v526_v3  ;;  %v948_v3 = vld [vmem:[#allocation7 + $0x8] sm:$0xff]  }
 0xcb8   :  { %v574_v37 = vadd.f32 %v568_v36, %v527_v34  ;;  %v570_v2 = vpop.f32.mrb[10].mxu1 }
 0xcb9   :  { %v571_v38 = vpop.f32.mrb[11].mxu1  ;;  %v892_v5 = vmul.f32 -1.442695, %v573_v4  ;;  %v949_v4 = vld [vmem:[#allocation7 + $0x10] sm:$0xff]  }
 0xcba   :  { %1011 = vtanh.f32 %v574_v37  ;;  %v893_v45 = vmul.f32 -1.442695, %v574_v37  ;;  %v947_v38 = vld [vmem:[#allocation7] sm:$0xff]  }
 0xcbb   :  { %1013 = vpow2.f32 %v892_v5 }
 0xcc4   :  { %v1012_v0 = vpop.eup %1011 }
 0xcc5   :  { %590 = vrot.lane.b32.xlu1 %v1012_v0, %s1170_s0  ;;  %v1014_v6 = vpop.eup %1013  ;;  %v1174_v0 = vmov 0.0  }
 0xcc6   :  { %v581_v39 = vadd.f32 1.0, %v1014_v6  ;;  %911 = vmatprep.subr.bf16.mxu0 %v1174_v0 }
 0xcc8   :  { %1015 = vrcp.f32 %v581_v39  ;;  %v950_v39 = vld [vmem:[#allocation7 + $0x18] sm:$0xff]  }
 0xcd2   :  { %v1016_v7 = vpop.eup %1015 }
 0xcd3   :  { %v588_v41 = vmul.f32 %v1016_v7, %v517_v24  ;;  %v689_v24 = vunpack.c.h.bf16 %v687_v23 }
 0xd37   :  { %v591_v8 = vpop.permute.xlu1 %590 }
 0xd38   :  { %v593_v40 = vmul.f32 %v1016_v7, %v591_v8 }
 0xd3a   :  { %595 = vrot.lane.b32.xlu0 %v593_v40, %s1170_s0 }
 0xdac   :  { %v596_v42 = vpop.permute.xlu0 %595 }
 0xdad   :  { %v598_v43 = vadd.f32 %v596_v42, %v588_v41 }
 0xdaf   :  { %1017 = vtanh.f32 %v598_v43 }
 0xdb0   :  { %1019 = vpow2.f32 %v893_v45 }
 0xdb9   :  { %v1018_v44 = vpop.eup %1017 }
 0xdba   :  { %601 = vrot.lane.b32.xlu1 %v1018_v44, %s1170_s0  ;;  %v1020_v46 = vpop.eup %1019 }
 0xdbb   :  { %v582_v47 = vadd.f32 1.0, %v1020_v46 }
 0xdbd   :  { %1021 = vrcp.f32 %v582_v47  ;;  %v900_v47 = vld [vmem:[#allocation8] ss:$0 sm:$0xff] }
 0xdc7   :  { %v1022_v48 = vpop.eup %1021 }
 0xe2c   :  { %v602_v1 = vpop.permute.xlu1 %601 }
 0xe2d   :  { %v604_v49 = vmul.f32 %v1022_v48, %v602_v1 }
 0xe2f   :  { %v609_v50 = vpack.c.bf16 %v604_v49, %v604_v49 }
 0xe31   :  { %894 = vmatmul.mubr.msk.bf16.vlgmr.msra.gmra.mrb[12].mxu0 %vm123_vm0, %v609_v50 }
 0xe32   :  { %912 = vmatpush3.bf16.msra.mxu0 %v947_v38  ;;  %919 = vmatprep.mubr.msk.bf16.mxu0 %vm1175_vm1, %v1174_v0 }
 0xe33   :  { %913 = vmatprep.subr.bf16.mxu0 %v1174_v0 }
 0xe36   :  { %914 = vmatpush3.bf16.msra.mxu0 %v948_v3 }
 0xe37   :  { %915 = vmatprep.subr.bf16.mxu0 %v1174_v0 }
 0xe3a   :  { %916 = vmatpush3.bf16.msra.mxu0 %v949_v4 }
 0xe3b   :  { %917 = vmatprep.subr.bf16.mxu0 %v1174_v0 }
 0xe3e   :  { %918 = vmatpush3.bf16.msra.mxu0 %v950_v39 }
 0xf04   :  { %v647_v53 = vpop.f32.mrb[12].mxu0 }
 0xf05   :  { %v649_v54 = vpop.f32.mrb[13].mxu0  ;;  %v654_v60 = vadd.f32 %v647_v53, %v607_v59 }
 0xf06   :  { %v655_v55 = vadd.f32 %v649_v54, %v608_v52  ;;  %v651_v56 = vpop.f32.mrb[14].mxu0 }
 0xf07   :  { %v652_v57 = vpop.f32.mrb[15].mxu0  ;;  %v895_v61 = vmul.f32 -1.442695, %v654_v60 }
 0xf08   :  { %1023 = vtanh.f32 %v655_v55  ;;  %v896_v16 = vmul.f32 -1.442695, %v655_v55 }
 0xf09   :  { %1025 = vpow2.f32 %v895_v61 }
 0xf12   :  { %v1024_v58 = vpop.eup %1023 }
 0xf13   :  { %671 = vrot.lane.b32.xlu0 %v1024_v58, %s1170_s0  ;;  %v1026_v62 = vpop.eup %1025 }
 0xf14   :  { %v662_v63 = vadd.f32 1.0, %v1026_v62 }
 0xf16   :  { %1027 = vrcp.f32 %v662_v63 }
 0xf20   :  { %v1028_v9 = vpop.eup %1027 }
 0xf21   :  { %v669_v12 = vmul.f32 %v1028_v9, %v598_v43 }
 0xf85   :  { %v672_v10 = vpop.permute.xlu0 %671 }
 0xf86   :  { %v674_v11 = vmul.f32 %v1028_v9, %v672_v10 }
 0xf88   :  { %676 = vrot.lane.b32.xlu1 %v674_v11, %s1170_s0 }
 0xffa   :  { %v677_v13 = vpop.permute.xlu1 %676 }
 0xffb   :  { %v679_v14 = vadd.f32 %v677_v13, %v669_v12 }
 0xffd   :  { %1029 = vtanh.f32 %v679_v14 }
 0xffe   :  { %1031 = vpow2.f32 %v896_v16 }
0x1007   :  { %v1030_v15 = vpop.eup %1029 }
0x1008   :  { %682 = vrot.lane.b32.xlu0 %v1030_v15, %s1170_s0  ;;  %v1032_v17 = vpop.eup %1031 }
0x1009   :  { %v663_v18 = vadd.f32 1.0, %v1032_v17 }
0x100b   :  { %1033 = vrcp.f32 %v663_v18 }
0x1015   :  { %v1034_v19 = vpop.eup %1033 }
0x107a   :  { %v683_v20 = vpop.permute.xlu0 %682 }
0x107b   :  { %v685_v21 = vmul.f32 %v1034_v19, %v683_v20 }
0x107d   :  { %v690_v22 = vpack.c.bf16 %v685_v21, %v685_v21 }
0x107f   :  { %897 = vmatmul.mubr.msk.bf16.vlgmr.msra.gmra.mrb[12].mxu1 %vm123_vm0, %v690_v22 }
0x1152   :  { %v728_v25 = vpop.f32.mrb[12].mxu1 }
0x1153   :  { %v730_v26 = vpop.f32.mrb[13].mxu1  ;;  %v735_v32 = vadd.f32 %v728_v25, %v688_v31 }
0x1154   :  { %v736_v27 = vadd.f32 %v730_v26, %v689_v24  ;;  %v732_v28 = vpop.f32.mrb[14].mxu1 }
0x1155   :  { %v733_v29 = vpop.f32.mrb[15].mxu1  ;;  %v898_v33 = vmul.f32 -1.442695, %v735_v32 }
0x1156   :  { %1035 = vtanh.f32 %v736_v27  ;;  %v899_v40 = vmul.f32 -1.442695, %v736_v27 }
0x1157   :  { %1037 = vpow2.f32 %v898_v33 }
0x1160   :  { %v1036_v30 = vpop.eup %1035 }
0x1161   :  { %752 = vrot.lane.b32.xlu1 %v1036_v30, %s1170_s0  ;;  %v1038_v34 = vpop.eup %1037 }
0x1162   :  { %v743_v35 = vadd.f32 1.0, %v1038_v34 }
0x1164   :  { %1039 = vrcp.f32 %v743_v35 }
0x116e   :  { %v1040_v36 = vpop.eup %1039 }
0x116f   :  { %v750_v5 = vmul.f32 %v1040_v36, %v679_v14 }
0x11d3   :  { %v753_v37 = vpop.permute.xlu1 %752 }
0x11d4   :  { %v755_v2 = vmul.f32 %v1040_v36, %v753_v37 }
0x11d6   :  { %757 = vrot.lane.b32.xlu0 %v755_v2, %s1170_s0 }
0x1248   :  { %v758_v6 = vpop.permute.xlu0 %757 }
0x1249   :  { %v760_v7 = vadd.f32 %v758_v6, %v750_v5 }
0x124b   :  { %1041 = vtanh.f32 %v760_v7 }
0x124c   :  { %1043 = vpow2.f32 %v899_v40 }
0x1255   :  { %v1042_v8 = vpop.eup %1041 }
0x1256   :  { %763 = vrot.lane.b32.xlu1 %v1042_v8, %s1170_s0  ;;  %v1044_v41 = vpop.eup %1043 }
0x1257   :  { %v744_v42 = vadd.f32 1.0, %v1044_v41 }
0x1259   :  { %1045 = vrcp.f32 %v744_v42 }
0x1263   :  { %v1046_v43 = vpop.eup %1045 }
0x12c8   :  { %v764_v44 = vpop.permute.xlu1 %763 }
0x12c9   :  { %v766_v45 = vmul.f32 %v1046_v43, %v764_v44 }
0x12cb   :  { %v767_v46 = vpack.c.bf16 %v766_v45, %v766_v45 }
0x12cd   :  { %920 = vmatmul.mubr.msk.bf16.vlgmr.msra.gmra.mrb[16].mxu0 %vm123_vm0, %v767_v46 }
0x13a0   :  { %v844_v48 = vpop.f32.mrb[16].mxu0 }
0x13a1   :  { %v845_v1 = vadd.f32 %v900_v47, %v844_v48  ;;  %v921_v49 = vpop.f32.mrb[17].mxu0 }
0x13a2   :  { %v847_v50 = vpop.f32.mrb[18].mxu0 }
0x13a3   :  { %v922_v51 = vpop.f32.mrb[19].mxu0  ;;  %851 = vst.msk [vmem:[#allocation10] sm:$0xff] %vm850_vm2, %v845_v1 }
0x13a4   :  { %1146 = shalt.err (!%p1143_p8)
}
0x13a5   :  { %s1147_s16 = scalar_lea.hbm %s1396_s4, 128 }
0x13a6   :  { %p1148_p9 = scmp.ne.s32.totalorder %s1396_s4, %s1147_s16  ;;  %p1151_p10 = scmp.lt.u32.totalorder %s1147_s16, %s1396_s4 }
0x13a8   :  { %p1153_p11 = pnand %p1151_p10, %p1148_p9 }
0x13aa   :  { %1156 = shalt.err (!%p1153_p11)
}
0x13ab   :  { %861 = dma.vmem_to_hbm [thread:$0]  %s859_s1, 128, %s1396_s4, [#allocation4]  }
0x13ac   :  { %1163 = dma.done.wait [#allocation4], 128  }
0x13ad   :  { %1164 = vsyncadd [#allocation4], 4294967168 }
0x13ae   :  { %865 = vsyncpa [#allocation3], 1 }
0x13af   :  { %866 = vsyncpa [#allocation6], 1 }
0x13b0   :  { %867 = vsyncpa [#allocation9], 1 }
0x13b1   :  { %868 = vsyncpa [#allocation4], 1 }

</bundles_post_ra>
